<compile_context>
chip_gen: v5e
topology: v5e:2x2
jax: 0.10.0
libtpu: 0.0.40
codegen_flags: <defaults>
</compile_context>

<pallas_src>
import math
import functools

import jax
import jax.numpy as jnp
from jax import lax
from jax.experimental import pallas as pl
from jax.experimental.pallas import tpu as pltpu


_VMEM_BUDGET = 12 * 1024 * 1024  # conservative per-kernel working-set budget


# ----------------------------- Pallas kernels ------------------------------

def matmul_bias_fullk_kernel(x_ref, w_ref, b_ref, o_ref):
    """o = x @ w + b with the full K extent resident (2-D grid, no accumulator)."""
    o_ref[...] = (jnp.dot(x_ref[...], w_ref[...],
                          preferred_element_type=jnp.float32)
                  + b_ref[...]).astype(o_ref.dtype)


def matmul_bias_kernel(x_ref, w_ref, b_ref, o_ref, acc_ref):
    """Tiled o = x @ w + b with f32 accumulation. grid = (M/tm, N/tn, K/tk)."""
    k = pl.program_id(2)

    @pl.when(k == 0)
    def _():
        acc_ref[...] = jnp.zeros_like(acc_ref)

    acc_ref[...] += jnp.dot(x_ref[...], w_ref[...],
                            preferred_element_type=jnp.float32)

    @pl.when(k == pl.num_programs(2) - 1)
    def _():
        o_ref[...] = (acc_ref[...] + b_ref[...]).astype(o_ref.dtype)


def lstm_layer_kernel(x_ref, wih_ref, whh_ref, b_ref, out_ref,
                      gx_scr, h_scr, c_scr, *, batch):
    """One LSTM layer over a time tile, with the input projection fused in.

    x_ref:   (tt*B, D)  bf16  time-major input rows for this tile
    wih_ref: (D, 4H)    bf16  W_ih^T (resident, constant block index)
    whh_ref: (H, 4H)    bf16  W_hh^T (resident, constant block index)
    b_ref:   (1, 4H)    f32   b_ih + b_hh
    out_ref: (tt*B, H)        hidden states h_t (flat, time-major)
    gx_scr:  (tt*B, 4H) f32   VMEM scratch for the fused input projection
    h_scr, c_scr: (B, H) f32  recurrent carry; persists across grid steps.
    """
    H = whh_ref.shape[0]
    tt = x_ref.shape[0] // batch

    @pl.when(pl.program_id(0) == 0)
    def _():
        h_scr[...] = jnp.zeros_like(h_scr)
        c_scr[...] = jnp.zeros_like(c_scr)

    # Fused input projection for the whole time tile: one big MXU matmul.
    # (The MXU is otherwise idle during the serial recurrence.)
    gx_scr[...] = (jnp.dot(x_ref[...], wih_ref[...],
                           preferred_element_type=jnp.float32)
                   + b_ref[...])

    whh = whh_ref[...]                        # hoisted loop-invariant load

    def body(t, carry):
        h_prev, c_prev = carry                # carry stays in vregs
        row = pl.multiple_of(t * batch, batch)
        gates = gx_scr[pl.ds(row, batch), :] + jnp.dot(
            h_prev.astype(whh.dtype), whh, preferred_element_type=jnp.float32)
        # PyTorch gate order: i, f, g, o (H is a multiple of 128 -> lane-aligned)
        i_g = jax.nn.sigmoid(gates[:, 0:H])
        f_g = jax.nn.sigmoid(gates[:, H:2 * H])
        g_g = jnp.tanh(gates[:, 2 * H:3 * H])
        o_g = jax.nn.sigmoid(gates[:, 3 * H:4 * H])
        c_new = f_g * c_prev + i_g * g_g
        h_new = o_g * jnp.tanh(c_new)
        out_ref[pl.ds(row, batch), :] = h_new.astype(out_ref.dtype)
        return h_new, c_new

    h_fin, c_fin = lax.fori_loop(0, tt, body, (h_scr[...], c_scr[...]),
                                 unroll=True)
    h_scr[...] = h_fin
    c_scr[...] = c_fin


# ------------------------------ call helpers -------------------------------

def _pick_tile(dim, targets):
    """Largest target (targets must be descending) dividing dim; else full dim."""
    for t in targets:
        if t <= dim and dim % t == 0:
            return t
    return dim  # fall back to full extent (always a legal block)


def matmul_bias(x, w, b, *, out_dtype=jnp.float32):
    """y = x @ w + b, tiled, with megacore-parallel row/column grid axes.

    When the full-K operand tiles fit VMEM the K grid axis is collapsed (no
    accumulator, x tile DMA'd once per row-tile)."""
    M, K = x.shape
    Kw, N = w.shape
    assert K == Kw
    # NOTE: N (vocab) should be a multiple of 128 for lane-dense output blocks;
    # otherwise _pick_tile falls back to a full-extent (masked) block.
    in_bytes = jnp.dtype(x.dtype).itemsize
    out_bytes = jnp.dtype(out_dtype).itemsize
    tm = _pick_tile(M, (512, 256, 128, 64, 32, 16, 8))
    tn = _pick_tile(N, (512, 256, 128))

    full_k_bytes = 2 * (tm * K + K * tn) * in_bytes + 2 * tm * tn * out_bytes
    if full_k_bytes <= _VMEM_BUDGET:
        return pl.pallas_call(
            matmul_bias_fullk_kernel,
            out_shape=jax.ShapeDtypeStruct((M, N), out_dtype),
            grid_spec=pltpu.PrefetchScalarGridSpec(
                num_scalar_prefetch=0,
                grid=(M // tm, N // tn),
                in_specs=[
                    pl.BlockSpec((tm, K), lambda i, j: (i, 0)),
                    pl.BlockSpec((K, tn), lambda i, j: (0, j)),
                    pl.BlockSpec((1, tn), lambda i, j: (0, j)),
                ],
                out_specs=pl.BlockSpec((tm, tn), lambda i, j: (i, j)),
            ),
            compiler_params=pltpu.CompilerParams(
                dimension_semantics=("parallel", "parallel")),
        )(x, w, b)

    tk = _pick_tile(K, (512, 256, 128))
    return pl.pallas_call(
        matmul_bias_kernel,
        out_shape=jax.ShapeDtypeStruct((M, N), out_dtype),
        grid_spec=pltpu.PrefetchScalarGridSpec(
            num_scalar_prefetch=0,
            grid=(M // tm, N // tn, K // tk),
            in_specs=[
                pl.BlockSpec((tm, tk), lambda i, j, k: (i, k)),
                pl.BlockSpec((tk, tn), lambda i, j, k: (k, j)),
                pl.BlockSpec((1, tn), lambda i, j, k: (0, j)),
            ],
            out_specs=pl.BlockSpec((tm, tn), lambda i, j, k: (i, j)),
            scratch_shapes=[pltpu.VMEM((tm, tn), jnp.float32)],
        ),
        compiler_params=pltpu.CompilerParams(
            dimension_semantics=("parallel", "parallel", "arbitrary")),
    )(x, w, b)


def _pick_time_tile(T, batch, D, H, budget=_VMEM_BUDGET):
    """Largest time tile whose working set (resident weights + double-buffered
    x/out tiles + gx scratch) stays under the VMEM budget (v7x-safe)."""
    G = 4 * H
    resident = 2 * (D * G + H * G) * 2 + G * 4 + 2 * batch * H * 4
    for tt in (64, 32, 16, 8, 4, 2, 1):
        if tt <= T and T % tt == 0:
            rows = tt * batch
            need = (resident
                    + 2 * rows * D * 2      # x tile, double-buffered, bf16
                    + 2 * rows * H * 2      # out tile, double-buffered, bf16
                    + rows * G * 4)         # gx scratch, f32
            if need <= budget:
                return tt
    return 1


def lstm_layer(x, wih_t, whh_t, bias, *, batch, out_dtype=jnp.bfloat16):
    """One LSTM layer over flat time-major rows x: (T*B, D) -> (T*B, H)."""
    TB, D = x.shape
    H = whh_t.shape[0]
    G = 4 * H
    T = TB // batch
    tt = _pick_time_tile(T, batch, D, H)
    rows = tt * batch
    return pl.pallas_call(
        functools.partial(lstm_layer_kernel, batch=batch),
        out_shape=jax.ShapeDtypeStruct((TB, H), out_dtype),
        grid_spec=pltpu.PrefetchScalarGridSpec(
            num_scalar_prefetch=0,
            grid=(T // tt,),
            in_specs=[
                pl.BlockSpec((rows, D), lambda i: (i, 0)),
                pl.BlockSpec((D, G), lambda i: (0, 0)),   # resident W_ih^T
                pl.BlockSpec((H, G), lambda i: (0, 0)),   # resident W_hh^T
                pl.BlockSpec((1, G), lambda i: (0, 0)),   # combined bias
            ],
            out_specs=pl.BlockSpec((rows, H), lambda i: (i, 0)),
            scratch_shapes=[pltpu.VMEM((rows, G), jnp.float32),
                            pltpu.VMEM((batch, H), jnp.float32),
                            pltpu.VMEM((batch, H), jnp.float32)],
        ),
        compiler_params=pltpu.CompilerParams(
            dimension_semantics=("arbitrary",)),   # sequential carry in scratch
    )(x, wih_t, whh_t, bias)


# ----------------------------- model (wrapper) ------------------------------

def make_positional_encoding(max_len, d_model):
    position = jnp.arange(max_len, dtype=jnp.float32)[:, None]
    div_term = jnp.exp(jnp.arange(0, d_model, 2, dtype=jnp.float32)
                       * (-math.log(10000.0) / d_model))
    pe = jnp.zeros((max_len, d_model), jnp.float32)
    pe = pe.at[:, 0::2].set(jnp.sin(position * div_term))
    pe = pe.at[:, 1::2].set(jnp.cos(position * div_term))
    return pe[None]  # (1, max_len, d_model)


def init_params(key, vocab_size, d_model, num_layers):
    keys = jax.random.split(key, 2 + 4 * num_layers)
    params = {
        "tok_emb": 0.02 * jax.random.normal(keys[0], (vocab_size, d_model), jnp.float32),
        "out_w": 0.02 * jax.random.normal(keys[1], (vocab_size, d_model), jnp.float32),
        "out_b": jnp.zeros((vocab_size,), jnp.float32),
    }
    k = 1.0 / math.sqrt(d_model)
    lstm = []
    for l in range(num_layers):
        kk = keys[2 + 4 * l: 2 + 4 * (l + 1)]
        w_ih = jax.random.uniform(kk[0], (4 * d_model, d_model), jnp.float32, -k, k)
        w_hh = jax.random.uniform(kk[1], (4 * d_model, d_model), jnp.float32, -k, k)
        b_ih = jax.random.uniform(kk[2], (4 * d_model,), jnp.float32, -k, k)
        b_hh = jax.random.uniform(kk[3], (4 * d_model,), jnp.float32, -k, k)
        lstm.append((w_ih, w_hh, b_ih, b_hh))
    params["lstm"] = lstm
    return params


def prepare_params(params, d_model):
    """One-time prep: fold sqrt(d_model) into the embedding, pre-transpose
    weights, pre-sum biases, cast MXU weights to bf16 (done once, not per call)."""
    prep = {
        "tok_emb_scaled": params["tok_emb"] * math.sqrt(d_model),          # (V, D) f32
        "out_w_t": jnp.transpose(params["out_w"]).astype(jnp.bfloat16),    # (H, V)
        "out_b": params["out_b"][None, :].astype(jnp.float32),             # (1, V)
        "lstm": [],
    }
    for (w_ih, w_hh, b_ih, b_hh) in params["lstm"]:
        prep["lstm"].append((
            jnp.transpose(w_ih).astype(jnp.bfloat16),          # (D, 4H)
            jnp.transpose(w_hh).astype(jnp.bfloat16),          # (H, 4H)
            (b_ih + b_hh)[None, :].astype(jnp.float32),        # (1, 4H)
        ))
    return prep


def gpt_forward(src, prep, pe, d_model):
    """Forward pass.  src: int32 [B, T] token ids -> logits f32 [B, T, vocab]."""
    B, T = src.shape
    H = d_model
    V = prep["out_w_t"].shape[1]

    # Time-major embedding gather (sqrt(d_model) folded into the table) + PE.
    # TODO(synk): embedding gather and dropout stay as glue JAX (dropout = identity).
    x = prep["tok_emb_scaled"][src.T] + pe[0, :T][:, None, :]      # (T, B, D) f32
    x = x.reshape(T * B, H).astype(jnp.bfloat16)                   # flat, time-major

    for (wih_t, whh_t, bias) in prep["lstm"]:
        # Fused input-projection + recurrence; no gx HBM round-trip.
        x = lstm_layer(x, wih_t, whh_t, bias, batch=B,
                       out_dtype=jnp.bfloat16)                     # (T*B, H)

    # Vocab projection.  Transpose the (small) hidden tensor to batch-major so
    # the logits come out directly in (B, T, V) layout.
    h_bt = jnp.transpose(x.reshape(T, B, H), (1, 0, 2)).reshape(B * T, H)
    logits = matmul_bias(h_bt, prep["out_w_t"], prep["out_b"],
                         out_dtype=jnp.float32)                    # (B*T, V)
    return logits.reshape(B, T, V)


# ------------------------------ pure-JAX reference ---------------------------

def ref_forward(src, params, pe, d_model):
    B, T = src.shape
    x = params["tok_emb"][src] * math.sqrt(d_model) + pe[:, :T, :]
    H = d_model
    for (w_ih, w_hh, b_ih, b_hh) in params["lstm"]:
        def step(carry, x_t):
            hp, cp = carry
            gates = x_t @ w_ih.T + b_ih + hp @ w_hh.T + b_hh
            i = jax.nn.sigmoid(gates[:, :H])
            f = jax.nn.sigmoid(gates[:, H:2 * H])
            g = jnp.tanh(gates[:, 2 * H:3 * H])
            o = jax.nn.sigmoid(gates[:, 3 * H:])
            cn = f * cp + i * g
            hn = o * jnp.tanh(cn)
            return (hn, cn), hn
        carry0 = (jnp.zeros((B, H), jnp.float32), jnp.zeros((B, H), jnp.float32))
        _, hs = lax.scan(step, carry0, jnp.transpose(x, (1, 0, 2)))
        x = jnp.transpose(hs, (1, 0, 2))
    return x @ params["out_w"].T + params["out_b"]


# ---------------------------------- main ------------------------------------

if __name__ == "__main__":
    # Small but TPU-aligned shapes: H multiple of 128 (lane), B multiple of 8
    # (sublane), so gate slices and hidden-state stores are full-tile.
    vocab_size, d_model, num_layers = 256, 128, 2
    B, T = 8, 16

    key = jax.random.PRNGKey(0)
    pkey, skey = jax.random.split(key)
    params = init_params(pkey, vocab_size, d_model, num_layers)
    prep = prepare_params(params, d_model)
    src = jax.random.randint(skey, (B, T), 0, vocab_size, dtype=jnp.int32)
    pe = make_positional_encoding(5000, d_model)

    fwd = jax.jit(gpt_forward, static_argnums=(3,))
    logits = jax.block_until_ready(fwd(src, prep, pe, d_model))

    ref = ref_forward(src, params, pe, d_model)
    assert logits.shape == (B, T, vocab_size)
    # bf16 MXU weights/activations vs a pure-f32 reference -> looser tolerance.
    assert jnp.allclose(logits, ref, atol=5e-2, rtol=5e-2), "mismatch vs reference"

    print("KERNEL_OK")
</pallas_src>

<mosaic_0001>
module attributes {stable_mosaic.version = 11 : i64} {
  func.func @lstm_layer_kernel(%arg0: i32, %arg1: memref<128x128xbf16, #tpu.memory_space<vmem>>, %arg2: memref<128x512xbf16, #tpu.memory_space<vmem>>, %arg3: memref<128x512xbf16, #tpu.memory_space<vmem>>, %arg4: memref<1x512xf32, #tpu.memory_space<vmem>>, %arg5: memref<128x128xbf16, #tpu.memory_space<vmem>>, %arg6: memref<128x512xf32, #tpu.memory_space<vmem>>, %arg7: memref<8x128xf32, #tpu.memory_space<vmem>>, %arg8: memref<8x128xf32, #tpu.memory_space<vmem>>) attributes {dimension_semantics = [#tpu.dimension_semantics<arbitrary>], iteration_bounds = array<i64: 1>, scalar_prefetch = 0 : i64, scratch_operands = 3 : i64, tpu.core_type = #tpu.core_type<tc>, window_params = [{transform_indices = @transform_0, window_bounds = array<i64: 128, 128>}, {pipeline_mode = #tpu.pipeline_mode<synchronous>, transform_indices = @transform_1, window_bounds = array<i64: 128, 512>}, {pipeline_mode = #tpu.pipeline_mode<synchronous>, transform_indices = @transform_2, window_bounds = array<i64: 128, 512>}, {pipeline_mode = #tpu.pipeline_mode<synchronous>, transform_indices = @transform_3, window_bounds = array<i64: 1, 512>}, {transform_indices = @transform_4, window_bounds = array<i64: 128, 128>}]} {
    %c0_i32 = arith.constant 0 : i32
    %0 = arith.cmpi eq, %arg0, %c0_i32 : i32
    %1 = arith.extui %0 : i1 to i32
    %c0_i32_0 = arith.constant 0 : i32
    %2 = arith.cmpi ne, %1, %c0_i32_0 : i32
    scf.if %2 {
      %cst_131 = arith.constant 0.000000e+00 : f32
      %575 = vector.broadcast %cst_131 : f32 to vector<8x128xf32>
      %c0_132 = arith.constant 0 : index
      %c0_133 = arith.constant 0 : index
      %576 = vector.load %arg7[%c0_132, %c0_133] : memref<8x128xf32, #tpu.memory_space<vmem>>, vector<8x128xf32>
      tpu.vector_store %arg7[%c0_132, %c0_133], %575 {strides = array<i32>} : memref<8x128xf32, #tpu.memory_space<vmem>>, vector<8x128xf32>,
      %cst_134 = arith.constant 0.000000e+00 : f32
      %577 = vector.broadcast %cst_134 : f32 to vector<8x128xf32>
      %c0_135 = arith.constant 0 : index
      %c0_136 = arith.constant 0 : index
      %578 = vector.load %arg8[%c0_135, %c0_136] : memref<8x128xf32, #tpu.memory_space<vmem>>, vector<8x128xf32>
      tpu.vector_store %arg8[%c0_135, %c0_136], %577 {strides = array<i32>} : memref<8x128xf32, #tpu.memory_space<vmem>>, vector<8x128xf32>,
    } else {
    }
    %c0 = arith.constant 0 : index
    %c0_1 = arith.constant 0 : index
    %3 = vector.load %arg1[%c0, %c0_1] : memref<128x128xbf16, #tpu.memory_space<vmem>>, vector<128x128xbf16>
    %c0_2 = arith.constant 0 : index
    %c0_3 = arith.constant 0 : index
    %4 = vector.load %arg2[%c0_2, %c0_3] : memref<128x512xbf16, #tpu.memory_space<vmem>>, vector<128x512xbf16>
    %cst = arith.constant dense<0.000000e+00> : vector<128x512xf32>
    %5 = tpu.matmul %3, %4, %cst {dimension_numbers = #tpu.dot_dimension_numbers<[1], [0], [0], [1], [0, 0, 1, 1], [], []>} : vector<128x128xbf16>, vector<128x512xbf16>, vector<128x512xf32> -> vector<128x512xf32>
    %c0_4 = arith.constant 0 : index
    %c0_5 = arith.constant 0 : index
    %6 = vector.load %arg4[%c0_4, %c0_5] : memref<1x512xf32, #tpu.memory_space<vmem>>, vector<1x512xf32>
    %7 = vector.broadcast %6 : vector<1x512xf32> to vector<128x512xf32>
    %8 = arith.addf %5, %7 : vector<128x512xf32>
    %c0_6 = arith.constant 0 : index
    %c0_7 = arith.constant 0 : index
    %9 = vector.load %arg6[%c0_6, %c0_7] : memref<128x512xf32, #tpu.memory_space<vmem>>, vector<128x512xf32>
    tpu.vector_store %arg6[%c0_6, %c0_7], %8 {strides = array<i32>} : memref<128x512xf32, #tpu.memory_space<vmem>>, vector<128x512xf32>,
    %c0_8 = arith.constant 0 : index
    %c0_9 = arith.constant 0 : index
    %10 = vector.load %arg3[%c0_8, %c0_9] : memref<128x512xbf16, #tpu.memory_space<vmem>>, vector<128x512xbf16>
    %c0_10 = arith.constant 0 : index
    %c0_11 = arith.constant 0 : index
    %11 = vector.load %arg7[%c0_10, %c0_11] : memref<8x128xf32, #tpu.memory_space<vmem>>, vector<8x128xf32>
    %c0_12 = arith.constant 0 : index
    %c0_13 = arith.constant 0 : index
    %12 = vector.load %arg8[%c0_12, %c0_13] : memref<8x128xf32, #tpu.memory_space<vmem>>, vector<8x128xf32>
    %c0_i32_14 = arith.constant 0 : i32
    %c8_i32 = arith.constant 8 : i32
    %13 = arith.muli %c0_i32_14, %c8_i32 : i32
    %14 = tpu.assume_multiple %13, 8 : i32
    %15 = arith.index_cast %14 : i32 to index
    %c0_15 = arith.constant 0 : index
    %16 = vector.load %arg6[%15, %c0_15] : memref<128x512xf32, #tpu.memory_space<vmem>>, vector<8x512xf32>
    %17 = arith.truncf %11 : vector<8x128xf32> to vector<8x128xbf16>
    %cst_16 = arith.constant dense<0.000000e+00> : vector<8x512xf32>
    %18 = tpu.matmul %17, %10, %cst_16 {dimension_numbers = #tpu.dot_dimension_numbers<[1], [0], [0], [1], [0, 0, 1, 1], [], []>} : vector<8x128xbf16>, vector<128x512xbf16>, vector<8x512xf32> -> vector<8x512xf32>
    %19 = arith.addf %16, %18 : vector<8x512xf32>
    %20 = vector.extract_strided_slice %19 {offsets = [0, 0], sizes = [8, 128], strides = [1, 1]} : vector<8x512xf32> to vector<8x128xf32>
    %21 = arith.negf %20 : vector<8x128xf32>
    %22 = math.exp %21 : vector<8x128xf32>
    %cst_17 = arith.constant 1.000000e+00 : f32
    %23 = vector.broadcast %cst_17 : f32 to vector<8x128xf32>
    %24 = arith.addf %23, %22 : vector<8x128xf32>
    %25 = arith.divf %23, %24 : vector<8x128xf32>
    %26 = vector.extract_strided_slice %19 {offsets = [0, 128], sizes = [8, 128], strides = [1, 1]} : vector<8x512xf32> to vector<8x128xf32>
    %27 = arith.negf %26 : vector<8x128xf32>
    %28 = math.exp %27 : vector<8x128xf32>
    %cst_18 = arith.constant 1.000000e+00 : f32
    %29 = vector.broadcast %cst_18 : f32 to vector<8x128xf32>
    %30 = arith.addf %29, %28 : vector<8x128xf32>
    %31 = arith.divf %29, %30 : vector<8x128xf32>
    %32 = vector.extract_strided_slice %19 {offsets = [0, 256], sizes = [8, 128], strides = [1, 1]} : vector<8x512xf32> to vector<8x128xf32>
    %33 = math.tanh %32 : vector<8x128xf32>
    %34 = vector.extract_strided_slice %19 {offsets = [0, 384], sizes = [8, 128], strides = [1, 1]} : vector<8x512xf32> to vector<8x128xf32>
    %35 = arith.negf %34 : vector<8x128xf32>
    %36 = math.exp %35 : vector<8x128xf32>
    %cst_19 = arith.constant 1.000000e+00 : f32
    %37 = vector.broadcast %cst_19 : f32 to vector<8x128xf32>
    %38 = arith.addf %37, %36 : vector<8x128xf32>
    %39 = arith.divf %37, %38 : vector<8x128xf32>
    %40 = arith.mulf %31, %12 : vector<8x128xf32>
    %41 = arith.mulf %25, %33 : vector<8x128xf32>
    %42 = arith.addf %40, %41 : vector<8x128xf32>
    %43 = math.tanh %42 : vector<8x128xf32>
    %44 = arith.mulf %39, %43 : vector<8x128xf32>
    %45 = arith.truncf %44 : vector<8x128xf32> to vector<8x128xbf16>
    %46 = arith.index_cast %14 : i32 to index
    %c0_20 = arith.constant 0 : index
    %47 = vector.load %arg5[%46, %c0_20] : memref<128x128xbf16, #tpu.memory_space<vmem>>, vector<8x128xbf16>
    tpu.vector_store %arg5[%46, %c0_20], %45 {strides = array<i32>} : memref<128x128xbf16, #tpu.memory_space<vmem>>, vector<8x128xbf16>,
    %c1_i32 = arith.constant 1 : i32
    %c8_i32_21 = arith.constant 8 : i32
    %48 = arith.muli %c1_i32, %c8_i32_21 : i32
    %49 = tpu.assume_multiple %48, 8 : i32
    %50 = arith.index_cast %49 : i32 to index
    %c0_22 = arith.constant 0 : index
    %51 = vector.load %arg6[%50, %c0_22] : memref<128x512xf32, #tpu.memory_space<vmem>>, vector<8x512xf32>
    %52 = arith.truncf %44 : vector<8x128xf32> to vector<8x128xbf16>
    %cst_23 = arith.constant dense<0.000000e+00> : vector<8x512xf32>
    %53 = tpu.matmul %52, %10, %cst_23 {dimension_numbers = #tpu.dot_dimension_numbers<[1], [0], [0], [1], [0, 0, 1, 1], [], []>} : vector<8x128xbf16>, vector<128x512xbf16>, vector<8x512xf32> -> vector<8x512xf32>
    %54 = arith.addf %51, %53 : vector<8x512xf32>
    %55 = vector.extract_strided_slice %54 {offsets = [0, 0], sizes = [8, 128], strides = [1, 1]} : vector<8x512xf32> to vector<8x128xf32>
    %56 = arith.negf %55 : vector<8x128xf32>
    %57 = math.exp %56 : vector<8x128xf32>
    %cst_24 = arith.constant 1.000000e+00 : f32
    %58 = vector.broadcast %cst_24 : f32 to vector<8x128xf32>
    %59 = arith.addf %58, %57 : vector<8x128xf32>
    %60 = arith.divf %58, %59 : vector<8x128xf32>
    %61 = vector.extract_strided_slice %54 {offsets = [0, 128], sizes = [8, 128], strides = [1, 1]} : vector<8x512xf32> to vector<8x128xf32>
    %62 = arith.negf %61 : vector<8x128xf32>
    %63 = math.exp %62 : vector<8x128xf32>
    %cst_25 = arith.constant 1.000000e+00 : f32
    %64 = vector.broadcast %cst_25 : f32 to vector<8x128xf32>
    %65 = arith.addf %64, %63 : vector<8x128xf32>
    %66 = arith.divf %64, %65 : vector<8x128xf32>
    %67 = vector.extract_strided_slice %54 {offsets = [0, 256], sizes = [8, 128], strides = [1, 1]} : vector<8x512xf32> to vector<8x128xf32>
    %68 = math.tanh %67 : vector<8x128xf32>
    %69 = vector.extract_strided_slice %54 {offsets = [0, 384], sizes = [8, 128], strides = [1, 1]} : vector<8x512xf32> to vector<8x128xf32>
    %70 = arith.negf %69 : vector<8x128xf32>
    %71 = math.exp %70 : vector<8x128xf32>
    %cst_26 = arith.constant 1.000000e+00 : f32
    %72 = vector.broadcast %cst_26 : f32 to vector<8x128xf32>
    %73 = arith.addf %72, %71 : vector<8x128xf32>
    %74 = arith.divf %72, %73 : vector<8x128xf32>
    %75 = arith.mulf %66, %42 : vector<8x128xf32>
    %76 = arith.mulf %60, %68 : vector<8x128xf32>
    %77 = arith.addf %75, %76 : vector<8x128xf32>
    %78 = math.tanh %77 : vector<8x128xf32>
    %79 = arith.mulf %74, %78 : vector<8x128xf32>
    %80 = arith.truncf %79 : vector<8x128xf32> to vector<8x128xbf16>
    %81 = arith.index_cast %49 : i32 to index
    %c0_27 = arith.constant 0 : index
    %82 = vector.load %arg5[%81, %c0_27] : memref<128x128xbf16, #tpu.memory_space<vmem>>, vector<8x128xbf16>
    tpu.vector_store %arg5[%81, %c0_27], %80 {strides = array<i32>} : memref<128x128xbf16, #tpu.memory_space<vmem>>, vector<8x128xbf16>,
    %c2_i32 = arith.constant 2 : i32
    %c8_i32_28 = arith.constant 8 : i32
    %83 = arith.muli %c2_i32, %c8_i32_28 : i32
    %84 = tpu.assume_multiple %83, 8 : i32
    %85 = arith.index_cast %84 : i32 to index
    %c0_29 = arith.constant 0 : index
    %86 = vector.load %arg6[%85, %c0_29] : memref<128x512xf32, #tpu.memory_space<vmem>>, vector<8x512xf32>
    %87 = arith.truncf %79 : vector<8x128xf32> to vector<8x128xbf16>
    %cst_30 = arith.constant dense<0.000000e+00> : vector<8x512xf32>
    %88 = tpu.matmul %87, %10, %cst_30 {dimension_numbers = #tpu.dot_dimension_numbers<[1], [0], [0], [1], [0, 0, 1, 1], [], []>} : vector<8x128xbf16>, vector<128x512xbf16>, vector<8x512xf32> -> vector<8x512xf32>
    %89 = arith.addf %86, %88 : vector<8x512xf32>
    %90 = vector.extract_strided_slice %89 {offsets = [0, 0], sizes = [8, 128], strides = [1, 1]} : vector<8x512xf32> to vector<8x128xf32>
    %91 = arith.negf %90 : vector<8x128xf32>
    %92 = math.exp %91 : vector<8x128xf32>
    %cst_31 = arith.constant 1.000000e+00 : f32
    %93 = vector.broadcast %cst_31 : f32 to vector<8x128xf32>
    %94 = arith.addf %93, %92 : vector<8x128xf32>
    %95 = arith.divf %93, %94 : vector<8x128xf32>
    %96 = vector.extract_strided_slice %89 {offsets = [0, 128], sizes = [8, 128], strides = [1, 1]} : vector<8x512xf32> to vector<8x128xf32>
    %97 = arith.negf %96 : vector<8x128xf32>
    %98 = math.exp %97 : vector<8x128xf32>
    %cst_32 = arith.constant 1.000000e+00 : f32
    %99 = vector.broadcast %cst_32 : f32 to vector<8x128xf32>
    %100 = arith.addf %99, %98 : vector<8x128xf32>
    %101 = arith.divf %99, %100 : vector<8x128xf32>
    %102 = vector.extract_strided_slice %89 {offsets = [0, 256], sizes = [8, 128], strides = [1, 1]} : vector<8x512xf32> to vector<8x128xf32>
    %103 = math.tanh %102 : vector<8x128xf32>
    %104 = vector.extract_strided_slice %89 {offsets = [0, 384], sizes = [8, 128], strides = [1, 1]} : vector<8x512xf32> to vector<8x128xf32>
    %105 = arith.negf %104 : vector<8x128xf32>
    %106 = math.exp %105 : vector<8x128xf32>
    %cst_33 = arith.constant 1.000000e+00 : f32
    %107 = vector.broadcast %cst_33 : f32 to vector<8x128xf32>
    %108 = arith.addf %107, %106 : vector<8x128xf32>
    %109 = arith.divf %107, %108 : vector<8x128xf32>
    %110 = arith.mulf %101, %77 : vector<8x128xf32>
    %111 = arith.mulf %95, %103 : vector<8x128xf32>
    %112 = arith.addf %110, %111 : vector<8x128xf32>
    %113 = math.tanh %112 : vector<8x128xf32>
    %114 = arith.mulf %109, %113 : vector<8x128xf32>
    %115 = arith.truncf %114 : vector<8x128xf32> to vector<8x128xbf16>
    %116 = arith.index_cast %84 : i32 to index
    %c0_34 = arith.constant 0 : index
    %117 = vector.load %arg5[%116, %c0_34] : memref<128x128xbf16, #tpu.memory_space<vmem>>, vector<8x128xbf16>
    tpu.vector_store %arg5[%116, %c0_34], %115 {strides = array<i32>} : memref<128x128xbf16, #tpu.memory_space<vmem>>, vector<8x128xbf16>,
    %c3_i32 = arith.constant 3 : i32
    %c8_i32_35 = arith.constant 8 : i32
    %118 = arith.muli %c3_i32, %c8_i32_35 : i32
    %119 = tpu.assume_multiple %118, 8 : i32
    %120 = arith.index_cast %119 : i32 to index
    %c0_36 = arith.constant 0 : index
    %121 = vector.load %arg6[%120, %c0_36] : memref<128x512xf32, #tpu.memory_space<vmem>>, vector<8x512xf32>
    %122 = arith.truncf %114 : vector<8x128xf32> to vector<8x128xbf16>
    %cst_37 = arith.constant dense<0.000000e+00> : vector<8x512xf32>
    %123 = tpu.matmul %122, %10, %cst_37 {dimension_numbers = #tpu.dot_dimension_numbers<[1], [0], [0], [1], [0, 0, 1, 1], [], []>} : vector<8x128xbf16>, vector<128x512xbf16>, vector<8x512xf32> -> vector<8x512xf32>
    %124 = arith.addf %121, %123 : vector<8x512xf32>
    %125 = vector.extract_strided_slice %124 {offsets = [0, 0], sizes = [8, 128], strides = [1, 1]} : vector<8x512xf32> to vector<8x128xf32>
    %126 = arith.negf %125 : vector<8x128xf32>
    %127 = math.exp %126 : vector<8x128xf32>
    %cst_38 = arith.constant 1.000000e+00 : f32
    %128 = vector.broadcast %cst_38 : f32 to vector<8x128xf32>
    %129 = arith.addf %128, %127 : vector<8x128xf32>
    %130 = arith.divf %128, %129 : vector<8x128xf32>
    %131 = vector.extract_strided_slice %124 {offsets = [0, 128], sizes = [8, 128], strides = [1, 1]} : vector<8x512xf32> to vector<8x128xf32>
    %132 = arith.negf %131 : vector<8x128xf32>
    %133 = math.exp %132 : vector<8x128xf32>
    %cst_39 = arith.constant 1.000000e+00 : f32
    %134 = vector.broadcast %cst_39 : f32 to vector<8x128xf32>
    %135 = arith.addf %134, %133 : vector<8x128xf32>
    %136 = arith.divf %134, %135 : vector<8x128xf32>
    %137 = vector.extract_strided_slice %124 {offsets = [0, 256], sizes = [8, 128], strides = [1, 1]} : vector<8x512xf32> to vector<8x128xf32>
    %138 = math.tanh %137 : vector<8x128xf32>
    %139 = vector.extract_strided_slice %124 {offsets = [0, 384], sizes = [8, 128], strides = [1, 1]} : vector<8x512xf32> to vector<8x128xf32>
    %140 = arith.negf %139 : vector<8x128xf32>
    %141 = math.exp %140 : vector<8x128xf32>
    %cst_40 = arith.constant 1.000000e+00 : f32
    %142 = vector.broadcast %cst_40 : f32 to vector<8x128xf32>
    %143 = arith.addf %142, %141 : vector<8x128xf32>
    %144 = arith.divf %142, %143 : vector<8x128xf32>
    %145 = arith.mulf %136, %112 : vector<8x128xf32>
    %146 = arith.mulf %130, %138 : vector<8x128xf32>
    %147 = arith.addf %145, %146 : vector<8x128xf32>
    %148 = math.tanh %147 : vector<8x128xf32>
    %149 = arith.mulf %144, %148 : vector<8x128xf32>
    %150 = arith.truncf %149 : vector<8x128xf32> to vector<8x128xbf16>
    %151 = arith.index_cast %119 : i32 to index
    %c0_41 = arith.constant 0 : index
    %152 = vector.load %arg5[%151, %c0_41] : memref<128x128xbf16, #tpu.memory_space<vmem>>, vector<8x128xbf16>
    tpu.vector_store %arg5[%151, %c0_41], %150 {strides = array<i32>} : memref<128x128xbf16, #tpu.memory_space<vmem>>, vector<8x128xbf16>,
    %c4_i32 = arith.constant 4 : i32
    %c8_i32_42 = arith.constant 8 : i32
    %153 = arith.muli %c4_i32, %c8_i32_42 : i32
    %154 = tpu.assume_multiple %153, 8 : i32
    %155 = arith.index_cast %154 : i32 to index
    %c0_43 = arith.constant 0 : index
    %156 = vector.load %arg6[%155, %c0_43] : memref<128x512xf32, #tpu.memory_space<vmem>>, vector<8x512xf32>
    %157 = arith.truncf %149 : vector<8x128xf32> to vector<8x128xbf16>
    %cst_44 = arith.constant dense<0.000000e+00> : vector<8x512xf32>
    %158 = tpu.matmul %157, %10, %cst_44 {dimension_numbers = #tpu.dot_dimension_numbers<[1], [0], [0], [1], [0, 0, 1, 1], [], []>} : vector<8x128xbf16>, vector<128x512xbf16>, vector<8x512xf32> -> vector<8x512xf32>
    %159 = arith.addf %156, %158 : vector<8x512xf32>
    %160 = vector.extract_strided_slice %159 {offsets = [0, 0], sizes = [8, 128], strides = [1, 1]} : vector<8x512xf32> to vector<8x128xf32>
    %161 = arith.negf %160 : vector<8x128xf32>
    %162 = math.exp %161 : vector<8x128xf32>
    %cst_45 = arith.constant 1.000000e+00 : f32
    %163 = vector.broadcast %cst_45 : f32 to vector<8x128xf32>
    %164 = arith.addf %163, %162 : vector<8x128xf32>
    %165 = arith.divf %163, %164 : vector<8x128xf32>
    %166 = vector.extract_strided_slice %159 {offsets = [0, 128], sizes = [8, 128], strides = [1, 1]} : vector<8x512xf32> to vector<8x128xf32>
    %167 = arith.negf %166 : vector<8x128xf32>
    %168 = math.exp %167 : vector<8x128xf32>
    %cst_46 = arith.constant 1.000000e+00 : f32
    %169 = vector.broadcast %cst_46 : f32 to vector<8x128xf32>
    %170 = arith.addf %169, %168 : vector<8x128xf32>
    %171 = arith.divf %169, %170 : vector<8x128xf32>
    %172 = vector.extract_strided_slice %159 {offsets = [0, 256], sizes = [8, 128], strides = [1, 1]} : vector<8x512xf32> to vector<8x128xf32>
    %173 = math.tanh %172 : vector<8x128xf32>
    %174 = vector.extract_strided_slice %159 {offsets = [0, 384], sizes = [8, 128], strides = [1, 1]} : vector<8x512xf32> to vector<8x128xf32>
    %175 = arith.negf %174 : vector<8x128xf32>
    %176 = math.exp %175 : vector<8x128xf32>
    %cst_47 = arith.constant 1.000000e+00 : f32
    %177 = vector.broadcast %cst_47 : f32 to vector<8x128xf32>
    %178 = arith.addf %177, %176 : vector<8x128xf32>
    %179 = arith.divf %177, %178 : vector<8x128xf32>
    %180 = arith.mulf %171, %147 : vector<8x128xf32>
    %181 = arith.mulf %165, %173 : vector<8x128xf32>
    %182 = arith.addf %180, %181 : vector<8x128xf32>
    %183 = math.tanh %182 : vector<8x128xf32>
    %184 = arith.mulf %179, %183 : vector<8x128xf32>
    %185 = arith.truncf %184 : vector<8x128xf32> to vector<8x128xbf16>
    %186 = arith.index_cast %154 : i32 to index
    %c0_48 = arith.constant 0 : index
    %187 = vector.load %arg5[%186, %c0_48] : memref<128x128xbf16, #tpu.memory_space<vmem>>, vector<8x128xbf16>
    tpu.vector_store %arg5[%186, %c0_48], %185 {strides = array<i32>} : memref<128x128xbf16, #tpu.memory_space<vmem>>, vector<8x128xbf16>,
    %c5_i32 = arith.constant 5 : i32
    %c8_i32_49 = arith.constant 8 : i32
    %188 = arith.muli %c5_i32, %c8_i32_49 : i32
    %189 = tpu.assume_multiple %188, 8 : i32
    %190 = arith.index_cast %189 : i32 to index
    %c0_50 = arith.constant 0 : index
    %191 = vector.load %arg6[%190, %c0_50] : memref<128x512xf32, #tpu.memory_space<vmem>>, vector<8x512xf32>
    %192 = arith.truncf %184 : vector<8x128xf32> to vector<8x128xbf16>
    %cst_51 = arith.constant dense<0.000000e+00> : vector<8x512xf32>
    %193 = tpu.matmul %192, %10, %cst_51 {dimension_numbers = #tpu.dot_dimension_numbers<[1], [0], [0], [1], [0, 0, 1, 1], [], []>} : vector<8x128xbf16>, vector<128x512xbf16>, vector<8x512xf32> -> vector<8x512xf32>
    %194 = arith.addf %191, %193 : vector<8x512xf32>
    %195 = vector.extract_strided_slice %194 {offsets = [0, 0], sizes = [8, 128], strides = [1, 1]} : vector<8x512xf32> to vector<8x128xf32>
    %196 = arith.negf %195 : vector<8x128xf32>
    %197 = math.exp %196 : vector<8x128xf32>
    %cst_52 = arith.constant 1.000000e+00 : f32
    %198 = vector.broadcast %cst_52 : f32 to vector<8x128xf32>
    %199 = arith.addf %198, %197 : vector<8x128xf32>
    %200 = arith.divf %198, %199 : vector<8x128xf32>
    %201 = vector.extract_strided_slice %194 {offsets = [0, 128], sizes = [8, 128], strides = [1, 1]} : vector<8x512xf32> to vector<8x128xf32>
    %202 = arith.negf %201 : vector<8x128xf32>
    %203 = math.exp %202 : vector<8x128xf32>
    %cst_53 = arith.constant 1.000000e+00 : f32
    %204 = vector.broadcast %cst_53 : f32 to vector<8x128xf32>
    %205 = arith.addf %204, %203 : vector<8x128xf32>
    %206 = arith.divf %204, %205 : vector<8x128xf32>
    %207 = vector.extract_strided_slice %194 {offsets = [0, 256], sizes = [8, 128], strides = [1, 1]} : vector<8x512xf32> to vector<8x128xf32>
    %208 = math.tanh %207 : vector<8x128xf32>
    %209 = vector.extract_strided_slice %194 {offsets = [0, 384], sizes = [8, 128], strides = [1, 1]} : vector<8x512xf32> to vector<8x128xf32>
    %210 = arith.negf %209 : vector<8x128xf32>
    %211 = math.exp %210 : vector<8x128xf32>
    %cst_54 = arith.constant 1.000000e+00 : f32
    %212 = vector.broadcast %cst_54 : f32 to vector<8x128xf32>
    %213 = arith.addf %212, %211 : vector<8x128xf32>
    %214 = arith.divf %212, %213 : vector<8x128xf32>
    %215 = arith.mulf %206, %182 : vector<8x128xf32>
    %216 = arith.mulf %200, %208 : vector<8x128xf32>
    %217 = arith.addf %215, %216 : vector<8x128xf32>
    %218 = math.tanh %217 : vector<8x128xf32>
    %219 = arith.mulf %214, %218 : vector<8x128xf32>
    %220 = arith.truncf %219 : vector<8x128xf32> to vector<8x128xbf16>
    %221 = arith.index_cast %189 : i32 to index
    %c0_55 = arith.constant 0 : index
    %222 = vector.load %arg5[%221, %c0_55] : memref<128x128xbf16, #tpu.memory_space<vmem>>, vector<8x128xbf16>
    tpu.vector_store %arg5[%221, %c0_55], %220 {strides = array<i32>} : memref<128x128xbf16, #tpu.memory_space<vmem>>, vector<8x128xbf16>,
    %c6_i32 = arith.constant 6 : i32
    %c8_i32_56 = arith.constant 8 : i32
    %223 = arith.muli %c6_i32, %c8_i32_56 : i32
    %224 = tpu.assume_multiple %223, 8 : i32
    %225 = arith.index_cast %224 : i32 to index
    %c0_57 = arith.constant 0 : index
    %226 = vector.load %arg6[%225, %c0_57] : memref<128x512xf32, #tpu.memory_space<vmem>>, vector<8x512xf32>
    %227 = arith.truncf %219 : vector<8x128xf32> to vector<8x128xbf16>
    %cst_58 = arith.constant dense<0.000000e+00> : vector<8x512xf32>
    %228 = tpu.matmul %227, %10, %cst_58 {dimension_numbers = #tpu.dot_dimension_numbers<[1], [0], [0], [1], [0, 0, 1, 1], [], []>} : vector<8x128xbf16>, vector<128x512xbf16>, vector<8x512xf32> -> vector<8x512xf32>
    %229 = arith.addf %226, %228 : vector<8x512xf32>
    %230 = vector.extract_strided_slice %229 {offsets = [0, 0], sizes = [8, 128], strides = [1, 1]} : vector<8x512xf32> to vector<8x128xf32>
    %231 = arith.negf %230 : vector<8x128xf32>
    %232 = math.exp %231 : vector<8x128xf32>
    %cst_59 = arith.constant 1.000000e+00 : f32
    %233 = vector.broadcast %cst_59 : f32 to vector<8x128xf32>
    %234 = arith.addf %233, %232 : vector<8x128xf32>
    %235 = arith.divf %233, %234 : vector<8x128xf32>
    %236 = vector.extract_strided_slice %229 {offsets = [0, 128], sizes = [8, 128], strides = [1, 1]} : vector<8x512xf32> to vector<8x128xf32>
    %237 = arith.negf %236 : vector<8x128xf32>
    %238 = math.exp %237 : vector<8x128xf32>
    %cst_60 = arith.constant 1.000000e+00 : f32
    %239 = vector.broadcast %cst_60 : f32 to vector<8x128xf32>
    %240 = arith.addf %239, %238 : vector<8x128xf32>
    %241 = arith.divf %239, %240 : vector<8x128xf32>
    %242 = vector.extract_strided_slice %229 {offsets = [0, 256], sizes = [8, 128], strides = [1, 1]} : vector<8x512xf32> to vector<8x128xf32>
    %243 = math.tanh %242 : vector<8x128xf32>
    %244 = vector.extract_strided_slice %229 {offsets = [0, 384], sizes = [8, 128], strides = [1, 1]} : vector<8x512xf32> to vector<8x128xf32>
    %245 = arith.negf %244 : vector<8x128xf32>
    %246 = math.exp %245 : vector<8x128xf32>
    %cst_61 = arith.constant 1.000000e+00 : f32
    %247 = vector.broadcast %cst_61 : f32 to vector<8x128xf32>
    %248 = arith.addf %247, %246 : vector<8x128xf32>
    %249 = arith.divf %247, %248 : vector<8x128xf32>
    %250 = arith.mulf %241, %217 : vector<8x128xf32>
    %251 = arith.mulf %235, %243 : vector<8x128xf32>
    %252 = arith.addf %250, %251 : vector<8x128xf32>
    %253 = math.tanh %252 : vector<8x128xf32>
    %254 = arith.mulf %249, %253 : vector<8x128xf32>
    %255 = arith.truncf %254 : vector<8x128xf32> to vector<8x128xbf16>
    %256 = arith.index_cast %224 : i32 to index
    %c0_62 = arith.constant 0 : index
    %257 = vector.load %arg5[%256, %c0_62] : memref<128x128xbf16, #tpu.memory_space<vmem>>, vector<8x128xbf16>
    tpu.vector_store %arg5[%256, %c0_62], %255 {strides = array<i32>} : memref<128x128xbf16, #tpu.memory_space<vmem>>, vector<8x128xbf16>,
    %c7_i32 = arith.constant 7 : i32
    %c8_i32_63 = arith.constant 8 : i32
    %258 = arith.muli %c7_i32, %c8_i32_63 : i32
    %259 = tpu.assume_multiple %258, 8 : i32
    %260 = arith.index_cast %259 : i32 to index
    %c0_64 = arith.constant 0 : index
    %261 = vector.load %arg6[%260, %c0_64] : memref<128x512xf32, #tpu.memory_space<vmem>>, vector<8x512xf32>
    %262 = arith.truncf %254 : vector<8x128xf32> to vector<8x128xbf16>
    %cst_65 = arith.constant dense<0.000000e+00> : vector<8x512xf32>
    %263 = tpu.matmul %262, %10, %cst_65 {dimension_numbers = #tpu.dot_dimension_numbers<[1], [0], [0], [1], [0, 0, 1, 1], [], []>} : vector<8x128xbf16>, vector<128x512xbf16>, vector<8x512xf32> -> vector<8x512xf32>
    %264 = arith.addf %261, %263 : vector<8x512xf32>
    %265 = vector.extract_strided_slice %264 {offsets = [0, 0], sizes = [8, 128], strides = [1, 1]} : vector<8x512xf32> to vector<8x128xf32>
    %266 = arith.negf %265 : vector<8x128xf32>
    %267 = math.exp %266 : vector<8x128xf32>
    %cst_66 = arith.constant 1.000000e+00 : f32
    %268 = vector.broadcast %cst_66 : f32 to vector<8x128xf32>
    %269 = arith.addf %268, %267 : vector<8x128xf32>
    %270 = arith.divf %268, %269 : vector<8x128xf32>
    %271 = vector.extract_strided_slice %264 {offsets = [0, 128], sizes = [8, 128], strides = [1, 1]} : vector<8x512xf32> to vector<8x128xf32>
    %272 = arith.negf %271 : vector<8x128xf32>
    %273 = math.exp %272 : vector<8x128xf32>
    %cst_67 = arith.constant 1.000000e+00 : f32
    %274 = vector.broadcast %cst_67 : f32 to vector<8x128xf32>
    %275 = arith.addf %274, %273 : vector<8x128xf32>
    %276 = arith.divf %274, %275 : vector<8x128xf32>
    %277 = vector.extract_strided_slice %264 {offsets = [0, 256], sizes = [8, 128], strides = [1, 1]} : vector<8x512xf32> to vector<8x128xf32>
    %278 = math.tanh %277 : vector<8x128xf32>
    %279 = vector.extract_strided_slice %264 {offsets = [0, 384], sizes = [8, 128], strides = [1, 1]} : vector<8x512xf32> to vector<8x128xf32>
    %280 = arith.negf %279 : vector<8x128xf32>
    %281 = math.exp %280 : vector<8x128xf32>
    %cst_68 = arith.constant 1.000000e+00 : f32
    %282 = vector.broadcast %cst_68 : f32 to vector<8x128xf32>
    %283 = arith.addf %282, %281 : vector<8x128xf32>
    %284 = arith.divf %282, %283 : vector<8x128xf32>
    %285 = arith.mulf %276, %252 : vector<8x128xf32>
    %286 = arith.mulf %270, %278 : vector<8x128xf32>
    %287 = arith.addf %285, %286 : vector<8x128xf32>
    %288 = math.tanh %287 : vector<8x128xf32>
    %289 = arith.mulf %284, %288 : vector<8x128xf32>
    %290 = arith.truncf %289 : vector<8x128xf32> to vector<8x128xbf16>
    %291 = arith.index_cast %259 : i32 to index
    %c0_69 = arith.constant 0 : index
    %292 = vector.load %arg5[%291, %c0_69] : memref<128x128xbf16, #tpu.memory_space<vmem>>, vector<8x128xbf16>
    tpu.vector_store %arg5[%291, %c0_69], %290 {strides = array<i32>} : memref<128x128xbf16, #tpu.memory_space<vmem>>, vector<8x128xbf16>,
    %c8_i32_70 = arith.constant 8 : i32
    %c8_i32_71 = arith.constant 8 : i32
    %293 = arith.muli %c8_i32_70, %c8_i32_71 : i32
    %294 = tpu.assume_multiple %293, 8 : i32
    %295 = arith.index_cast %294 : i32 to index
    %c0_72 = arith.constant 0 : index
    %296 = vector.load %arg6[%295, %c0_72] : memref<128x512xf32, #tpu.memory_space<vmem>>, vector<8x512xf32>
    %297 = arith.truncf %289 : vector<8x128xf32> to vector<8x128xbf16>
    %cst_73 = arith.constant dense<0.000000e+00> : vector<8x512xf32>
    %298 = tpu.matmul %297, %10, %cst_73 {dimension_numbers = #tpu.dot_dimension_numbers<[1], [0], [0], [1], [0, 0, 1, 1], [], []>} : vector<8x128xbf16>, vector<128x512xbf16>, vector<8x512xf32> -> vector<8x512xf32>
    %299 = arith.addf %296, %298 : vector<8x512xf32>
    %300 = vector.extract_strided_slice %299 {offsets = [0, 0], sizes = [8, 128], strides = [1, 1]} : vector<8x512xf32> to vector<8x128xf32>
    %301 = arith.negf %300 : vector<8x128xf32>
    %302 = math.exp %301 : vector<8x128xf32>
    %cst_74 = arith.constant 1.000000e+00 : f32
    %303 = vector.broadcast %cst_74 : f32 to vector<8x128xf32>
    %304 = arith.addf %303, %302 : vector<8x128xf32>
    %305 = arith.divf %303, %304 : vector<8x128xf32>
    %306 = vector.extract_strided_slice %299 {offsets = [0, 128], sizes = [8, 128], strides = [1, 1]} : vector<8x512xf32> to vector<8x128xf32>
    %307 = arith.negf %306 : vector<8x128xf32>
    %308 = math.exp %307 : vector<8x128xf32>
    %cst_75 = arith.constant 1.000000e+00 : f32
    %309 = vector.broadcast %cst_75 : f32 to vector<8x128xf32>
    %310 = arith.addf %309, %308 : vector<8x128xf32>
    %311 = arith.divf %309, %310 : vector<8x128xf32>
    %312 = vector.extract_strided_slice %299 {offsets = [0, 256], sizes = [8, 128], strides = [1, 1]} : vector<8x512xf32> to vector<8x128xf32>
    %313 = math.tanh %312 : vector<8x128xf32>
    %314 = vector.extract_strided_slice %299 {offsets = [0, 384], sizes = [8, 128], strides = [1, 1]} : vector<8x512xf32> to vector<8x128xf32>
    %315 = arith.negf %314 : vector<8x128xf32>
    %316 = math.exp %315 : vector<8x128xf32>
    %cst_76 = arith.constant 1.000000e+00 : f32
    %317 = vector.broadcast %cst_76 : f32 to vector<8x128xf32>
    %318 = arith.addf %317, %316 : vector<8x128xf32>
    %319 = arith.divf %317, %318 : vector<8x128xf32>
    %320 = arith.mulf %311, %287 : vector<8x128xf32>
    %321 = arith.mulf %305, %313 : vector<8x128xf32>
    %322 = arith.addf %320, %321 : vector<8x128xf32>
    %323 = math.tanh %322 : vector<8x128xf32>
    %324 = arith.mulf %319, %323 : vector<8x128xf32>
    %325 = arith.truncf %324 : vector<8x128xf32> to vector<8x128xbf16>
    %326 = arith.index_cast %294 : i32 to index
    %c0_77 = arith.constant 0 : index
    %327 = vector.load %arg5[%326, %c0_77] : memref<128x128xbf16, #tpu.memory_space<vmem>>, vector<8x128xbf16>
    tpu.vector_store %arg5[%326, %c0_77], %325 {strides = array<i32>} : memref<128x128xbf16, #tpu.memory_space<vmem>>, vector<8x128xbf16>,
    %c9_i32 = arith.constant 9 : i32
    %c8_i32_78 = arith.constant 8 : i32
    %328 = arith.muli %c9_i32, %c8_i32_78 : i32
    %329 = tpu.assume_multiple %328, 8 : i32
    %330 = arith.index_cast %329 : i32 to index
    %c0_79 = arith.constant 0 : index
    %331 = vector.load %arg6[%330, %c0_79] : memref<128x512xf32, #tpu.memory_space<vmem>>, vector<8x512xf32>
    %332 = arith.truncf %324 : vector<8x128xf32> to vector<8x128xbf16>
    %cst_80 = arith.constant dense<0.000000e+00> : vector<8x512xf32>
    %333 = tpu.matmul %332, %10, %cst_80 {dimension_numbers = #tpu.dot_dimension_numbers<[1], [0], [0], [1], [0, 0, 1, 1], [], []>} : vector<8x128xbf16>, vector<128x512xbf16>, vector<8x512xf32> -> vector<8x512xf32>
    %334 = arith.addf %331, %333 : vector<8x512xf32>
    %335 = vector.extract_strided_slice %334 {offsets = [0, 0], sizes = [8, 128], strides = [1, 1]} : vector<8x512xf32> to vector<8x128xf32>
    %336 = arith.negf %335 : vector<8x128xf32>
    %337 = math.exp %336 : vector<8x128xf32>
    %cst_81 = arith.constant 1.000000e+00 : f32
    %338 = vector.broadcast %cst_81 : f32 to vector<8x128xf32>
    %339 = arith.addf %338, %337 : vector<8x128xf32>
    %340 = arith.divf %338, %339 : vector<8x128xf32>
    %341 = vector.extract_strided_slice %334 {offsets = [0, 128], sizes = [8, 128], strides = [1, 1]} : vector<8x512xf32> to vector<8x128xf32>
    %342 = arith.negf %341 : vector<8x128xf32>
    %343 = math.exp %342 : vector<8x128xf32>
    %cst_82 = arith.constant 1.000000e+00 : f32
    %344 = vector.broadcast %cst_82 : f32 to vector<8x128xf32>
    %345 = arith.addf %344, %343 : vector<8x128xf32>
    %346 = arith.divf %344, %345 : vector<8x128xf32>
    %347 = vector.extract_strided_slice %334 {offsets = [0, 256], sizes = [8, 128], strides = [1, 1]} : vector<8x512xf32> to vector<8x128xf32>
    %348 = math.tanh %347 : vector<8x128xf32>
    %349 = vector.extract_strided_slice %334 {offsets = [0, 384], sizes = [8, 128], strides = [1, 1]} : vector<8x512xf32> to vector<8x128xf32>
    %350 = arith.negf %349 : vector<8x128xf32>
    %351 = math.exp %350 : vector<8x128xf32>
    %cst_83 = arith.constant 1.000000e+00 : f32
    %352 = vector.broadcast %cst_83 : f32 to vector<8x128xf32>
    %353 = arith.addf %352, %351 : vector<8x128xf32>
    %354 = arith.divf %352, %353 : vector<8x128xf32>
    %355 = arith.mulf %346, %322 : vector<8x128xf32>
    %356 = arith.mulf %340, %348 : vector<8x128xf32>
    %357 = arith.addf %355, %356 : vector<8x128xf32>
    %358 = math.tanh %357 : vector<8x128xf32>
    %359 = arith.mulf %354, %358 : vector<8x128xf32>
    %360 = arith.truncf %359 : vector<8x128xf32> to vector<8x128xbf16>
    %361 = arith.index_cast %329 : i32 to index
    %c0_84 = arith.constant 0 : index
    %362 = vector.load %arg5[%361, %c0_84] : memref<128x128xbf16, #tpu.memory_space<vmem>>, vector<8x128xbf16>
    tpu.vector_store %arg5[%361, %c0_84], %360 {strides = array<i32>} : memref<128x128xbf16, #tpu.memory_space<vmem>>, vector<8x128xbf16>,
    %c10_i32 = arith.constant 10 : i32
    %c8_i32_85 = arith.constant 8 : i32
    %363 = arith.muli %c10_i32, %c8_i32_85 : i32
    %364 = tpu.assume_multiple %363, 8 : i32
    %365 = arith.index_cast %364 : i32 to index
    %c0_86 = arith.constant 0 : index
    %366 = vector.load %arg6[%365, %c0_86] : memref<128x512xf32, #tpu.memory_space<vmem>>, vector<8x512xf32>
    %367 = arith.truncf %359 : vector<8x128xf32> to vector<8x128xbf16>
    %cst_87 = arith.constant dense<0.000000e+00> : vector<8x512xf32>
    %368 = tpu.matmul %367, %10, %cst_87 {dimension_numbers = #tpu.dot_dimension_numbers<[1], [0], [0], [1], [0, 0, 1, 1], [], []>} : vector<8x128xbf16>, vector<128x512xbf16>, vector<8x512xf32> -> vector<8x512xf32>
    %369 = arith.addf %366, %368 : vector<8x512xf32>
    %370 = vector.extract_strided_slice %369 {offsets = [0, 0], sizes = [8, 128], strides = [1, 1]} : vector<8x512xf32> to vector<8x128xf32>
    %371 = arith.negf %370 : vector<8x128xf32>
    %372 = math.exp %371 : vector<8x128xf32>
    %cst_88 = arith.constant 1.000000e+00 : f32
    %373 = vector.broadcast %cst_88 : f32 to vector<8x128xf32>
    %374 = arith.addf %373, %372 : vector<8x128xf32>
    %375 = arith.divf %373, %374 : vector<8x128xf32>
    %376 = vector.extract_strided_slice %369 {offsets = [0, 128], sizes = [8, 128], strides = [1, 1]} : vector<8x512xf32> to vector<8x128xf32>
    %377 = arith.negf %376 : vector<8x128xf32>
    %378 = math.exp %377 : vector<8x128xf32>
    %cst_89 = arith.constant 1.000000e+00 : f32
    %379 = vector.broadcast %cst_89 : f32 to vector<8x128xf32>
    %380 = arith.addf %379, %378 : vector<8x128xf32>
    %381 = arith.divf %379, %380 : vector<8x128xf32>
    %382 = vector.extract_strided_slice %369 {offsets = [0, 256], sizes = [8, 128], strides = [1, 1]} : vector<8x512xf32> to vector<8x128xf32>
    %383 = math.tanh %382 : vector<8x128xf32>
    %384 = vector.extract_strided_slice %369 {offsets = [0, 384], sizes = [8, 128], strides = [1, 1]} : vector<8x512xf32> to vector<8x128xf32>
    %385 = arith.negf %384 : vector<8x128xf32>
    %386 = math.exp %385 : vector<8x128xf32>
    %cst_90 = arith.constant 1.000000e+00 : f32
    %387 = vector.broadcast %cst_90 : f32 to vector<8x128xf32>
    %388 = arith.addf %387, %386 : vector<8x128xf32>
    %389 = arith.divf %387, %388 : vector<8x128xf32>
    %390 = arith.mulf %381, %357 : vector<8x128xf32>
    %391 = arith.mulf %375, %383 : vector<8x128xf32>
    %392 = arith.addf %390, %391 : vector<8x128xf32>
    %393 = math.tanh %392 : vector<8x128xf32>
    %394 = arith.mulf %389, %393 : vector<8x128xf32>
    %395 = arith.truncf %394 : vector<8x128xf32> to vector<8x128xbf16>
    %396 = arith.index_cast %364 : i32 to index
    %c0_91 = arith.constant 0 : index
    %397 = vector.load %arg5[%396, %c0_91] : memref<128x128xbf16, #tpu.memory_space<vmem>>, vector<8x128xbf16>
    tpu.vector_store %arg5[%396, %c0_91], %395 {strides = array<i32>} : memref<128x128xbf16, #tpu.memory_space<vmem>>, vector<8x128xbf16>,
    %c11_i32 = arith.constant 11 : i32
    %c8_i32_92 = arith.constant 8 : i32
    %398 = arith.muli %c11_i32, %c8_i32_92 : i32
    %399 = tpu.assume_multiple %398, 8 : i32
    %400 = arith.index_cast %399 : i32 to index
    %c0_93 = arith.constant 0 : index
    %401 = vector.load %arg6[%400, %c0_93] : memref<128x512xf32, #tpu.memory_space<vmem>>, vector<8x512xf32>
    %402 = arith.truncf %394 : vector<8x128xf32> to vector<8x128xbf16>
    %cst_94 = arith.constant dense<0.000000e+00> : vector<8x512xf32>
    %403 = tpu.matmul %402, %10, %cst_94 {dimension_numbers = #tpu.dot_dimension_numbers<[1], [0], [0], [1], [0, 0, 1, 1], [], []>} : vector<8x128xbf16>, vector<128x512xbf16>, vector<8x512xf32> -> vector<8x512xf32>
    %404 = arith.addf %401, %403 : vector<8x512xf32>
    %405 = vector.extract_strided_slice %404 {offsets = [0, 0], sizes = [8, 128], strides = [1, 1]} : vector<8x512xf32> to vector<8x128xf32>
    %406 = arith.negf %405 : vector<8x128xf32>
    %407 = math.exp %406 : vector<8x128xf32>
    %cst_95 = arith.constant 1.000000e+00 : f32
    %408 = vector.broadcast %cst_95 : f32 to vector<8x128xf32>
    %409 = arith.addf %408, %407 : vector<8x128xf32>
    %410 = arith.divf %408, %409 : vector<8x128xf32>
    %411 = vector.extract_strided_slice %404 {offsets = [0, 128], sizes = [8, 128], strides = [1, 1]} : vector<8x512xf32> to vector<8x128xf32>
    %412 = arith.negf %411 : vector<8x128xf32>
    %413 = math.exp %412 : vector<8x128xf32>
    %cst_96 = arith.constant 1.000000e+00 : f32
    %414 = vector.broadcast %cst_96 : f32 to vector<8x128xf32>
    %415 = arith.addf %414, %413 : vector<8x128xf32>
    %416 = arith.divf %414, %415 : vector<8x128xf32>
    %417 = vector.extract_strided_slice %404 {offsets = [0, 256], sizes = [8, 128], strides = [1, 1]} : vector<8x512xf32> to vector<8x128xf32>
    %418 = math.tanh %417 : vector<8x128xf32>
    %419 = vector.extract_strided_slice %404 {offsets = [0, 384], sizes = [8, 128], strides = [1, 1]} : vector<8x512xf32> to vector<8x128xf32>
    %420 = arith.negf %419 : vector<8x128xf32>
    %421 = math.exp %420 : vector<8x128xf32>
    %cst_97 = arith.constant 1.000000e+00 : f32
    %422 = vector.broadcast %cst_97 : f32 to vector<8x128xf32>
    %423 = arith.addf %422, %421 : vector<8x128xf32>
    %424 = arith.divf %422, %423 : vector<8x128xf32>
    %425 = arith.mulf %416, %392 : vector<8x128xf32>
    %426 = arith.mulf %410, %418 : vector<8x128xf32>
    %427 = arith.addf %425, %426 : vector<8x128xf32>
    %428 = math.tanh %427 : vector<8x128xf32>
    %429 = arith.mulf %424, %428 : vector<8x128xf32>
    %430 = arith.truncf %429 : vector<8x128xf32> to vector<8x128xbf16>
    %431 = arith.index_cast %399 : i32 to index
    %c0_98 = arith.constant 0 : index
    %432 = vector.load %arg5[%431, %c0_98] : memref<128x128xbf16, #tpu.memory_space<vmem>>, vector<8x128xbf16>
    tpu.vector_store %arg5[%431, %c0_98], %430 {strides = array<i32>} : memref<128x128xbf16, #tpu.memory_space<vmem>>, vector<8x128xbf16>,
    %c12_i32 = arith.constant 12 : i32
    %c8_i32_99 = arith.constant 8 : i32
    %433 = arith.muli %c12_i32, %c8_i32_99 : i32
    %434 = tpu.assume_multiple %433, 8 : i32
    %435 = arith.index_cast %434 : i32 to index
    %c0_100 = arith.constant 0 : index
    %436 = vector.load %arg6[%435, %c0_100] : memref<128x512xf32, #tpu.memory_space<vmem>>, vector<8x512xf32>
    %437 = arith.truncf %429 : vector<8x128xf32> to vector<8x128xbf16>
    %cst_101 = arith.constant dense<0.000000e+00> : vector<8x512xf32>
    %438 = tpu.matmul %437, %10, %cst_101 {dimension_numbers = #tpu.dot_dimension_numbers<[1], [0], [0], [1], [0, 0, 1, 1], [], []>} : vector<8x128xbf16>, vector<128x512xbf16>, vector<8x512xf32> -> vector<8x512xf32>
    %439 = arith.addf %436, %438 : vector<8x512xf32>
    %440 = vector.extract_strided_slice %439 {offsets = [0, 0], sizes = [8, 128], strides = [1, 1]} : vector<8x512xf32> to vector<8x128xf32>
    %441 = arith.negf %440 : vector<8x128xf32>
    %442 = math.exp %441 : vector<8x128xf32>
    %cst_102 = arith.constant 1.000000e+00 : f32
    %443 = vector.broadcast %cst_102 : f32 to vector<8x128xf32>
    %444 = arith.addf %443, %442 : vector<8x128xf32>
    %445 = arith.divf %443, %444 : vector<8x128xf32>
    %446 = vector.extract_strided_slice %439 {offsets = [0, 128], sizes = [8, 128], strides = [1, 1]} : vector<8x512xf32> to vector<8x128xf32>
    %447 = arith.negf %446 : vector<8x128xf32>
    %448 = math.exp %447 : vector<8x128xf32>
    %cst_103 = arith.constant 1.000000e+00 : f32
    %449 = vector.broadcast %cst_103 : f32 to vector<8x128xf32>
    %450 = arith.addf %449, %448 : vector<8x128xf32>
    %451 = arith.divf %449, %450 : vector<8x128xf32>
    %452 = vector.extract_strided_slice %439 {offsets = [0, 256], sizes = [8, 128], strides = [1, 1]} : vector<8x512xf32> to vector<8x128xf32>
    %453 = math.tanh %452 : vector<8x128xf32>
    %454 = vector.extract_strided_slice %439 {offsets = [0, 384], sizes = [8, 128], strides = [1, 1]} : vector<8x512xf32> to vector<8x128xf32>
    %455 = arith.negf %454 : vector<8x128xf32>
    %456 = math.exp %455 : vector<8x128xf32>
    %cst_104 = arith.constant 1.000000e+00 : f32
    %457 = vector.broadcast %cst_104 : f32 to vector<8x128xf32>
    %458 = arith.addf %457, %456 : vector<8x128xf32>
    %459 = arith.divf %457, %458 : vector<8x128xf32>
    %460 = arith.mulf %451, %427 : vector<8x128xf32>
    %461 = arith.mulf %445, %453 : vector<8x128xf32>
    %462 = arith.addf %460, %461 : vector<8x128xf32>
    %463 = math.tanh %462 : vector<8x128xf32>
    %464 = arith.mulf %459, %463 : vector<8x128xf32>
    %465 = arith.truncf %464 : vector<8x128xf32> to vector<8x128xbf16>
    %466 = arith.index_cast %434 : i32 to index
    %c0_105 = arith.constant 0 : index
    %467 = vector.load %arg5[%466, %c0_105] : memref<128x128xbf16, #tpu.memory_space<vmem>>, vector<8x128xbf16>
    tpu.vector_store %arg5[%466, %c0_105], %465 {strides = array<i32>} : memref<128x128xbf16, #tpu.memory_space<vmem>>, vector<8x128xbf16>,
    %c13_i32 = arith.constant 13 : i32
    %c8_i32_106 = arith.constant 8 : i32
    %468 = arith.muli %c13_i32, %c8_i32_106 : i32
    %469 = tpu.assume_multiple %468, 8 : i32
    %470 = arith.index_cast %469 : i32 to index
    %c0_107 = arith.constant 0 : index
    %471 = vector.load %arg6[%470, %c0_107] : memref<128x512xf32, #tpu.memory_space<vmem>>, vector<8x512xf32>
    %472 = arith.truncf %464 : vector<8x128xf32> to vector<8x128xbf16>
    %cst_108 = arith.constant dense<0.000000e+00> : vector<8x512xf32>
    %473 = tpu.matmul %472, %10, %cst_108 {dimension_numbers = #tpu.dot_dimension_numbers<[1], [0], [0], [1], [0, 0, 1, 1], [], []>} : vector<8x128xbf16>, vector<128x512xbf16>, vector<8x512xf32> -> vector<8x512xf32>
    %474 = arith.addf %471, %473 : vector<8x512xf32>
    %475 = vector.extract_strided_slice %474 {offsets = [0, 0], sizes = [8, 128], strides = [1, 1]} : vector<8x512xf32> to vector<8x128xf32>
    %476 = arith.negf %475 : vector<8x128xf32>
    %477 = math.exp %476 : vector<8x128xf32>
    %cst_109 = arith.constant 1.000000e+00 : f32
    %478 = vector.broadcast %cst_109 : f32 to vector<8x128xf32>
    %479 = arith.addf %478, %477 : vector<8x128xf32>
    %480 = arith.divf %478, %479 : vector<8x128xf32>
    %481 = vector.extract_strided_slice %474 {offsets = [0, 128], sizes = [8, 128], strides = [1, 1]} : vector<8x512xf32> to vector<8x128xf32>
    %482 = arith.negf %481 : vector<8x128xf32>
    %483 = math.exp %482 : vector<8x128xf32>
    %cst_110 = arith.constant 1.000000e+00 : f32
    %484 = vector.broadcast %cst_110 : f32 to vector<8x128xf32>
    %485 = arith.addf %484, %483 : vector<8x128xf32>
    %486 = arith.divf %484, %485 : vector<8x128xf32>
    %487 = vector.extract_strided_slice %474 {offsets = [0, 256], sizes = [8, 128], strides = [1, 1]} : vector<8x512xf32> to vector<8x128xf32>
    %488 = math.tanh %487 : vector<8x128xf32>
    %489 = vector.extract_strided_slice %474 {offsets = [0, 384], sizes = [8, 128], strides = [1, 1]} : vector<8x512xf32> to vector<8x128xf32>
    %490 = arith.negf %489 : vector<8x128xf32>
    %491 = math.exp %490 : vector<8x128xf32>
    %cst_111 = arith.constant 1.000000e+00 : f32
    %492 = vector.broadcast %cst_111 : f32 to vector<8x128xf32>
    %493 = arith.addf %492, %491 : vector<8x128xf32>
    %494 = arith.divf %492, %493 : vector<8x128xf32>
    %495 = arith.mulf %486, %462 : vector<8x128xf32>
    %496 = arith.mulf %480, %488 : vector<8x128xf32>
    %497 = arith.addf %495, %496 : vector<8x128xf32>
    %498 = math.tanh %497 : vector<8x128xf32>
    %499 = arith.mulf %494, %498 : vector<8x128xf32>
    %500 = arith.truncf %499 : vector<8x128xf32> to vector<8x128xbf16>
    %501 = arith.index_cast %469 : i32 to index
    %c0_112 = arith.constant 0 : index
    %502 = vector.load %arg5[%501, %c0_112] : memref<128x128xbf16, #tpu.memory_space<vmem>>, vector<8x128xbf16>
    tpu.vector_store %arg5[%501, %c0_112], %500 {strides = array<i32>} : memref<128x128xbf16, #tpu.memory_space<vmem>>, vector<8x128xbf16>,
    %c14_i32 = arith.constant 14 : i32
    %c8_i32_113 = arith.constant 8 : i32
    %503 = arith.muli %c14_i32, %c8_i32_113 : i32
    %504 = tpu.assume_multiple %503, 8 : i32
    %505 = arith.index_cast %504 : i32 to index
    %c0_114 = arith.constant 0 : index
    %506 = vector.load %arg6[%505, %c0_114] : memref<128x512xf32, #tpu.memory_space<vmem>>, vector<8x512xf32>
    %507 = arith.truncf %499 : vector<8x128xf32> to vector<8x128xbf16>
    %cst_115 = arith.constant dense<0.000000e+00> : vector<8x512xf32>
    %508 = tpu.matmul %507, %10, %cst_115 {dimension_numbers = #tpu.dot_dimension_numbers<[1], [0], [0], [1], [0, 0, 1, 1], [], []>} : vector<8x128xbf16>, vector<128x512xbf16>, vector<8x512xf32> -> vector<8x512xf32>
    %509 = arith.addf %506, %508 : vector<8x512xf32>
    %510 = vector.extract_strided_slice %509 {offsets = [0, 0], sizes = [8, 128], strides = [1, 1]} : vector<8x512xf32> to vector<8x128xf32>
    %511 = arith.negf %510 : vector<8x128xf32>
    %512 = math.exp %511 : vector<8x128xf32>
    %cst_116 = arith.constant 1.000000e+00 : f32
    %513 = vector.broadcast %cst_116 : f32 to vector<8x128xf32>
    %514 = arith.addf %513, %512 : vector<8x128xf32>
    %515 = arith.divf %513, %514 : vector<8x128xf32>
    %516 = vector.extract_strided_slice %509 {offsets = [0, 128], sizes = [8, 128], strides = [1, 1]} : vector<8x512xf32> to vector<8x128xf32>
    %517 = arith.negf %516 : vector<8x128xf32>
    %518 = math.exp %517 : vector<8x128xf32>
    %cst_117 = arith.constant 1.000000e+00 : f32
    %519 = vector.broadcast %cst_117 : f32 to vector<8x128xf32>
    %520 = arith.addf %519, %518 : vector<8x128xf32>
    %521 = arith.divf %519, %520 : vector<8x128xf32>
    %522 = vector.extract_strided_slice %509 {offsets = [0, 256], sizes = [8, 128], strides = [1, 1]} : vector<8x512xf32> to vector<8x128xf32>
    %523 = math.tanh %522 : vector<8x128xf32>
    %524 = vector.extract_strided_slice %509 {offsets = [0, 384], sizes = [8, 128], strides = [1, 1]} : vector<8x512xf32> to vector<8x128xf32>
    %525 = arith.negf %524 : vector<8x128xf32>
    %526 = math.exp %525 : vector<8x128xf32>
    %cst_118 = arith.constant 1.000000e+00 : f32
    %527 = vector.broadcast %cst_118 : f32 to vector<8x128xf32>
    %528 = arith.addf %527, %526 : vector<8x128xf32>
    %529 = arith.divf %527, %528 : vector<8x128xf32>
    %530 = arith.mulf %521, %497 : vector<8x128xf32>
    %531 = arith.mulf %515, %523 : vector<8x128xf32>
    %532 = arith.addf %530, %531 : vector<8x128xf32>
    %533 = math.tanh %532 : vector<8x128xf32>
    %534 = arith.mulf %529, %533 : vector<8x128xf32>
    %535 = arith.truncf %534 : vector<8x128xf32> to vector<8x128xbf16>
    %536 = arith.index_cast %504 : i32 to index
    %c0_119 = arith.constant 0 : index
    %537 = vector.load %arg5[%536, %c0_119] : memref<128x128xbf16, #tpu.memory_space<vmem>>, vector<8x128xbf16>
    tpu.vector_store %arg5[%536, %c0_119], %535 {strides = array<i32>} : memref<128x128xbf16, #tpu.memory_space<vmem>>, vector<8x128xbf16>,
    %c15_i32 = arith.constant 15 : i32
    %c8_i32_120 = arith.constant 8 : i32
    %538 = arith.muli %c15_i32, %c8_i32_120 : i32
    %539 = tpu.assume_multiple %538, 8 : i32
    %540 = arith.index_cast %539 : i32 to index
    %c0_121 = arith.constant 0 : index
    %541 = vector.load %arg6[%540, %c0_121] : memref<128x512xf32, #tpu.memory_space<vmem>>, vector<8x512xf32>
    %542 = arith.truncf %534 : vector<8x128xf32> to vector<8x128xbf16>
    %cst_122 = arith.constant dense<0.000000e+00> : vector<8x512xf32>
    %543 = tpu.matmul %542, %10, %cst_122 {dimension_numbers = #tpu.dot_dimension_numbers<[1], [0], [0], [1], [0, 0, 1, 1], [], []>} : vector<8x128xbf16>, vector<128x512xbf16>, vector<8x512xf32> -> vector<8x512xf32>
    %544 = arith.addf %541, %543 : vector<8x512xf32>
    %545 = vector.extract_strided_slice %544 {offsets = [0, 0], sizes = [8, 128], strides = [1, 1]} : vector<8x512xf32> to vector<8x128xf32>
    %546 = arith.negf %545 : vector<8x128xf32>
    %547 = math.exp %546 : vector<8x128xf32>
    %cst_123 = arith.constant 1.000000e+00 : f32
    %548 = vector.broadcast %cst_123 : f32 to vector<8x128xf32>
    %549 = arith.addf %548, %547 : vector<8x128xf32>
    %550 = arith.divf %548, %549 : vector<8x128xf32>
    %551 = vector.extract_strided_slice %544 {offsets = [0, 128], sizes = [8, 128], strides = [1, 1]} : vector<8x512xf32> to vector<8x128xf32>
    %552 = arith.negf %551 : vector<8x128xf32>
    %553 = math.exp %552 : vector<8x128xf32>
    %cst_124 = arith.constant 1.000000e+00 : f32
    %554 = vector.broadcast %cst_124 : f32 to vector<8x128xf32>
    %555 = arith.addf %554, %553 : vector<8x128xf32>
    %556 = arith.divf %554, %555 : vector<8x128xf32>
    %557 = vector.extract_strided_slice %544 {offsets = [0, 256], sizes = [8, 128], strides = [1, 1]} : vector<8x512xf32> to vector<8x128xf32>
    %558 = math.tanh %557 : vector<8x128xf32>
    %559 = vector.extract_strided_slice %544 {offsets = [0, 384], sizes = [8, 128], strides = [1, 1]} : vector<8x512xf32> to vector<8x128xf32>
    %560 = arith.negf %559 : vector<8x128xf32>
    %561 = math.exp %560 : vector<8x128xf32>
    %cst_125 = arith.constant 1.000000e+00 : f32
    %562 = vector.broadcast %cst_125 : f32 to vector<8x128xf32>
    %563 = arith.addf %562, %561 : vector<8x128xf32>
    %564 = arith.divf %562, %563 : vector<8x128xf32>
    %565 = arith.mulf %556, %532 : vector<8x128xf32>
    %566 = arith.mulf %550, %558 : vector<8x128xf32>
    %567 = arith.addf %565, %566 : vector<8x128xf32>
    %568 = math.tanh %567 : vector<8x128xf32>
    %569 = arith.mulf %564, %568 : vector<8x128xf32>
    %570 = arith.truncf %569 : vector<8x128xf32> to vector<8x128xbf16>
    %571 = arith.index_cast %539 : i32 to index
    %c0_126 = arith.constant 0 : index
    %572 = vector.load %arg5[%571, %c0_126] : memref<128x128xbf16, #tpu.memory_space<vmem>>, vector<8x128xbf16>
    tpu.vector_store %arg5[%571, %c0_126], %570 {strides = array<i32>} : memref<128x128xbf16, #tpu.memory_space<vmem>>, vector<8x128xbf16>,
    %c16_i32 = arith.constant 16 : i32
    %c0_127 = arith.constant 0 : index
    %c0_128 = arith.constant 0 : index
    %573 = vector.load %arg7[%c0_127, %c0_128] : memref<8x128xf32, #tpu.memory_space<vmem>>, vector<8x128xf32>
    tpu.vector_store %arg7[%c0_127, %c0_128], %569 {strides = array<i32>} : memref<8x128xf32, #tpu.memory_space<vmem>>, vector<8x128xf32>,
    %c0_129 = arith.constant 0 : index
    %c0_130 = arith.constant 0 : index
    %574 = vector.load %arg8[%c0_129, %c0_130] : memref<8x128xf32, #tpu.memory_space<vmem>>, vector<8x128xf32>
    tpu.vector_store %arg8[%c0_129, %c0_130], %567 {strides = array<i32>} : memref<8x128xf32, #tpu.memory_space<vmem>>, vector<8x128xf32>,
    return
  }
  func.func @transform_0(%arg0: i32) -> (i32, i32) {
    %c0_i32 = arith.constant 0 : i32
    %c0_i32_0 = arith.constant 0 : i32
    return %arg0, %c0_i32 : i32, i32
  }
  func.func @transform_1(%arg0: i32) -> (i32, i32) {
    %c0_i32 = arith.constant 0 : i32
    %c0_i32_0 = arith.constant 0 : i32
    %c0_i32_1 = arith.constant 0 : i32
    return %c0_i32, %c0_i32_0 : i32, i32
  }
  func.func @transform_2(%arg0: i32) -> (i32, i32) {
    %c0_i32 = arith.constant 0 : i32
    %c0_i32_0 = arith.constant 0 : i32
    %c0_i32_1 = arith.constant 0 : i32
    return %c0_i32, %c0_i32_0 : i32, i32
  }
  func.func @transform_3(%arg0: i32) -> (i32, i32) {
    %c0_i32 = arith.constant 0 : i32
    %c0_i32_0 = arith.constant 0 : i32
    %c0_i32_1 = arith.constant 0 : i32
    return %c0_i32, %c0_i32_0 : i32, i32
  }
  func.func @transform_4(%arg0: i32) -> (i32, i32) {
    %c0_i32 = arith.constant 0 : i32
    %c0_i32_0 = arith.constant 0 : i32
    return %arg0, %c0_i32 : i32, i32
  }
}

module attributes {stable_mosaic.version = 11 : i64} {
  func.func @matmul_bias_fullk_kernel(%arg0: i32, %arg1: i32, %arg2: memref<128x128xbf16, #tpu.memory_space<vmem>>, %arg3: memref<128x256xbf16, #tpu.memory_space<vmem>>, %arg4: memref<1x256xf32, #tpu.memory_space<vmem>>, %arg5: memref<128x256xf32, #tpu.memory_space<vmem>>) attributes {dimension_semantics = [#tpu.dimension_semantics<parallel>, #tpu.dimension_semantics<parallel>], iteration_bounds = array<i64: 1, 1>, scalar_prefetch = 0 : i64, scratch_operands = 0 : i64, tpu.core_type = #tpu.core_type<tc>, window_params = [{transform_indices = @transform_0, window_bounds = array<i64: 128, 128>}, {transform_indices = @transform_1, window_bounds = array<i64: 128, 256>}, {transform_indices = @transform_2, window_bounds = array<i64: 1, 256>}, {transform_indices = @transform_3, window_bounds = array<i64: 128, 256>}]} {
    %c0 = arith.constant 0 : index
    %c0_0 = arith.constant 0 : index
    %0 = vector.load %arg2[%c0, %c0_0] : memref<128x128xbf16, #tpu.memory_space<vmem>>, vector<128x128xbf16>
    %c0_1 = arith.constant 0 : index
    %c0_2 = arith.constant 0 : index
    %1 = vector.load %arg3[%c0_1, %c0_2] : memref<128x256xbf16, #tpu.memory_space<vmem>>, vector<128x256xbf16>
    %cst = arith.constant dense<0.000000e+00> : vector<128x256xf32>
    %2 = tpu.matmul %0, %1, %cst {dimension_numbers = #tpu.dot_dimension_numbers<[1], [0], [0], [1], [0, 0, 1, 1], [], []>} : vector<128x128xbf16>, vector<128x256xbf16>, vector<128x256xf32> -> vector<128x256xf32>
    %c0_3 = arith.constant 0 : index
    %c0_4 = arith.constant 0 : index
    %3 = vector.load %arg4[%c0_3, %c0_4] : memref<1x256xf32, #tpu.memory_space<vmem>>, vector<1x256xf32>
    %4 = vector.broadcast %3 : vector<1x256xf32> to vector<128x256xf32>
    %5 = arith.addf %2, %4 : vector<128x256xf32>
    %c0_5 = arith.constant 0 : index
    %c0_6 = arith.constant 0 : index
    %6 = vector.load %arg5[%c0_5, %c0_6] : memref<128x256xf32, #tpu.memory_space<vmem>>, vector<128x256xf32>
    tpu.vector_store %arg5[%c0_5, %c0_6], %5 {strides = array<i32>} : memref<128x256xf32, #tpu.memory_space<vmem>>, vector<128x256xf32>,
    return
  }
  func.func @transform_0(%arg0: i32, %arg1: i32) -> (i32, i32) {
    %c0_i32 = arith.constant 0 : i32
    %c0_i32_0 = arith.constant 0 : i32
    return %arg0, %c0_i32 : i32, i32
  }
  func.func @transform_1(%arg0: i32, %arg1: i32) -> (i32, i32) {
    %c0_i32 = arith.constant 0 : i32
    %c0_i32_0 = arith.constant 0 : i32
    return %c0_i32, %arg1 : i32, i32
  }
  func.func @transform_2(%arg0: i32, %arg1: i32) -> (i32, i32) {
    %c0_i32 = arith.constant 0 : i32
    %c0_i32_0 = arith.constant 0 : i32
    return %c0_i32, %arg1 : i32, i32
  }
  func.func @transform_3(%arg0: i32, %arg1: i32) -> (i32, i32) {
    %c0_i32 = arith.constant 0 : i32
    return %arg0, %arg1 : i32, i32
  }
}

</mosaic_0001>

<bundles_post_ra>
// kernel: gpt_forward.5
= control target key start
LH: loop header
LB: loop body
LE: loop exit
PB: predicated region body
PF: predicated region fallthrough
CT: control target
= control target key end

     0   :  { %8 = vsyncpa [#allocation3], 0  ;;  %s678_s0 = inlined_call_operand.vmem [shape: bf16[128,128], index: 0, kind: input, shape index: {}]   ;;  %s679_s1 = inlined_call_operand.hbm [shape: bf16[128,256], index: 1, kind: input, shape index: {}]   ;;  %s680_s2 = inlined_call_operand.hbm [shape: f32[1,256], index: 2, kind: input, shape index: {}]   ;;  %s681_s3 = inlined_call_operand.hbm [shape: f32[128,256], index: 3, kind: output, shape index: {}]  }
   0x1   :  { %9 = vsyncpa [#allocation6], 0 }
   0x2   :  { %10 = vsyncpa [#allocation4], 0  ;;  %s17_s14 = sshll.u32 %s679_s1, 4  ;;  %s582_s15 = smov [#allocation2]   ;;  %s18_s14 = int_to_ptr.hbm [resolvable:$true] %s17_s14 }
   0x3   :  { %s19_s16 = sshll.u32 %s582_s15, 4  ;;  %s31_s19 = sshll.u32 %s680_s2, 4  ;;  %s20_s16 = int_to_ptr.vmem [resolvable:$true] %s19_s16  ;;  %s32_s19 = int_to_ptr.hbm [resolvable:$true] %s31_s19 }
   0x4   :  { %s583_s20 = smov 128   ;;  %s584_s21 = smov 8  }
   0x5   :  { %25 = dma.hbm_to_vmem [thread:$0]  %s18_s14, 2048, %s20_s16, [#allocation3], %s583_s20, %s583_s20, %s584_s21  }
   0x6   :  { %s585_s22 = smov [#allocation5]  }
   0x7   :  { %s33_s23 = sshll.u32 %s585_s22, 4  ;;  %s34_s23 = int_to_ptr.vmem [resolvable:$true] %s33_s23 }
   0x8   :  { %36 = dma.hbm_to_vmem [thread:$0]  %s32_s19, 32, %s34_s23, [#allocation6]  }
   0x9   :  { %576 = dma.done.wait [#allocation3], 2048  }
   0xa   :  { %577 = vsyncadd [#allocation3], 4294965248 }
   0xb   :  { %578 = dma.done.wait [#allocation6], 32  }
   0xc   :  { %579 = vsyncadd [#allocation6], 4294967264  ;;  %v451_v0 = vld [vmem:[#allocation2 + $0x70] sm:$0xf]  ;;  %v480_v1 = vld [vmem:[#allocation2 + $0x74] sm:$0xf0] }
   0xd   :  { %v479_v2 = vld [vmem:[#allocation2 + $0x74] sm:$0xf]  ;;  %v452_v3 = vor.u32 %v480_v1, %v451_v0  ;;  %v453_v4 = vld [vmem:[#allocation2 + $0x78] sm:$0xf0]  ;;  %v443_v5 = vld [vmem:[#allocation2 + $0x60] sm:$0xf] }
   0xe   :  { %v478_v6 = vld [vmem:[#allocation2 + $0x64] sm:$0xf0]  ;;  %v456_v7 = vor.u32 %v479_v2, %v453_v4  ;;  %v477_v8 = vld [vmem:[#allocation2 + $0x64] sm:$0xf]  ;;  %v445_v9 = vld [vmem:[#allocation2 + $0x68] sm:$0xf0] }
   0xf   :  { %211 = vmatpush.bf16.msra.mxu0 %v452_v3  ;;  %481 = vmatpush.bf16.msra.mxu2 %v452_v3  ;;  %v444_v10 = vor.u32 %v478_v6, %v443_v5  ;;  %v448_v11 = vor.u32 %v477_v8, %v445_v9  ;;  %v435_v12 = vld [vmem:[#allocation2 + $0x50] sm:$0xf]  ;;  %v476_v13 = vld [vmem:[#allocation2 + $0x54] sm:$0xf0]  ;;  %v475_v14 = vld [vmem:[#allocation2 + $0x54] sm:$0xf] }
  0x10   :  { %260 = vmatpush.bf16.msra.mxu1 %v456_v7  ;;  %489 = vmatpush.bf16.msra.mxu3 %v456_v7  ;;  %v437_v15 = vld [vmem:[#allocation2 + $0x58] sm:$0xf0]  ;;  %v436_v16 = vor.u32 %v476_v13, %v435_v12  ;;  %v427_v18 = vld [vmem:[#allocation2 + $0x40] sm:$0xf]  ;;  %v474_v19 = vld [vmem:[#allocation2 + $0x44] sm:$0xf0] }
  0x11   :  { %v440_v17 = vor.u32 %v475_v14, %v437_v15  ;;  %v473_v20 = vld [vmem:[#allocation2 + $0x44] sm:$0xf]  ;;  %v429_v21 = vld [vmem:[#allocation2 + $0x48] sm:$0xf0]  ;;  %v428_v22 = vor.u32 %v474_v19, %v427_v18  ;;  %v419_v24 = vld [vmem:[#allocation2 + $0x30] sm:$0xf] }
  0x12   :  { %v432_v23 = vor.u32 %v473_v20, %v429_v21  ;;  %v472_v25 = vld [vmem:[#allocation2 + $0x34] sm:$0xf0]  ;;  %v471_v26 = vld [vmem:[#allocation2 + $0x34] sm:$0xf]  ;;  %v421_v27 = vld [vmem:[#allocation2 + $0x38] sm:$0xf0] }
  0x13   :  { %212 = vmatpush.bf16.msra.mxu0 %v444_v10  ;;  %482 = vmatpush.bf16.msra.mxu2 %v444_v10  ;;  %v420_v28 = vor.u32 %v472_v25, %v419_v24  ;;  %v424_v29 = vor.u32 %v471_v26, %v421_v27  ;;  %v411_v30 = vld [vmem:[#allocation2 + $0x20] sm:$0xf]  ;;  %v470_v31 = vld [vmem:[#allocation2 + $0x24] sm:$0xf0]  ;;  %v469_v32 = vld [vmem:[#allocation2 + $0x24] sm:$0xf] }
  0x14   :  { %261 = vmatpush.bf16.msra.mxu1 %v448_v11  ;;  %490 = vmatpush.bf16.msra.mxu3 %v448_v11  ;;  %v413_v33 = vld [vmem:[#allocation2 + $0x28] sm:$0xf0]  ;;  %v412_v34 = vor.u32 %v470_v31, %v411_v30  ;;  %v403_v36 = vld [vmem:[#allocation2 + $0x10] sm:$0xf]  ;;  %v468_v37 = vld [vmem:[#allocation2 + $0x14] sm:$0xf0] }
  0x15   :  { %v416_v35 = vor.u32 %v469_v32, %v413_v33  ;;  %v467_v38 = vld [vmem:[#allocation2 + $0x14] sm:$0xf]  ;;  %v405_v39 = vld [vmem:[#allocation2 + $0x18] sm:$0xf0]  ;;  %v404_v40 = vor.u32 %v468_v37, %v403_v36  ;;  %v395_v42 = vld [vmem:[#allocation2] sm:$0xf] }
  0x16   :  { %v408_v41 = vor.u32 %v467_v38, %v405_v39  ;;  %v466_v43 = vld [vmem:[#allocation2 + $0x4] sm:$0xf0]  ;;  %v465_v44 = vld [vmem:[#allocation2 + $0x4] sm:$0xf]  ;;  %v397_v45 = vld [vmem:[#allocation2 + $0x8] sm:$0xf0] }
  0x17   :  { %213 = vmatpush.bf16.msra.mxu0 %v436_v16  ;;  %483 = vmatpush.bf16.msra.mxu2 %v436_v16  ;;  %v396_v46 = vor.u32 %v466_v43, %v395_v42  ;;  %v400_v47 = vor.u32 %v465_v44, %v397_v45  ;;  %v457_v48 = vld [vmem:[%s678_s0] sm:$0xff]  ;;  %v458_v50 = vld [vmem:[%s678_s0 + $0x8] sm:$0xff]  ;;  %v459_v52 = vld [vmem:[%s678_s0 + $0x10] sm:$0xff]  ;;  %s347_s14 = sshll.u32 %s681_s3, 4  ;;  %s587_s15 = smov 256   ;;  %s348_s14 = int_to_ptr.hbm [resolvable:$true] %s347_s14 }
  0x18   :  { %262 = vmatpush.bf16.msra.mxu1 %v440_v17  ;;  %491 = vmatpush.bf16.msra.mxu3 %v440_v17  ;;  %v461_v49 = vld [vmem:[%s678_s0 + $0x20] sm:$0xff]  ;;  %v462_v51 = vld [vmem:[%s678_s0 + $0x28] sm:$0xff]  ;;  %v463_v53 = vld [vmem:[%s678_s0 + $0x30] sm:$0xff]  ;;  %s588_s16 = smov 16  }
  0x19   :  { %v460_v54 = vld [vmem:[%s678_s0 + $0x18] sm:$0xff]  ;;  %v77_v56 = vld [vmem:[#allocation5] sm:$0x3] }
  0x1a   :  { %v464_v55 = vld [vmem:[%s678_s0 + $0x38] sm:$0xff]  ;;  %v639_v57 = vperm.slane %v77_v56, 0  ;;  %v641_v58 = vperm.slane %v77_v56, 1  ;;  %s586_s0 = smov [#allocation7]  }
  0x1b   :  { %214 = vmatpush.bf16.msra.mxu0 %v428_v22  ;;  %484 = vmatpush.bf16.msra.mxu2 %v428_v22  ;;  %s345_s11 = sshll.u32 %s586_s0, 4  ;;  %s346_s11 = int_to_ptr.vmem [resolvable:$true] %s345_s11 }
  0x1c   :  { %263 = vmatpush.bf16.msra.mxu1 %v432_v23  ;;  %492 = vmatpush.bf16.msra.mxu3 %v432_v23 }
  0x1f   :  { %215 = vmatpush.bf16.msra.mxu0 %v420_v28  ;;  %485 = vmatpush.bf16.msra.mxu2 %v420_v28 }
  0x20   :  { %264 = vmatpush.bf16.msra.mxu1 %v424_v29  ;;  %493 = vmatpush.bf16.msra.mxu3 %v424_v29 }
  0x23   :  { %216 = vmatpush.bf16.msra.mxu0 %v412_v34  ;;  %486 = vmatpush.bf16.msra.mxu2 %v412_v34 }
  0x24   :  { %265 = vmatpush.bf16.msra.mxu1 %v416_v35  ;;  %494 = vmatpush.bf16.msra.mxu3 %v416_v35 }
  0x27   :  { %217 = vmatpush.bf16.msra.mxu0 %v404_v40  ;;  %487 = vmatpush.bf16.msra.mxu2 %v404_v40 }
  0x28   :  { %266 = vmatpush.bf16.msra.mxu1 %v408_v41  ;;  %495 = vmatpush.bf16.msra.mxu3 %v408_v41 }
  0x2b   :  { %218 = vmatpush.bf16.msra.mxu0 %v396_v46  ;;  %488 = vmatpush.bf16.msra.mxu2 %v396_v46 }
  0x2c   :  { %267 = vmatpush.bf16.msra.mxu1 %v400_v47  ;;  %496 = vmatpush.bf16.msra.mxu3 %v400_v47 }
  0x2e   :  { %219 = vmatmul.bf16.vlgmr.msra.gmra.mxu0 %v457_v48  ;;  %239 = vmatmul.bf16.vlgmr.msra.gmra.mxu2 %v461_v49 }
  0x2f   :  { %268 = vmatmul.bf16.vlgmr.msra.gmra.mxu1 %v457_v48  ;;  %288 = vmatmul.bf16.vlgmr.msra.gmra.mxu3 %v461_v49 }
  0x3e   :  { %224 = vmatmul.bf16.gmra.mxu0 %v458_v50  ;;  %244 = vmatmul.bf16.gmra.mxu2 %v462_v51 }
  0x3f   :  { %273 = vmatmul.bf16.gmra.mxu1 %v458_v50  ;;  %293 = vmatmul.bf16.gmra.mxu3 %v462_v51 }
  0x4e   :  { %229 = vmatmul.bf16.gmra.mxu0 %v459_v52  ;;  %249 = vmatmul.bf16.gmra.mxu2 %v463_v53 }
  0x4f   :  { %278 = vmatmul.bf16.gmra.mxu1 %v459_v52  ;;  %298 = vmatmul.bf16.gmra.mxu3 %v463_v53 }
  0x5e   :  { %234 = vmatmul.bf16.gmra.mxu0 %v460_v54  ;;  %254 = vmatmul.bf16.gmra.mxu2 %v464_v55 }
  0x5f   :  { %283 = vmatmul.bf16.gmra.mxu1 %v460_v54  ;;  %303 = vmatmul.bf16.gmra.mxu3 %v464_v55 }
  0xab   :  { %v220_v59 = vpop.f32.mrf.mxu0 }
  0xac   :  { %v221_v60 = vadd.f32 %v220_v59, %v639_v57  ;;  %v269_v61 = vpop.f32.mrf.mxu1 }
  0xad   :  { %v270_v62 = vadd.f32 %v269_v61, %v641_v58 }
  0xae   :  { %309 = vst [vmem:[#allocation7] sm:$0xff] %v221_v60 }
  0xaf   :  { %310 = vst [vmem:[#allocation7 + $0x8] sm:$0xff] %v270_v62 }
  0xb1   :  { %v240_v63 = vpop.f32.mrf.mxu2 }
  0xb2   :  { %v241_v0 = vadd.f32 %v240_v63, %v639_v57  ;;  %v289_v1 = vpop.f32.mrf.mxu3 }
  0xb3   :  { %v290_v2 = vadd.f32 %v289_v1, %v641_v58  ;;  %v222_v3 = vpop.f32.mrf.mxu0 }
  0xb4   :  { %325 = vst [vmem:[#allocation7 + $0x80] sm:$0xff] %v241_v0  ;;  %v223_v4 = vadd.f32 %v222_v3, %v639_v57  ;;  %v271_v5 = vpop.f32.mrf.mxu1 }
  0xb5   :  { %326 = vst [vmem:[#allocation7 + $0x88] sm:$0xff] %v290_v2  ;;  %v272_v6 = vadd.f32 %v271_v5, %v641_v58 }
  0xb6   :  { %311 = vst [vmem:[#allocation7 + $0x10] sm:$0xff] %v223_v4 }
  0xb7   :  { %312 = vst [vmem:[#allocation7 + $0x18] sm:$0xff] %v272_v6 }
  0xb9   :  { %v242_v7 = vpop.f32.mrf.mxu2 }
  0xba   :  { %v243_v8 = vadd.f32 %v242_v7, %v639_v57  ;;  %v291_v9 = vpop.f32.mrf.mxu3 }
  0xbb   :  { %v292_v10 = vadd.f32 %v291_v9, %v641_v58  ;;  %v225_v11 = vpop.f32.mrf.mxu0 }
  0xbc   :  { %327 = vst [vmem:[#allocation7 + $0x90] sm:$0xff] %v243_v8  ;;  %v226_v12 = vadd.f32 %v225_v11, %v639_v57  ;;  %v274_v13 = vpop.f32.mrf.mxu1 }
  0xbd   :  { %328 = vst [vmem:[#allocation7 + $0x98] sm:$0xff] %v292_v10  ;;  %v275_v14 = vadd.f32 %v274_v13, %v641_v58 }
  0xbe   :  { %313 = vst [vmem:[#allocation7 + $0x20] sm:$0xff] %v226_v12 }
  0xbf   :  { %314 = vst [vmem:[#allocation7 + $0x28] sm:$0xff] %v275_v14 }
  0xc1   :  { %v245_v15 = vpop.f32.mrf.mxu2 }
  0xc2   :  { %v246_v16 = vadd.f32 %v245_v15, %v639_v57  ;;  %v294_v17 = vpop.f32.mrf.mxu3 }
  0xc3   :  { %v295_v18 = vadd.f32 %v294_v17, %v641_v58  ;;  %v227_v19 = vpop.f32.mrf.mxu0 }
  0xc4   :  { %329 = vst [vmem:[#allocation7 + $0xa0] sm:$0xff] %v246_v16  ;;  %v228_v20 = vadd.f32 %v227_v19, %v639_v57  ;;  %v276_v21 = vpop.f32.mrf.mxu1 }
  0xc5   :  { %330 = vst [vmem:[#allocation7 + $0xa8] sm:$0xff] %v295_v18  ;;  %v277_v22 = vadd.f32 %v276_v21, %v641_v58 }
  0xc6   :  { %315 = vst [vmem:[#allocation7 + $0x30] sm:$0xff] %v228_v20 }
  0xc7   :  { %316 = vst [vmem:[#allocation7 + $0x38] sm:$0xff] %v277_v22 }
  0xc9   :  { %v247_v23 = vpop.f32.mrf.mxu2 }
  0xca   :  { %v248_v24 = vadd.f32 %v247_v23, %v639_v57  ;;  %v296_v25 = vpop.f32.mrf.mxu3 }
  0xcb   :  { %v297_v26 = vadd.f32 %v296_v25, %v641_v58  ;;  %v230_v27 = vpop.f32.mrf.mxu0 }
  0xcc   :  { %331 = vst [vmem:[#allocation7 + $0xb0] sm:$0xff] %v248_v24  ;;  %v231_v28 = vadd.f32 %v230_v27, %v639_v57  ;;  %v279_v29 = vpop.f32.mrf.mxu1 }
  0xcd   :  { %332 = vst [vmem:[#allocation7 + $0xb8] sm:$0xff] %v297_v26  ;;  %v280_v30 = vadd.f32 %v279_v29, %v641_v58 }
  0xce   :  { %317 = vst [vmem:[#allocation7 + $0x40] sm:$0xff] %v231_v28 }
  0xcf   :  { %318 = vst [vmem:[#allocation7 + $0x48] sm:$0xff] %v280_v30 }
  0xd1   :  { %v250_v31 = vpop.f32.mrf.mxu2 }
  0xd2   :  { %v251_v32 = vadd.f32 %v250_v31, %v639_v57  ;;  %v299_v33 = vpop.f32.mrf.mxu3 }
  0xd3   :  { %v300_v34 = vadd.f32 %v299_v33, %v641_v58  ;;  %v232_v35 = vpop.f32.mrf.mxu0 }
  0xd4   :  { %333 = vst [vmem:[#allocation7 + $0xc0] sm:$0xff] %v251_v32  ;;  %v233_v36 = vadd.f32 %v232_v35, %v639_v57  ;;  %v281_v37 = vpop.f32.mrf.mxu1 }
  0xd5   :  { %334 = vst [vmem:[#allocation7 + $0xc8] sm:$0xff] %v300_v34  ;;  %v282_v38 = vadd.f32 %v281_v37, %v641_v58 }
  0xd6   :  { %319 = vst [vmem:[#allocation7 + $0x50] sm:$0xff] %v233_v36 }
  0xd7   :  { %320 = vst [vmem:[#allocation7 + $0x58] sm:$0xff] %v282_v38 }
  0xd9   :  { %v252_v39 = vpop.f32.mrf.mxu2 }
  0xda   :  { %v253_v40 = vadd.f32 %v252_v39, %v639_v57  ;;  %v301_v41 = vpop.f32.mrf.mxu3 }
  0xdb   :  { %v302_v42 = vadd.f32 %v301_v41, %v641_v58  ;;  %v235_v43 = vpop.f32.mrf.mxu0 }
  0xdc   :  { %335 = vst [vmem:[#allocation7 + $0xd0] sm:$0xff] %v253_v40  ;;  %v236_v44 = vadd.f32 %v235_v43, %v639_v57  ;;  %v284_v45 = vpop.f32.mrf.mxu1 }
  0xdd   :  { %336 = vst [vmem:[#allocation7 + $0xd8] sm:$0xff] %v302_v42  ;;  %v285_v46 = vadd.f32 %v284_v45, %v641_v58 }
  0xde   :  { %321 = vst [vmem:[#allocation7 + $0x60] sm:$0xff] %v236_v44 }
  0xdf   :  { %322 = vst [vmem:[#allocation7 + $0x68] sm:$0xff] %v285_v46 }
  0xe1   :  { %v255_v47 = vpop.f32.mrf.mxu2 }
  0xe2   :  { %v256_v48 = vadd.f32 %v255_v47, %v639_v57  ;;  %v304_v49 = vpop.f32.mrf.mxu3 }
  0xe3   :  { %v305_v50 = vadd.f32 %v304_v49, %v641_v58  ;;  %v237_v51 = vpop.f32.mrf.mxu0 }
  0xe4   :  { %337 = vst [vmem:[#allocation7 + $0xe0] sm:$0xff] %v256_v48  ;;  %v238_v52 = vadd.f32 %v237_v51, %v639_v57  ;;  %v286_v53 = vpop.f32.mrf.mxu1 }
  0xe5   :  { %338 = vst [vmem:[#allocation7 + $0xe8] sm:$0xff] %v305_v50  ;;  %v287_v54 = vadd.f32 %v286_v53, %v641_v58 }
  0xe6   :  { %323 = vst [vmem:[#allocation7 + $0x70] sm:$0xff] %v238_v52 }
  0xe7   :  { %324 = vst [vmem:[#allocation7 + $0x78] sm:$0xff] %v287_v54 }
  0xe9   :  { %v257_v55 = vpop.f32.mrf.mxu2 }
  0xea   :  { %v258_v56 = vadd.f32 %v257_v55, %v639_v57  ;;  %v306_v59 = vpop.f32.mrf.mxu3 }
  0xeb   :  { %v307_v60 = vadd.f32 %v306_v59, %v641_v58 }
  0xec   :  { %339 = vst [vmem:[#allocation7 + $0xf0] sm:$0xff] %v258_v56 }
  0xed   :  { %340 = vst [vmem:[#allocation7 + $0xf8] sm:$0xff] %v307_v60 }
  0xee   :  { %353 = dma.vmem_to_hbm [thread:$0]  %s346_s11, 4096, %s348_s14, [#allocation4], %s587_s15, %s587_s15, %s588_s16  }
  0xef   :  { %580 = dma.done.wait [#allocation4], 4096  }
  0xf0   :  { %581 = vsyncadd [#allocation4], 4294963200 }
  0xf1   :  { %358 = vsyncpa [#allocation3], 1 }
  0xf2   :  { %359 = vsyncpa [#allocation6], 1 }
  0xf3   :  { %360 = vsyncpa [#allocation4], 1 }

// kernel: gpt_forward.3
= control target key start
LH: loop header
LB: loop body
LE: loop exit
PB: predicated region body
PF: predicated region fallthrough
CT: control target
= control target key end

     0   :  { %9 = vsyncpa [#allocation6], 0  ;;  %s4648_s0 = inlined_call_operand.vmem [shape: bf16[128,128], index: 0, kind: input, shape index: {}]   ;;  %s4649_s1 = inlined_call_operand.hbm [shape: bf16[128,512], index: 1, kind: input, shape index: {}]   ;;  %s4650_s2 = inlined_call_operand.hbm [shape: bf16[128,512], index: 2, kind: input, shape index: {}]   ;;  %s4651_s3 = inlined_call_operand.hbm [shape: f32[1,512], index: 3, kind: input, shape index: {}]   ;;  %s4652_s4 = inlined_call_operand.vmem [shape: bf16[128,128], index: 4, kind: output, shape index: {}]  }
   0x1   :  { %10 = vsyncpa [#allocation8], 0  ;;  %s30_s17 = sshll.u32 %s4650_s2, 4  ;;  %s3636_s18 = smov [#allocation7]   ;;  %s31_s17 = int_to_ptr.hbm [resolvable:$true] %s30_s17 }
   0x2   :  { %s32_s19 = sshll.u32 %s3636_s18, 4  ;;  %s17_s22 = sshll.u32 %s4649_s1, 4  ;;  %s33_s19 = int_to_ptr.vmem [resolvable:$true] %s32_s19  ;;  %s18_s22 = int_to_ptr.hbm [resolvable:$true] %s17_s22 }
   0x3   :  { %s3637_s23 = smov 256   ;;  %s3638_s24 = smov 16  }
   0x4   :  { %38 = dma.hbm_to_vmem [thread:$0]  %s31_s17, 4096, %s33_s19, [#allocation8], %s3637_s23, %s3637_s23, %s3638_s24  }
   0x5   :  { %s3639_s25 = smov [#allocation5]   ;;  %s44_s29 = sshll.u32 %s4651_s3, 4  ;;  %s45_s29 = int_to_ptr.hbm [resolvable:$true] %s44_s29 }
   0x6   :  { %s19_s26 = sshll.u32 %s3639_s25, 4  ;;  %s3640_s2 = smov [#allocation9]   ;;  %s20_s26 = int_to_ptr.vmem [resolvable:$true] %s19_s26 }
   0x7   :  { %25 = dma.hbm_to_vmem [thread:$0]  %s18_s22, 4096, %s20_s26, [#allocation6], %s3637_s23, %s3637_s23, %s3638_s24  }
   0x8   :  { %s46_s30 = sshll.u32 %s3640_s2, 4  ;;  %s47_s30 = int_to_ptr.vmem [resolvable:$true] %s46_s30 }
   0x9   :  { %49 = dma.hbm_to_vmem [thread:$0]  %s45_s29, 64, %s47_s30, [#allocation8]  }
   0xa   :  { %3632 = dma.done.wait [#allocation6], 4096  }
   0xb   :  { %3633 = vsyncadd [#allocation6], 4294963200 }
   0xc   :  { %3634 = dma.done.wait [#allocation8], 4160  }
   0xd   :  { %3635 = vsyncadd [#allocation8], 4294963136  ;;  %v3021_v0 = vld [vmem:[#allocation5 + $0xe0] sm:$0xf]  ;;  %v3264_v1 = vld [vmem:[#allocation5 + $0xec] sm:$0xf0] }
   0xe   :  { %v3262_v2 = vld [vmem:[#allocation5 + $0xe4] sm:$0xf]  ;;  %v3022_v3 = vor.u32 %v3264_v1, %v3021_v0  ;;  %v3023_v4 = vld [vmem:[#allocation5 + $0xf0] sm:$0xf0]  ;;  %v3029_v5 = vld [vmem:[#allocation5 + $0xe8] sm:$0xf] }
   0xf   :  { %v3265_v6 = vld [vmem:[#allocation5 + $0xf4] sm:$0xf0]  ;;  %v3026_v7 = vor.u32 %v3262_v2, %v3023_v4  ;;  %v3263_v9 = vld [vmem:[#allocation5 + $0xec] sm:$0xf]  ;;  %v3031_v10 = vld [vmem:[#allocation5 + $0xf8] sm:$0xf0] }
  0x10   :  { %v3030_v8 = vor.u32 %v3265_v6, %v3029_v5  ;;  %v3005_v11 = vld [vmem:[#allocation5 + $0xc0] sm:$0xf]  ;;  %334 = vmatpush.bf16.msra.mxu0 %v3022_v3  ;;  %v3034_v12 = vor.u32 %v3263_v9, %v3031_v10  ;;  %v3260_v13 = vld [vmem:[#allocation5 + $0xcc] sm:$0xf0]  ;;  %v3258_v14 = vld [vmem:[#allocation5 + $0xc4] sm:$0xf] }
  0x11   :  { %v3007_v15 = vld [vmem:[#allocation5 + $0xd0] sm:$0xf0]  ;;  %383 = vmatpush.bf16.msra.mxu1 %v3026_v7  ;;  %v3006_v16 = vor.u32 %v3260_v13, %v3005_v11  ;;  %v3013_v18 = vld [vmem:[#allocation5 + $0xc8] sm:$0xf]  ;;  %v3261_v19 = vld [vmem:[#allocation5 + $0xd4] sm:$0xf0] }
  0x12   :  { %432 = vmatpush.bf16.msra.mxu2 %v3030_v8  ;;  %v3010_v17 = vor.u32 %v3258_v14, %v3007_v15  ;;  %v3259_v20 = vld [vmem:[#allocation5 + $0xcc] sm:$0xf]  ;;  %481 = vmatpush.bf16.msra.mxu3 %v3034_v12  ;;  %v3014_v21 = vor.u32 %v3261_v19, %v3013_v18  ;;  %v3015_v22 = vld [vmem:[#allocation5 + $0xd8] sm:$0xf0]  ;;  %v2989_v23 = vld [vmem:[#allocation5 + $0xa0] sm:$0xf] }
  0x13   :  { %v3256_v24 = vld [vmem:[#allocation5 + $0xac] sm:$0xf0]  ;;  %v3018_v25 = vor.u32 %v3259_v20, %v3015_v22  ;;  %v3254_v26 = vld [vmem:[#allocation5 + $0xa4] sm:$0xf]  ;;  %v2991_v27 = vld [vmem:[#allocation5 + $0xb0] sm:$0xf0] }
  0x14   :  { %v2997_v28 = vld [vmem:[#allocation5 + $0xa8] sm:$0xf]  ;;  %335 = vmatpush.bf16.msra.mxu0 %v3006_v16  ;;  %v2990_v29 = vor.u32 %v3256_v24, %v2989_v23  ;;  %v3257_v30 = vld [vmem:[#allocation5 + $0xb4] sm:$0xf0]  ;;  %v3255_v31 = vld [vmem:[#allocation5 + $0xac] sm:$0xf]  ;;  %v2994_v33 = vor.u32 %v3254_v26, %v2991_v27 }
  0x15   :  { %v2999_v32 = vld [vmem:[#allocation5 + $0xb8] sm:$0xf0]  ;;  %384 = vmatpush.bf16.msra.mxu1 %v3010_v17  ;;  %v2998_v34 = vor.u32 %v3257_v30, %v2997_v28  ;;  %v2973_v35 = vld [vmem:[#allocation5 + $0x80] sm:$0xf]  ;;  %v3252_v36 = vld [vmem:[#allocation5 + $0x8c] sm:$0xf0] }
  0x16   :  { %433 = vmatpush.bf16.msra.mxu2 %v3014_v21  ;;  %v3250_v37 = vld [vmem:[#allocation5 + $0x84] sm:$0xf]  ;;  %482 = vmatpush.bf16.msra.mxu3 %v3018_v25  ;;  %v3002_v38 = vor.u32 %v3255_v31, %v2999_v32  ;;  %v2975_v39 = vld [vmem:[#allocation5 + $0x90] sm:$0xf0]  ;;  %v2981_v40 = vld [vmem:[#allocation5 + $0x88] sm:$0xf]  ;;  %v2974_v44 = vor.u32 %v3252_v36, %v2973_v35 }
  0x17   :  { %v3253_v41 = vld [vmem:[#allocation5 + $0x94] sm:$0xf0]  ;;  %v3251_v42 = vld [vmem:[#allocation5 + $0x8c] sm:$0xf]  ;;  %v2983_v43 = vld [vmem:[#allocation5 + $0x98] sm:$0xf0]  ;;  %v2978_v45 = vor.u32 %v3250_v37, %v2975_v39 }
  0x18   :  { %336 = vmatpush.bf16.msra.mxu0 %v2990_v29  ;;  %v2982_v46 = vor.u32 %v3253_v41, %v2981_v40  ;;  %v2957_v47 = vld [vmem:[#allocation5 + $0x60] sm:$0xf]  ;;  %v3248_v48 = vld [vmem:[#allocation5 + $0x6c] sm:$0xf0]  ;;  %v3246_v49 = vld [vmem:[#allocation5 + $0x64] sm:$0xf]  ;;  %v2986_v50 = vor.u32 %v3251_v42, %v2983_v43 }
  0x19   :  { %385 = vmatpush.bf16.msra.mxu1 %v2994_v33  ;;  %v2959_v51 = vld [vmem:[#allocation5 + $0x70] sm:$0xf0]  ;;  %v2965_v52 = vld [vmem:[#allocation5 + $0x68] sm:$0xf]  ;;  %v3249_v53 = vld [vmem:[#allocation5 + $0x74] sm:$0xf0]  ;;  %v2958_v56 = vor.u32 %v3248_v48, %v2957_v47 }
  0x1a   :  { %434 = vmatpush.bf16.msra.mxu2 %v2998_v34  ;;  %483 = vmatpush.bf16.msra.mxu3 %v3002_v38  ;;  %v3247_v54 = vld [vmem:[#allocation5 + $0x6c] sm:$0xf]  ;;  %v2967_v55 = vld [vmem:[#allocation5 + $0x78] sm:$0xf0]  ;;  %v2962_v57 = vor.u32 %v3246_v49, %v2959_v51  ;;  %v2966_v58 = vor.u32 %v3249_v53, %v2965_v52  ;;  %v2941_v59 = vld [vmem:[#allocation5 + $0x40] sm:$0xf] }
  0x1b   :  { %v3244_v60 = vld [vmem:[#allocation5 + $0x4c] sm:$0xf0]  ;;  %v3242_v61 = vld [vmem:[#allocation5 + $0x44] sm:$0xf]  ;;  %v2970_v62 = vor.u32 %v3247_v54, %v2967_v55  ;;  %v2943_v63 = vld [vmem:[#allocation5 + $0x50] sm:$0xf0] }
  0x1c   :  { %337 = vmatpush.bf16.msra.mxu0 %v2974_v44  ;;  %v2949_v0 = vld [vmem:[#allocation5 + $0x48] sm:$0xf]  ;;  %v3245_v1 = vld [vmem:[#allocation5 + $0x54] sm:$0xf0]  ;;  %v3243_v2 = vld [vmem:[#allocation5 + $0x4c] sm:$0xf]  ;;  %v2942_v4 = vor.u32 %v3244_v60, %v2941_v59  ;;  %v2946_v5 = vor.u32 %v3242_v61, %v2943_v63 }
  0x1d   :  { %386 = vmatpush.bf16.msra.mxu1 %v2978_v45  ;;  %v2951_v3 = vld [vmem:[#allocation5 + $0x58] sm:$0xf0]  ;;  %v2950_v6 = vor.u32 %v3245_v1, %v2949_v0  ;;  %v2925_v7 = vld [vmem:[#allocation5 + $0x20] sm:$0xf]  ;;  %v3240_v8 = vld [vmem:[#allocation5 + $0x2c] sm:$0xf0] }
  0x1e   :  { %435 = vmatpush.bf16.msra.mxu2 %v2982_v46  ;;  %484 = vmatpush.bf16.msra.mxu3 %v2986_v50  ;;  %v3238_v9 = vld [vmem:[#allocation5 + $0x24] sm:$0xf]  ;;  %v2954_v10 = vor.u32 %v3243_v2, %v2951_v3  ;;  %v2927_v11 = vld [vmem:[#allocation5 + $0x30] sm:$0xf0]  ;;  %v2933_v12 = vld [vmem:[#allocation5 + $0x28] sm:$0xf]  ;;  %v2926_v16 = vor.u32 %v3240_v8, %v2925_v7 }
  0x1f   :  { %v3241_v13 = vld [vmem:[#allocation5 + $0x34] sm:$0xf0]  ;;  %v3239_v14 = vld [vmem:[#allocation5 + $0x2c] sm:$0xf]  ;;  %v2935_v15 = vld [vmem:[#allocation5 + $0x38] sm:$0xf0]  ;;  %v2930_v18 = vor.u32 %v3238_v9, %v2927_v11 }
  0x20   :  { %338 = vmatpush.bf16.msra.mxu0 %v2958_v56  ;;  %v2909_v17 = vld [vmem:[#allocation5] sm:$0xf]  ;;  %v2934_v19 = vor.u32 %v3241_v13, %v2933_v12  ;;  %v3236_v20 = vld [vmem:[#allocation5 + $0xc] sm:$0xf0]  ;;  %v3234_v21 = vld [vmem:[#allocation5 + $0x4] sm:$0xf]  ;;  %v2938_v23 = vor.u32 %v3239_v14, %v2935_v15 }
  0x21   :  { %387 = vmatpush.bf16.msra.mxu1 %v2962_v57  ;;  %v2911_v22 = vld [vmem:[#allocation5 + $0x10] sm:$0xf0]  ;;  %v2917_v24 = vld [vmem:[#allocation5 + $0x8] sm:$0xf]  ;;  %v3237_v25 = vld [vmem:[#allocation5 + $0x14] sm:$0xf0]  ;;  %v2910_v30 = vor.u32 %v3236_v20, %v2909_v17 }
  0x22   :  { %436 = vmatpush.bf16.msra.mxu2 %v2966_v58  ;;  %485 = vmatpush.bf16.msra.mxu3 %v2970_v62  ;;  %v3235_v26 = vld [vmem:[#allocation5 + $0xc] sm:$0xf]  ;;  %v2919_v27 = vld [vmem:[#allocation5 + $0x18] sm:$0xf0]  ;;  %v3149_v28 = vld [vmem:[#allocation7 + $0xe0] sm:$0xf]  ;;  %v2914_v33 = vor.u32 %v3234_v21, %v2911_v22  ;;  %v2918_v34 = vor.u32 %v3237_v25, %v2917_v24 }
  0x23   :  { %v3296_v29 = vld [vmem:[#allocation7 + $0xec] sm:$0xf0]  ;;  %v3294_v31 = vld [vmem:[#allocation7 + $0xe4] sm:$0xf]  ;;  %v3151_v32 = vld [vmem:[#allocation7 + $0xf0] sm:$0xf0]  ;;  %v2922_v36 = vor.u32 %v3235_v26, %v2919_v27 }
  0x24   :  { %339 = vmatpush.bf16.msra.mxu0 %v2942_v4  ;;  %v3226_v35 = vld [vmem:[%s4648_s0] sm:$0xff]  ;;  %v3679_v37 = vor.u32 %v3296_v29, %v3149_v28  ;;  %v3295_v38 = vld [vmem:[#allocation7 + $0xec] sm:$0xf]  ;;  %v3157_v39 = vld [vmem:[#allocation7 + $0xe8] sm:$0xf]  ;;  %v3681_v41 = vor.u32 %v3294_v31, %v3151_v32 }
  0x25   :  { %388 = vmatpush.bf16.msra.mxu1 %v2946_v5  ;;  %v3297_v40 = vld [vmem:[#allocation7 + $0xf4] sm:$0xf0]  ;;  %v3159_v42 = vld [vmem:[#allocation7 + $0xf8] sm:$0xf0]  ;;  %v3133_v43 = vld [vmem:[#allocation7 + $0xc0] sm:$0xf] }
  0x26   :  { %437 = vmatpush.bf16.msra.mxu2 %v2950_v6  ;;  %486 = vmatpush.bf16.msra.mxu3 %v2954_v10  ;;  %v3292_v44 = vld [vmem:[#allocation7 + $0xcc] sm:$0xf0]  ;;  %v3290_v45 = vld [vmem:[#allocation7 + $0xc4] sm:$0xf]  ;;  %v3135_v46 = vld [vmem:[#allocation7 + $0xd0] sm:$0xf0]  ;;  %v3683_v47 = vor.u32 %v3297_v40, %v3157_v39  ;;  %v3686_v48 = vor.u32 %v3295_v38, %v3159_v42 }
  0x27   :  { %v3688_v49 = vor.u32 %v3292_v44, %v3133_v43  ;;  %v3141_v50 = vld [vmem:[#allocation7 + $0xc8] sm:$0xf]  ;;  %v3293_v51 = vld [vmem:[#allocation7 + $0xd4] sm:$0xf0]  ;;  %v3691_v52 = vor.u32 %v3290_v45, %v3135_v46  ;;  %v3291_v53 = vld [vmem:[#allocation7 + $0xcc] sm:$0xf] }
  0x28   :  { %340 = vmatpush.bf16.msra.mxu0 %v2926_v16  ;;  %v3143_v54 = vld [vmem:[#allocation7 + $0xd8] sm:$0xf0]  ;;  %v3694_v55 = vor.u32 %v3293_v51, %v3141_v50  ;;  %v3117_v56 = vld [vmem:[#allocation7 + $0xa0] sm:$0xf]  ;;  %v3288_v57 = vld [vmem:[#allocation7 + $0xac] sm:$0xf0] }
  0x29   :  { %389 = vmatpush.bf16.msra.mxu1 %v2930_v18  ;;  %v3286_v58 = vld [vmem:[#allocation7 + $0xa4] sm:$0xf]  ;;  %v3698_v59 = vor.u32 %v3291_v53, %v3143_v54  ;;  %v3700_v60 = vor.u32 %v3288_v57, %v3117_v56  ;;  %v3119_v61 = vld [vmem:[#allocation7 + $0xb0] sm:$0xf0]  ;;  %v3287_v62 = vld [vmem:[#allocation7 + $0xac] sm:$0xf] }
  0x2a   :  { %438 = vmatpush.bf16.msra.mxu2 %v2934_v19  ;;  %487 = vmatpush.bf16.msra.mxu3 %v2938_v23  ;;  %v3703_v63 = vor.u32 %v3286_v58, %v3119_v61  ;;  %v3127_v0 = vld [vmem:[#allocation7 + $0xb8] sm:$0xf0]  ;;  %v3125_v1 = vld [vmem:[#allocation7 + $0xa8] sm:$0xf]  ;;  %v3289_v2 = vld [vmem:[#allocation7 + $0xb4] sm:$0xf0] }
  0x2b   :  { %v3706_v3 = vor.u32 %v3289_v2, %v3125_v1  ;;  %v3710_v4 = vor.u32 %v3287_v62, %v3127_v0  ;;  %v3227_v5 = vld [vmem:[%s4648_s0 + $0x8] sm:$0xff]  ;;  %v3101_v6 = vld [vmem:[#allocation7 + $0x80] sm:$0xf]  ;;  %v3284_v7 = vld [vmem:[#allocation7 + $0x8c] sm:$0xf0] }
  0x2c   :  { %341 = vmatpush.bf16.msra.mxu0 %v2910_v30  ;;  %v3282_v8 = vld [vmem:[#allocation7 + $0x84] sm:$0xf]  ;;  %v3718_v9 = vor.u32 %v3284_v7, %v3101_v6  ;;  %v3103_v10 = vld [vmem:[#allocation7 + $0x90] sm:$0xf0]  ;;  %v3283_v11 = vld [vmem:[#allocation7 + $0x8c] sm:$0xf] }
  0x2d   :  { %390 = vmatpush.bf16.msra.mxu1 %v2914_v33  ;;  %v3111_v12 = vld [vmem:[#allocation7 + $0x98] sm:$0xf0]  ;;  %v3720_v13 = vor.u32 %v3282_v8, %v3103_v10  ;;  %v3109_v15 = vld [vmem:[#allocation7 + $0x88] sm:$0xf]  ;;  %v3285_v16 = vld [vmem:[#allocation7 + $0x94] sm:$0xf0] }
  0x2e   :  { %439 = vmatpush.bf16.msra.mxu2 %v2918_v34  ;;  %488 = vmatpush.bf16.msra.mxu3 %v2922_v36  ;;  %v3722_v14 = vor.u32 %v3283_v11, %v3111_v12  ;;  %v3725_v17 = vor.u32 %v3285_v16, %v3109_v15  ;;  %v3228_v18 = vld [vmem:[%s4648_s0 + $0x10] sm:$0xff]  ;;  %v3085_v19 = vld [vmem:[#allocation7 + $0x60] sm:$0xf]  ;;  %v3278_v21 = vld [vmem:[#allocation7 + $0x64] sm:$0xf] }
  0x2f   :  { %342 = vmatmul.bf16.vlgmr.msra.gmra.mxu0 %v3226_v35  ;;  %v3280_v20 = vld [vmem:[#allocation7 + $0x6c] sm:$0xf0]  ;;  %v3087_v23 = vld [vmem:[#allocation7 + $0x70] sm:$0xf0]  ;;  %v3279_v24 = vld [vmem:[#allocation7 + $0x6c] sm:$0xf] }
  0x30   :  { %796 = vmatpush.bf16.msrb.mxu0 %v3679_v37  ;;  %391 = vmatmul.bf16.vlgmr.msra.gmra.mxu1 %v3226_v35  ;;  %v3733_v22 = vor.u32 %v3280_v20, %v3085_v19  ;;  %v3095_v25 = vld [vmem:[#allocation7 + $0x78] sm:$0xf0]  ;;  %v3735_v26 = vor.u32 %v3278_v21, %v3087_v23  ;;  %v3093_v28 = vld [vmem:[#allocation7 + $0x68] sm:$0xf]  ;;  %v3281_v29 = vld [vmem:[#allocation7 + $0x74] sm:$0xf0] }
  0x31   :  { %809 = vmatpush.bf16.msrb.mxu1 %v3681_v41  ;;  %440 = vmatmul.bf16.vlgmr.msra.gmra.mxu2 %v3226_v35  ;;  %v3737_v27 = vor.u32 %v3279_v24, %v3095_v25  ;;  %v3740_v30 = vor.u32 %v3281_v29, %v3093_v28  ;;  %v3229_v31 = vld [vmem:[%s4648_s0 + $0x18] sm:$0xff]  ;;  %v3069_v32 = vld [vmem:[#allocation7 + $0x40] sm:$0xf]  ;;  %v3276_v33 = vld [vmem:[#allocation7 + $0x4c] sm:$0xf0]  ;;  %v3641_v29 = vmov 0.0|0.0  }
  0x32   :  { %489 = vmatmul.bf16.vlgmr.msra.gmra.mxu3 %v3226_v35  ;;  %822 = vmatpush.bf16.msrb.mxu2 %v3683_v47  ;;  %v3274_v34 = vld [vmem:[#allocation7 + $0x44] sm:$0xf]  ;;  %v3748_v35 = vor.u32 %v3276_v33, %v3069_v32  ;;  %v3071_v36 = vld [vmem:[#allocation7 + $0x50] sm:$0xf0]  ;;  %v3275_v38 = vld [vmem:[#allocation7 + $0x4c] sm:$0xf] }
  0x33   :  { %835 = vmatpush.bf16.msrb.mxu3 %v3686_v48  ;;  %v3079_v39 = vld [vmem:[#allocation7 + $0x58] sm:$0xf0]  ;;  %v3750_v40 = vor.u32 %v3274_v34, %v3071_v36  ;;  %v3077_v43 = vld [vmem:[#allocation7 + $0x48] sm:$0xf]  ;;  %v3277_v44 = vld [vmem:[#allocation7 + $0x54] sm:$0xf0] }
  0x34   :  { %797 = vmatpush.bf16.msrb.mxu0 %v3688_v49  ;;  %v3752_v42 = vor.u32 %v3275_v38, %v3079_v39  ;;  %v3755_v45 = vor.u32 %v3277_v44, %v3077_v43  ;;  %v3230_v46 = vld [vmem:[%s4648_s0 + $0x20] sm:$0xff]  ;;  %v3272_v51 = vld [vmem:[#allocation7 + $0x2c] sm:$0xf0]  ;;  %v3055_v56 = vld [vmem:[#allocation7 + $0x30] sm:$0xf0] }
  0x35   :  { %810 = vmatpush.bf16.msrb.mxu1 %v3691_v52  ;;  %v3053_v50 = vld [vmem:[#allocation7 + $0x20] sm:$0xf]  ;;  %v3270_v53 = vld [vmem:[#allocation7 + $0x24] sm:$0xf]  ;;  %v3271_v57 = vld [vmem:[#allocation7 + $0x2c] sm:$0xf] }
  0x36   :  { %823 = vmatpush.bf16.msrb.mxu2 %v3694_v55  ;;  %v3763_v54 = vor.u32 %v3272_v51, %v3053_v50  ;;  %v3063_v58 = vld [vmem:[#allocation7 + $0x38] sm:$0xf0]  ;;  %v3765_v61 = vor.u32 %v3270_v53, %v3055_v56  ;;  %v3061_v0 = vld [vmem:[#allocation7 + $0x28] sm:$0xf]  ;;  %v3273_v1 = vld [vmem:[#allocation7 + $0x34] sm:$0xf0] }
  0x37   :  { %836 = vmatpush.bf16.msrb.mxu3 %v3698_v59  ;;  %v3767_v62 = vor.u32 %v3271_v57, %v3063_v58  ;;  %v3770_v2 = vor.u32 %v3273_v1, %v3061_v0  ;;  %v3037_v6 = vld [vmem:[#allocation7] sm:$0xf]  ;;  %v3268_v7 = vld [vmem:[#allocation7 + $0xc] sm:$0xf0]  ;;  %v3266_v8 = vld [vmem:[#allocation7 + $0x4] sm:$0xf] }
  0x38   :  { %798 = vmatpush.bf16.msrb.mxu0 %v3700_v60  ;;  %v3778_v10 = vor.u32 %v3268_v7, %v3037_v6  ;;  %v3039_v11 = vld [vmem:[#allocation7 + $0x10] sm:$0xf0]  ;;  %v3267_v12 = vld [vmem:[#allocation7 + $0xc] sm:$0xf]  ;;  %v3047_v15 = vld [vmem:[#allocation7 + $0x18] sm:$0xf0] }
  0x39   :  { %811 = vmatpush.bf16.msrb.mxu1 %v3703_v63  ;;  %v3780_v16 = vor.u32 %v3266_v8, %v3039_v11  ;;  %v3232_v19 = vld [vmem:[%s4648_s0 + $0x30] sm:$0xff]  ;;  %v3045_v20 = vld [vmem:[#allocation7 + $0x8] sm:$0xf]  ;;  %v3269_v21 = vld [vmem:[#allocation7 + $0x14] sm:$0xf0] }
  0x3a   :  { %824 = vmatpush.bf16.msrb.mxu2 %v3706_v3  ;;  %v3796_v23 = vor.u32 %v3269_v21, %v3045_v20  ;;  %v3233_v24 = vld [vmem:[%s4648_s0 + $0x38] sm:$0xff] }
  0x3b   :  { %837 = vmatpush.bf16.msrb.mxu3 %v3710_v4 }
  0x3c   :  { %799 = vmatpush.bf16.msrb.mxu0 %v3718_v9 }
  0x3d   :  { %812 = vmatpush.bf16.msrb.mxu1 %v3720_v13 }
  0x3e   :  { %825 = vmatpush.bf16.msrb.mxu2 %v3725_v17 }
  0x3f   :  { %347 = vmatmul.bf16.gmra.mxu0 %v3227_v5  ;;  %838 = vmatpush.bf16.msrb.mxu3 %v3722_v14 }
  0x40   :  { %396 = vmatmul.bf16.gmra.mxu1 %v3227_v5  ;;  %800 = vmatpush.bf16.msrb.mxu0 %v3733_v22 }
  0x41   :  { %445 = vmatmul.bf16.gmra.mxu2 %v3227_v5  ;;  %813 = vmatpush.bf16.msrb.mxu1 %v3735_v26 }
  0x42   :  { %494 = vmatmul.bf16.gmra.mxu3 %v3227_v5  ;;  %826 = vmatpush.bf16.msrb.mxu2 %v3740_v30  ;;  %v3231_v5 = vld [vmem:[%s4648_s0 + $0x28] sm:$0xff] }
  0x43   :  { %839 = vmatpush.bf16.msrb.mxu3 %v3737_v27 }
  0x44   :  { %801 = vmatpush.bf16.msrb.mxu0 %v3748_v35 }
  0x45   :  { %814 = vmatpush.bf16.msrb.mxu1 %v3750_v40 }
  0x46   :  { %827 = vmatpush.bf16.msrb.mxu2 %v3755_v45 }
  0x47   :  { %840 = vmatpush.bf16.msrb.mxu3 %v3752_v42 }
  0x48   :  { %802 = vmatpush.bf16.msrb.mxu0 %v3763_v54 }
  0x49   :  { %815 = vmatpush.bf16.msrb.mxu1 %v3765_v61 }
  0x4a   :  { %828 = vmatpush.bf16.msrb.mxu2 %v3770_v2 }
  0x4b   :  { %841 = vmatpush.bf16.msrb.mxu3 %v3767_v62 }
  0x4c   :  { %803 = vmatpush.bf16.msrb.mxu0 %v3778_v10 }
  0x4d   :  { %816 = vmatpush.bf16.msrb.mxu1 %v3780_v16 }
  0x4e   :  { %829 = vmatpush.bf16.msrb.mxu2 %v3796_v23 }
  0x4f   :  { %352 = vmatmul.bf16.gmra.mxu0 %v3228_v18 }
  0x50   :  { %401 = vmatmul.bf16.gmra.mxu1 %v3228_v18  ;;  %924 = vmatpush.bf16.msra.mxu0 %v3679_v37 }
  0x51   :  { %450 = vmatmul.bf16.gmra.mxu2 %v3228_v18  ;;  %937 = vmatpush.bf16.msra.mxu1 %v3681_v41 }
  0x52   :  { %499 = vmatmul.bf16.gmra.mxu3 %v3228_v18  ;;  %v3782_v18 = vor.u32 %v3267_v12, %v3047_v15  ;;  %950 = vmatpush.bf16.msra.mxu2 %v3683_v47 }
  0x54   :  { %842 = vmatpush.bf16.msrb.mxu3 %v3782_v18  ;;  %925 = vmatpush.bf16.msra.mxu0 %v3688_v49 }
  0x55   :  { %938 = vmatpush.bf16.msra.mxu1 %v3691_v52 }
  0x56   :  { %951 = vmatpush.bf16.msra.mxu2 %v3694_v55 }
  0x58   :  { %963 = vmatpush.bf16.msra.mxu3 %v3686_v48  ;;  %926 = vmatpush.bf16.msra.mxu0 %v3700_v60 }
  0x59   :  { %939 = vmatpush.bf16.msra.mxu1 %v3703_v63 }
  0x5a   :  { %952 = vmatpush.bf16.msra.mxu2 %v3706_v3 }
  0x5c   :  { %964 = vmatpush.bf16.msra.mxu3 %v3698_v59  ;;  %927 = vmatpush.bf16.msra.mxu0 %v3718_v9 }
  0x5d   :  { %940 = vmatpush.bf16.msra.mxu1 %v3720_v13 }
  0x5e   :  { %953 = vmatpush.bf16.msra.mxu2 %v3725_v17 }
  0x5f   :  { %357 = vmatmul.bf16.gmra.mxu0 %v3229_v31 }
  0x60   :  { %406 = vmatmul.bf16.gmra.mxu1 %v3229_v31  ;;  %965 = vmatpush.bf16.msra.mxu3 %v3710_v4 }
  0x61   :  { %455 = vmatmul.bf16.gmra.mxu2 %v3229_v31  ;;  %928 = vmatpush.bf16.msra.mxu0 %v3733_v22 }
  0x62   :  { %504 = vmatmul.bf16.gmra.mxu3 %v3229_v31  ;;  %941 = vmatpush.bf16.msra.mxu1 %v3735_v26 }
  0x63   :  { %954 = vmatpush.bf16.msra.mxu2 %v3740_v30 }
  0x64   :  { %966 = vmatpush.bf16.msra.mxu3 %v3722_v14 }
  0x65   :  { %929 = vmatpush.bf16.msra.mxu0 %v3748_v35 }
  0x66   :  { %942 = vmatpush.bf16.msra.mxu1 %v3750_v40 }
  0x67   :  { %955 = vmatpush.bf16.msra.mxu2 %v3755_v45 }
  0x68   :  { %967 = vmatpush.bf16.msra.mxu3 %v3737_v27 }
  0x69   :  { %930 = vmatpush.bf16.msra.mxu0 %v3763_v54 }
  0x6a   :  { %943 = vmatpush.bf16.msra.mxu1 %v3765_v61 }
  0x6b   :  { %956 = vmatpush.bf16.msra.mxu2 %v3770_v2 }
  0x6c   :  { %968 = vmatpush.bf16.msra.mxu3 %v3752_v42 }
  0x6d   :  { %931 = vmatpush.bf16.msra.mxu0 %v3778_v10 }
  0x6e   :  { %944 = vmatpush.bf16.msra.mxu1 %v3780_v16 }
  0x6f   :  { %362 = vmatmul.bf16.gmra.mxu0 %v3230_v46  ;;  %957 = vmatpush.bf16.msra.mxu2 %v3796_v23 }
  0x70   :  { %411 = vmatmul.bf16.gmra.mxu1 %v3230_v46  ;;  %969 = vmatpush.bf16.msra.mxu3 %v3767_v62 }
  0x71   :  { %460 = vmatmul.bf16.gmra.mxu2 %v3230_v46 }
  0x72   :  { %509 = vmatmul.bf16.gmra.mxu3 %v3230_v46 }
  0x74   :  { %970 = vmatpush.bf16.msra.mxu3 %v3782_v18 }
  0x7f   :  { %367 = vmatmul.bf16.gmra.mxu0 %v3231_v5 }
  0x80   :  { %416 = vmatmul.bf16.gmra.mxu1 %v3231_v5 }
  0x81   :  { %465 = vmatmul.bf16.gmra.mxu2 %v3231_v5 }
  0x82   :  { %514 = vmatmul.bf16.gmra.mxu3 %v3231_v5 }
  0x8f   :  { %372 = vmatmul.bf16.gmra.mxu0 %v3232_v19 }
  0x90   :  { %421 = vmatmul.bf16.gmra.mxu1 %v3232_v19 }
  0x91   :  { %470 = vmatmul.bf16.gmra.mxu2 %v3232_v19 }
  0x92   :  { %519 = vmatmul.bf16.gmra.mxu3 %v3232_v19 }
  0x9f   :  { %377 = vmatmul.bf16.gmra.mxu0 %v3233_v24 }
  0xa0   :  { %426 = vmatmul.bf16.gmra.mxu1 %v3233_v24 }
  0xa1   :  { %475 = vmatmul.bf16.gmra.mxu2 %v3233_v24 }
  0xa2   :  { %524 = vmatmul.bf16.gmra.mxu3 %v3233_v24 }
  0xac   :  { %v3828_v25 = vpop.f32.mrf.mxu0 }
  0xad   :  { %v3830_v28 = vpop.f32.mrf.mxu1 }
  0xaf   :  { %804 = vmatmul.bf16.vlgmr.msrb.gmra.mxu0 %v3641_v29 }
  0xb0   :  { %817 = vmatmul.bf16.vlgmr.msrb.gmra.mxu1 %v3641_v29  ;;  %1053 = vmatpush.bf16.msrb.mxu0 %v3679_v37 }
  0xb1   :  { %830 = vmatmul.bf16.vlgmr.msrb.gmra.mxu2 %v3641_v29  ;;  %1066 = vmatpush.bf16.msrb.mxu1 %v3681_v41 }
  0xb2   :  { %843 = vmatmul.bf16.vlgmr.msrb.gmra.mxu3 %v3641_v29  ;;  %1079 = vmatpush.bf16.msrb.mxu2 %v3683_v47 }
  0xb3   :  { %1092 = vmatpush.bf16.msrb.mxu3 %v3686_v48 }
  0xb4   :  { %v3835_v31 = vpop.f32.mrf.mxu2  ;;  %v3840_v33 = vpop.f32.mrf.mxu0  ;;  %1054 = vmatpush.bf16.msrb.mxu0 %v3688_v49 }
  0xb5   :  { %v3838_v32 = vpop.f32.mrf.mxu3  ;;  %v3842_v34 = vpop.f32.mrf.mxu1  ;;  %1067 = vmatpush.bf16.msrb.mxu1 %v3691_v52 }
  0xb6   :  { %1080 = vmatpush.bf16.msrb.mxu2 %v3694_v55 }
  0xb7   :  { %1093 = vmatpush.bf16.msrb.mxu3 %v3698_v59 }
  0xb8   :  { %1055 = vmatpush.bf16.msrb.mxu0 %v3700_v60 }
  0xb9   :  { %1068 = vmatpush.bf16.msrb.mxu1 %v3703_v63 }
  0xba   :  { %1081 = vmatpush.bf16.msrb.mxu2 %v3706_v3 }
  0xbb   :  { %1094 = vmatpush.bf16.msrb.mxu3 %v3710_v4 }
  0xbc   :  { %v3851_v36 = vpop.f32.mrf.mxu2  ;;  %v3856_v39 = vpop.f32.mrf.mxu0  ;;  %1056 = vmatpush.bf16.msrb.mxu0 %v3718_v9 }
  0xbd   :  { %4653 = vst [vmem:[#allocation12_spill] sm:$0xff] %v3851_v36  ;;  %v3854_v38 = vpop.f32.mrf.mxu3  ;;  %v3858_v43 = vpop.f32.mrf.mxu1  ;;  %1069 = vmatpush.bf16.msrb.mxu1 %v3720_v13 }
  0xbe   :  { %4654 = vst [vmem:[#allocation13_spill] sm:$0xff] %v3856_v39  ;;  %1082 = vmatpush.bf16.msrb.mxu2 %v3725_v17 }
  0xbf   :  { %4655 = vst [vmem:[#allocation14_spill] sm:$0xff] %v3858_v43  ;;  %1095 = vmatpush.bf16.msrb.mxu3 %v3722_v14 }
  0xc0   :  { %1057 = vmatpush.bf16.msrb.mxu0 %v3733_v22 }
  0xc1   :  { %1070 = vmatpush.bf16.msrb.mxu1 %v3735_v26 }
  0xc2   :  { %1083 = vmatpush.bf16.msrb.mxu2 %v3740_v30 }
  0xc3   :  { %1096 = vmatpush.bf16.msrb.mxu3 %v3737_v27 }
  0xc4   :  { %v3867_v44 = vpop.f32.mrf.mxu2  ;;  %v3872_v50 = vpop.f32.mrf.mxu0  ;;  %1058 = vmatpush.bf16.msrb.mxu0 %v3748_v35 }
  0xc5   :  { %4656 = vst [vmem:[#allocation15_spill] sm:$0xff] %v3867_v44  ;;  %v3870_v46 = vpop.f32.mrf.mxu3  ;;  %v3874_v51 = vpop.f32.mrf.mxu1  ;;  %1071 = vmatpush.bf16.msrb.mxu1 %v3750_v40 }
  0xc6   :  { %4657 = vst [vmem:[#allocation16_spill] sm:$0xff] %v3870_v46  ;;  %1084 = vmatpush.bf16.msrb.mxu2 %v3755_v45 }
  0xc7   :  { %4658 = vst [vmem:[#allocation17_spill] sm:$0xff] %v3872_v50  ;;  %1097 = vmatpush.bf16.msrb.mxu3 %v3752_v42 }
  0xc8   :  { %4659 = vst [vmem:[#allocation18_spill] sm:$0xff] %v3874_v51  ;;  %1059 = vmatpush.bf16.msrb.mxu0 %v3763_v54 }
  0xc9   :  { %1072 = vmatpush.bf16.msrb.mxu1 %v3765_v61 }
  0xca   :  { %1085 = vmatpush.bf16.msrb.mxu2 %v3770_v2 }
  0xcb   :  { %1098 = vmatpush.bf16.msrb.mxu3 %v3767_v62 }
  0xcc   :  { %v3883_v53 = vpop.f32.mrf.mxu2  ;;  %v3888_v57 = vpop.f32.mrf.mxu0  ;;  %1060 = vmatpush.bf16.msrb.mxu0 %v3778_v10 }
  0xcd   :  { %4660 = vst [vmem:[#allocation19_spill] sm:$0xff] %v3883_v53  ;;  %v3886_v56 = vpop.f32.mrf.mxu3  ;;  %v3890_v58 = vpop.f32.mrf.mxu1  ;;  %1073 = vmatpush.bf16.msrb.mxu1 %v3780_v16 }
  0xce   :  { %4661 = vst [vmem:[#allocation20_spill] sm:$0xff] %v3886_v56  ;;  %1086 = vmatpush.bf16.msrb.mxu2 %v3796_v23 }
  0xcf   :  { %4662 = vst [vmem:[#allocation21_spill] sm:$0xff] %v3888_v57  ;;  %1099 = vmatpush.bf16.msrb.mxu3 %v3782_v18 }
  0xd0   :  { %4663 = vst [vmem:[#allocation22_spill] sm:$0xff] %v3890_v58 }
  0xd4   :  { %v3896_v0 = vpop.f32.mrf.mxu2  ;;  %v3900_v5 = vpop.f32.mrf.mxu0 }
  0xd5   :  { %4664 = vst [vmem:[#allocation23_spill] sm:$0xff] %v3896_v0  ;;  %v3898_v1 = vpop.f32.mrf.mxu3  ;;  %v3902_v6 = vpop.f32.mrf.mxu1 }
  0xd6   :  { %4665 = vst [vmem:[#allocation24_spill] sm:$0xff] %v3898_v1 }
  0xd7   :  { %4666 = vst [vmem:[#allocation25_spill] sm:$0xff] %v3900_v5 }
  0xd8   :  { %4667 = vst [vmem:[#allocation26_spill] sm:$0xff] %v3902_v6 }
  0xdc   :  { %v3904_v7 = vpop.f32.mrf.mxu2  ;;  %v3908_v11 = vpop.f32.mrf.mxu0 }
  0xdd   :  { %4668 = vst [vmem:[#allocation27_spill] sm:$0xff] %v3904_v7  ;;  %v3906_v8 = vpop.f32.mrf.mxu3  ;;  %v3910_v12 = vpop.f32.mrf.mxu1 }
  0xde   :  { %4669 = vst [vmem:[#allocation28_spill] sm:$0xff] %v3906_v8 }
  0xdf   :  { %4670 = vst [vmem:[#allocation29_spill] sm:$0xff] %v3908_v11 }
  0xe0   :  { %4671 = vst [vmem:[#allocation30_spill] sm:$0xff] %v3910_v12 }
  0xe4   :  { %v3912_v15 = vpop.f32.mrf.mxu2  ;;  %v3916_v20 = vpop.f32.mrf.mxu0 }
  0xe5   :  { %4672 = vst [vmem:[#allocation31_spill] sm:$0xff] %v3912_v15  ;;  %v3914_v19 = vpop.f32.mrf.mxu3  ;;  %v3918_v21 = vpop.f32.mrf.mxu1 }
  0xe6   :  { %4673 = vst [vmem:[#allocation32_spill] sm:$0xff] %v3914_v19 }
  0xe7   :  { %4674 = vst [vmem:[#allocation33_spill] sm:$0xff] %v3916_v20 }
  0xe8   :  { %4675 = vst [vmem:[#allocation34_spill] sm:$0xff] %v3918_v21 }
  0xec   :  { %v3920_v24 = vpop.f32.mrf.mxu2  ;;  %v3924_v6 = vpop.f32.mrf.mxu0 }
  0xed   :  { %4676 = vst [vmem:[#allocation35_spill] sm:$0xff] %v3920_v24  ;;  %v3922_v29 = vpop.f32.mrf.mxu3  ;;  %v3926_v7 = vpop.f32.mrf.mxu1 }
  0xee   :  { %4677 = vst [vmem:[#allocation36_spill] sm:$0xff] %v3922_v29 }
  0xef   :  { %4678 = vst [vmem:[#allocation37_spill] sm:$0xff] %v3924_v6 }
  0xf0   :  { %4679 = vst [vmem:[#allocation38_spill] sm:$0xff] %v3926_v7 }
  0xf4   :  { %v3928_v8 = vpop.f32.mrf.mxu2  ;;  %v3932_v12 = vpop.f32.mrf.mxu0 }
  0xf5   :  { %4680 = vst [vmem:[#allocation39_spill] sm:$0xff] %v3928_v8  ;;  %v3930_v11 = vpop.f32.mrf.mxu3  ;;  %v3934_v15 = vpop.f32.mrf.mxu1 }
  0xf6   :  { %4681 = vst [vmem:[#allocation40_spill] sm:$0xff] %v3930_v11 }
  0xf7   :  { %4682 = vst [vmem:[#allocation41_spill] sm:$0xff] %v3932_v12 }
  0xf8   :  { %4683 = vst [vmem:[#allocation42_spill] sm:$0xff] %v3934_v15 }
  0xfc   :  { %v3936_v19 = vpop.f32.mrf.mxu2  ;;  %v3940_v21 = vpop.f32.mrf.mxu0 }
  0xfd   :  { %4684 = vst [vmem:[#allocation43_spill] sm:$0xff] %v3936_v19  ;;  %v3938_v20 = vpop.f32.mrf.mxu3  ;;  %v3942_v24 = vpop.f32.mrf.mxu1 }
  0xfe   :  { %4685 = vst [vmem:[#allocation44_spill] sm:$0xff] %v3938_v20 }
  0xff   :  { %4686 = vst [vmem:[#allocation45_spill] sm:$0xff] %v3940_v21 }
 0x100   :  { %4687 = vst [vmem:[#allocation46_spill] sm:$0xff] %v3942_v24 }
 0x104   :  { %v3944_v29 = vpop.f32.mrf.mxu2  ;;  %v3948_v7 = vpop.f32.mrf.mxu0 }
 0x105   :  { %4688 = vst [vmem:[#allocation47_spill] sm:$0xff] %v3944_v29  ;;  %v3946_v6 = vpop.f32.mrf.mxu3  ;;  %v3950_v8 = vpop.f32.mrf.mxu1 }
 0x106   :  { %4689 = vst [vmem:[#allocation48_spill] sm:$0xff] %v3946_v6 }
 0x107   :  { %4690 = vst [vmem:[#allocation49_spill] sm:$0xff] %v3948_v7 }
 0x108   :  { %4691 = vst [vmem:[#allocation50_spill] sm:$0xff] %v3950_v8 }
 0x10c   :  { %v3952_v11 = vpop.f32.mrf.mxu2  ;;  %v3956_v15 = vpop.f32.mrf.mxu0 }
 0x10d   :  { %4692 = vst [vmem:[#allocation51_spill] sm:$0xff] %v3952_v11  ;;  %v3954_v12 = vpop.f32.mrf.mxu3  ;;  %v3958_v19 = vpop.f32.mrf.mxu1 }
 0x10e   :  { %4693 = vst [vmem:[#allocation52_spill] sm:$0xff] %v3954_v12 }
 0x10f   :  { %4694 = vst [vmem:[#allocation53_spill] sm:$0xff] %v3956_v15  ;;  %v116_v15 = vld [vmem:[#allocation9] sm:$0xf] }
 0x110   :  { %4695 = vst [vmem:[#allocation54_spill] sm:$0xff] %v3958_v19  ;;  %v3996_v0 = vperm.slane %v116_v15, 3 }
 0x114   :  { %v3960_v20 = vpop.f32.mrf.mxu2  ;;  %v3964_v24 = vpop.f32.mrf.mxu0 }
 0x115   :  { %4696 = vst [vmem:[#allocation55_spill] sm:$0xff] %v3960_v20  ;;  %v3962_v21 = vpop.f32.mrf.mxu3  ;;  %v3966_v29 = vpop.f32.mrf.mxu1 }
 0x116   :  { %4697 = vst [vmem:[#allocation56_spill] sm:$0xff] %v3962_v21 }
 0x117   :  { %4698 = vst [vmem:[#allocation57_spill] sm:$0xff] %v3964_v24  ;;  %v3984_v24 = vperm.slane %v116_v15, 0 }
 0x118   :  { %4699 = vst [vmem:[#allocation58_spill] sm:$0xff] %v3966_v29  ;;  %v3986_v29 = vperm.slane %v116_v15, 1 }
 0x11c   :  { %v3968_v6 = vpop.f32.mrf.mxu2  ;;  %v3972_v8 = vpop.f32.mrf.mxu0 }
 0x11d   :  { %4700 = vst [vmem:[#allocation59_spill] sm:$0xff] %v3968_v6  ;;  %v3970_v7 = vpop.f32.mrf.mxu3  ;;  %v3974_v11 = vpop.f32.mrf.mxu1  ;;  %v344_v6 = vadd.f32 %v3828_v25, %v3984_v24  ;;  %v491_v25 = vadd.f32 %v3838_v32, %v3996_v0 }
 0x11e   :  { %4701 = vst [vmem:[#allocation60_spill] sm:$0xff] %v3970_v7 }
 0x11f   :  { %4702 = vst [vmem:[#allocation61_spill] sm:$0xff] %v3972_v8 }
 0x120   :  { %4703 = vst [vmem:[#allocation62_spill] sm:$0xff] %v3974_v11  ;;  %v393_v11 = vadd.f32 %v3830_v28, %v3986_v29 }
 0x124   :  { %v3976_v12 = vpop.f32.mrf.mxu2  ;;  %v3980_v20 = vpop.f32.mrf.mxu0 }
 0x125   :  { %4704 = vst [vmem:[#allocation63_spill] sm:$0xff] %v3976_v12  ;;  %v3978_v19 = vpop.f32.mrf.mxu3  ;;  %v3982_v21 = vpop.f32.mrf.mxu1 }
 0x126   :  { %4705 = vst [vmem:[#allocation64_spill] sm:$0xff] %v3978_v19 }
 0x127   :  { %4706 = vst [vmem:[#allocation65_spill] sm:$0xff] %v3980_v20 }
 0x128   :  { %4707 = vst [vmem:[#allocation66_spill] sm:$0xff] %v3982_v21 }
 0x12c   :  { %v3990_v7 = vpop.f32.mrf.mxu2  ;;  %v805_v8 = vpop.f32.mrf.mxu0 }
 0x12d   :  { %4708 = vst [vmem:[#allocation67_spill] sm:$0xff] %v3990_v7  ;;  %v3994_v12 = vpop.f32.mrf.mxu3  ;;  %v848_v19 = vadd.f32 %v805_v8, %v344_v6  ;;  %v818_v5 = vpop.f32.mrf.mxu1 }
 0x12e   :  { %4709 = vst [vmem:[#allocation68_spill] sm:$0xff] %v3994_v12  ;;  %v849_v20 = vadd.f32 %v818_v5, %v393_v11  ;;  %v4000_v5 = vperm.slane %v116_v15, 2 }
 0x12f   :  { %v3163_v21 = vmul.f32 -1.442695, %v848_v19 }
 0x130   :  { %v3164_v1 = vmul.f32 -1.442695, %v849_v20  ;;  %v442_v32 = vadd.f32 %v3835_v31, %v4000_v5 }
 0x131   :  { %3304 = vpow2.f32 %v3163_v21 }
 0x132   :  { %3306 = vpow2.f32 %v3164_v1 }
 0x134   :  { %v831_v58 = vpop.f32.mrf.mxu2  ;;  %v807_v57 = vpop.f32.mrf.mxu0 }
 0x135   :  { %v844_v7 = vpop.f32.mrf.mxu3  ;;  %v820_v28 = vpop.f32.mrf.mxu1  ;;  %v850_v57 = vadd.f32 %v831_v58, %v442_v32 }
 0x136   :  { %v851_v53 = vadd.f32 %v844_v7, %v491_v25 }
 0x137   :  { %v3305_v56 = vpop.eup %3304 }
 0x138   :  { %v3165_v12 = vmul.f32 -1.442695, %v851_v53  ;;  %v3307_v51 = vpop.eup %3306  ;;  %v855_v6 = vadd.f32 1.0, %v3305_v56 }
 0x139   :  { %v874_v8 = vadd.f32 1.0, %v3307_v51 }
 0x13a   :  { %3308 = vpow2.f32 %v3165_v12  ;;  %v867_v12 = vand.u32 2147483648, %v855_v6  ;;  %vm861_vm2 = vweird.f32 %v855_v6 }
 0x13b   :  { %3310 = vrcp.f32 %v855_v6  ;;  %v886_v15 = vand.u32 2147483648, %v874_v8  ;;  %v884_v50 = vand.u32 2147483647, %v874_v8  ;;  %vm880_vm3 = vweird.f32 %v874_v8 }
 0x13c   :  { %3312 = vrcp.f32 %v874_v8  ;;  %v833_v11 = vpop.f32.mrf.mxu2  ;;  %v868_v58 = vor.u32 1.1754944e-38, %v867_v12 }
 0x13d   :  { %v846_v1 = vpop.f32.mrf.mxu3  ;;  %v865_v11 = vand.u32 2147483647, %v855_v6  ;;  %vm885_vm7 = vcmp.eq.f32.partialorder %v884_v50, 8.507059e+37 }
 0x13f   :  { %vm866_vm5 = vcmp.eq.f32.partialorder %v865_v11, 8.507059e+37 }
 0x140   :  { %v3309_v19 = vpop.eup %3308 }
 0x141   :  { %v3311_v20 = vpop.eup %3310  ;;  %v894_v7 = vadd.f32 1.0, %v3309_v19  ;;  %v887_v19 = vor.u32 1.1754944e-38, %v886_v15 }
 0x142   :  { %v3313_v21 = vpop.eup %3312  ;;  %v857_v25 = vmul.f32 %v3311_v20, %v855_v6  ;;  %vm862_vm0 = vweird.f32 %v3311_v20 }
 0x143   :  { %v876_v53 = vmul.f32 %v3313_v21, %v874_v8  ;;  %3314 = vrcp.f32 %v894_v7  ;;  %vm881_vm1 = vweird.f32 %v3313_v21  ;;  %vm863_vm4 = vmor %vm861_vm2, %vm862_vm0  ;;  %v906_v12 = vand.u32 2147483648, %v894_v7 }
 0x144   :  { %v858_v56 = vsub.f32 1.0, %v857_v25  ;;  %3316 = vtanh.f32 %v850_v57  ;;  %vm882_vm6 = vmor %vm880_vm3, %vm881_vm1  ;;  %vm900_vm9 = vweird.f32 %v894_v7 }
 0x145   :  { %v877_v51 = vsub.f32 1.0, %v876_v53  ;;  %v907_v11 = vor.u32 1.1754944e-38, %v906_v12 }
 0x146   :  { %v859_v28 = vmul.f32 %v3311_v20, %v858_v56 }
 0x147   :  { %v878_v1 = vmul.f32 %v3313_v21, %v877_v51 }
 0x148   :  { %v860_v31 = vadd.f32 %v3311_v20, %v859_v28 }
 0x149   :  { %v3315_v44 = vpop.eup %3314  ;;  %v879_v32 = vadd.f32 %v3313_v21, %v878_v1 }
 0x14a   :  { %v864_v46 = vsel %vm863_vm4, %v3311_v20, %v860_v31  ;;  %v896_v25 = vmul.f32 %v3315_v44, %v894_v7  ;;  %v3317_v57 = vpop.eup %3316  ;;  %vm901_vm8 = vweird.f32 %v3315_v44  ;;  %v904_v20 = vand.u32 2147483647, %v894_v7 }
 0x14b   :  { %v869_v53 = vsel %vm866_vm5, %v868_v58, %v864_v46  ;;  %v883_v56 = vsel %vm882_vm6, %v3313_v21, %v879_v32  ;;  %vm902_vm10 = vmor %vm900_vm9, %vm901_vm8 }
 0x14c   :  { %v888_v43 = vsel %vm885_vm7, %v887_v19, %v883_v56  ;;  %v911_v51 = vmul.f32 %v3317_v57, %v869_v53  ;;  %v897_v39 = vsub.f32 1.0, %v896_v25  ;;  %vm905_vm11 = vcmp.eq.f32.partialorder %v904_v20, 8.507059e+37 }
 0x14d   :  { %v910_v36 = vmul.f32 0.0, %v888_v43  ;;  %v493_v19 = vadd.f32 %v3854_v38, %v3996_v0 }
 0x14e   :  { %v898_v28 = vmul.f32 %v3315_v44, %v897_v39  ;;  %v395_v39 = vadd.f32 %v3842_v34, %v3986_v29 }
 0x14f   :  { %v4004_v6 = vadd.f32 %v911_v51, %v910_v36  ;;  %v346_v36 = vadd.f32 %v3840_v33, %v3984_v24 }
 0x150   :  { %v899_v8 = vadd.f32 %v3315_v44, %v898_v28 }
 0x151   :  { %3318 = vtanh.f32 %v4004_v6 }
 0x152   :  { %v903_v15 = vsel %vm902_vm10, %v3315_v44, %v899_v8 }
 0x153   :  { %v908_v50 = vsel %vm905_vm11, %v907_v11, %v903_v15 }
 0x157   :  { %v3319_v46 = vpop.eup %3318 }
 0x158   :  { %v914_v21 = vmul.f32 %v3319_v46, %v908_v50  ;;  %v4710_v46 = vld [vmem:[#allocation12_spill] sm:$0xff] }
 0x159   :  { %v444_v38 = vadd.f32 %v4710_v46, %v4000_v5 }
 0x15a   :  { %v915_v1 = vpack.c.bf16 %v914_v21, %v914_v21 }
 0x15c   :  { %916 = vst [vmem:[%s4652_s4] sm:$0xf] %v915_v1  ;;  %932 = vmatmul.bf16.vlgmr.msra.gmra.mxu0 %v915_v1  ;;  %945 = vmatmul.bf16.vlgmr.msra.gmra.mxu1 %v915_v1 }
 0x15d   :  { %958 = vmatmul.bf16.vlgmr.msra.gmra.mxu2 %v915_v1  ;;  %971 = vmatmul.bf16.vlgmr.msra.gmra.mxu3 %v915_v1 }
 0x15e   :  { %1182 = vmatpush.bf16.msra.mxu0 %v3679_v37  ;;  %1195 = vmatpush.bf16.msra.mxu1 %v3681_v41 }
 0x15f   :  { %1208 = vmatpush.bf16.msra.mxu2 %v3683_v47  ;;  %1221 = vmatpush.bf16.msra.mxu3 %v3686_v48 }
 0x162   :  { %1183 = vmatpush.bf16.msra.mxu0 %v3688_v49  ;;  %1196 = vmatpush.bf16.msra.mxu1 %v3691_v52 }
 0x163   :  { %1209 = vmatpush.bf16.msra.mxu2 %v3694_v55  ;;  %1222 = vmatpush.bf16.msra.mxu3 %v3698_v59 }
 0x166   :  { %1184 = vmatpush.bf16.msra.mxu0 %v3700_v60  ;;  %1197 = vmatpush.bf16.msra.mxu1 %v3703_v63 }
 0x167   :  { %1210 = vmatpush.bf16.msra.mxu2 %v3706_v3  ;;  %1223 = vmatpush.bf16.msra.mxu3 %v3710_v4 }
 0x16a   :  { %1185 = vmatpush.bf16.msra.mxu0 %v3718_v9  ;;  %1198 = vmatpush.bf16.msra.mxu1 %v3720_v13 }
 0x16b   :  { %1211 = vmatpush.bf16.msra.mxu2 %v3725_v17  ;;  %1224 = vmatpush.bf16.msra.mxu3 %v3722_v14 }
 0x16e   :  { %1186 = vmatpush.bf16.msra.mxu0 %v3733_v22  ;;  %1199 = vmatpush.bf16.msra.mxu1 %v3735_v26 }
 0x16f   :  { %1212 = vmatpush.bf16.msra.mxu2 %v3740_v30  ;;  %1225 = vmatpush.bf16.msra.mxu3 %v3737_v27 }
 0x172   :  { %1187 = vmatpush.bf16.msra.mxu0 %v3748_v35  ;;  %1200 = vmatpush.bf16.msra.mxu1 %v3750_v40 }
 0x173   :  { %1213 = vmatpush.bf16.msra.mxu2 %v3755_v45  ;;  %1226 = vmatpush.bf16.msra.mxu3 %v3752_v42 }
 0x176   :  { %1188 = vmatpush.bf16.msra.mxu0 %v3763_v54  ;;  %1201 = vmatpush.bf16.msra.mxu1 %v3765_v61 }
 0x177   :  { %1214 = vmatpush.bf16.msra.mxu2 %v3770_v2  ;;  %1227 = vmatpush.bf16.msra.mxu3 %v3767_v62 }
 0x17a   :  { %1189 = vmatpush.bf16.msra.mxu0 %v3778_v10  ;;  %1202 = vmatpush.bf16.msra.mxu1 %v3780_v16 }
 0x17b   :  { %1215 = vmatpush.bf16.msra.mxu2 %v3796_v23  ;;  %1228 = vmatpush.bf16.msra.mxu3 %v3782_v18 }
 0x1d9   :  { %v933_v43 = vpop.f32.mrf.mxu0  ;;  %v946_v44 = vpop.f32.mrf.mxu1 }
 0x1da   :  { %v976_v7 = vadd.f32 %v933_v43, %v346_v36  ;;  %v977_v31 = vadd.f32 %v946_v44, %v395_v39 }
 0x1dc   :  { %v3166_v58 = vmul.f32 -1.442695, %v976_v7  ;;  %v3167_v32 = vmul.f32 -1.442695, %v977_v31 }
 0x1de   :  { %3320 = vpow2.f32 %v3166_v58 }
 0x1df   :  { %3322 = vpow2.f32 %v3167_v32 }
 0x1e0   :  { %v959_v25 = vpop.f32.mrf.mxu2  ;;  %v972_v57 = vpop.f32.mrf.mxu3 }
 0x1e1   :  { %v979_v53 = vadd.f32 %v972_v57, %v493_v19  ;;  %v935_v56 = vpop.f32.mrf.mxu0  ;;  %v948_v51 = vpop.f32.mrf.mxu1  ;;  %v978_v1 = vadd.f32 %v959_v25, %v444_v38 }
 0x1e3   :  { %v3168_v33 = vmul.f32 -1.442695, %v979_v53 }
 0x1e4   :  { %v3321_v28 = vpop.eup %3320 }
 0x1e5   :  { %v3323_v8 = vpop.eup %3322  ;;  %v983_v34 = vadd.f32 1.0, %v3321_v28  ;;  %3324 = vpow2.f32 %v3168_v33 }
 0x1e6   :  { %v1002_v12 = vadd.f32 1.0, %v3323_v8 }
 0x1e7   :  { %3326 = vrcp.f32 %v983_v34  ;;  %v995_v31 = vand.u32 2147483648, %v983_v34  ;;  %v993_v19 = vand.u32 2147483647, %v983_v34  ;;  %vm989_vm14 = vweird.f32 %v983_v34 }
 0x1e8   :  { %3328 = vrcp.f32 %v1002_v12  ;;  %v961_v20 = vpop.f32.mrf.mxu2  ;;  %v974_v15 = vpop.f32.mrf.mxu3  ;;  %v1014_v58 = vand.u32 2147483648, %v1002_v12  ;;  %v1012_v53 = vand.u32 2147483647, %v1002_v12  ;;  %vm1008_vm15 = vweird.f32 %v1002_v12 }
 0x1e9   :  { %v996_v25 = vor.u32 1.1754944e-38, %v995_v31  ;;  %vm994_vm2 = vcmp.eq.f32.partialorder %v993_v19, 8.507059e+37 }
 0x1ea   :  { %v1015_v8 = vor.u32 1.1754944e-38, %v1014_v58  ;;  %vm1013_vm3 = vcmp.eq.f32.partialorder %v1012_v53, 8.507059e+37  ;;  %v4712_v53 = vld [vmem:[#allocation14_spill] sm:$0xff] }
 0x1eb   :  { %v3325_v11 = vpop.eup %3324 }
 0x1ec   :  { %v1022_v50 = vadd.f32 1.0, %v3325_v11 }
 0x1ed   :  { %v3327_v21 = vpop.eup %3326 }
 0x1ee   :  { %v3329_v36 = vpop.eup %3328  ;;  %v985_v39 = vmul.f32 %v3327_v21, %v983_v34  ;;  %3330 = vrcp.f32 %v1022_v50  ;;  %vm990_vm12 = vweird.f32 %v3327_v21  ;;  %vm1028_vm5 = vweird.f32 %v1022_v50 }
 0x1ef   :  { %v1004_v43 = vmul.f32 %v3329_v36, %v1002_v12  ;;  %3332 = vtanh.f32 %v978_v1  ;;  %vm1009_vm13 = vweird.f32 %v3329_v36  ;;  %vm991_vm0 = vmor %vm989_vm14, %vm990_vm12 }
 0x1f0   :  { %v986_v44 = vsub.f32 1.0, %v985_v39  ;;  %vm1010_vm1 = vmor %vm1008_vm15, %vm1009_vm13 }
 0x1f1   :  { %v1005_v7 = vsub.f32 1.0, %v1004_v43 }
 0x1f2   :  { %v987_v32 = vmul.f32 %v3327_v21, %v986_v44 }
 0x1f3   :  { %v1006_v57 = vmul.f32 %v3329_v36, %v1005_v7  ;;  %v1034_v7 = vand.u32 2147483648, %v1022_v50 }
 0x1f4   :  { %v3331_v56 = vpop.eup %3330  ;;  %v988_v51 = vadd.f32 %v3327_v21, %v987_v32 }
 0x1f5   :  { %v1007_v33 = vadd.f32 %v3329_v36, %v1006_v57  ;;  %v1024_v28 = vmul.f32 %v3331_v56, %v1022_v50  ;;  %v3333_v15 = vpop.eup %3332  ;;  %vm1029_vm4 = vweird.f32 %v3331_v56  ;;  %v1035_v58 = vor.u32 1.1754944e-38, %v1034_v7 }
 0x1f6   :  { %v992_v20 = vsel %vm991_vm0, %v3327_v21, %v988_v51  ;;  %v1032_v21 = vand.u32 2147483647, %v1022_v50  ;;  %vm1030_vm6 = vmor %vm1028_vm5, %vm1029_vm4 }
 0x1f7   :  { %v997_v11 = vsel %vm994_vm2, %v996_v25, %v992_v20  ;;  %v1011_v46 = vsel %vm1010_vm1, %v3329_v36, %v1007_v33  ;;  %v1025_v38 = vsub.f32 1.0, %v1024_v28 }
 0x1f8   :  { %v1016_v1 = vsel %vm1013_vm3, %v1015_v8, %v1011_v46  ;;  %v1039_v39 = vmul.f32 %v3333_v15, %v997_v11  ;;  %vm1033_vm7 = vcmp.eq.f32.partialorder %v1032_v21, 8.507059e+37  ;;  %v4713_v15 = vld [vmem:[#allocation16_spill] sm:$0xff] }
 0x1f9   :  { %v1038_v43 = vmul.f32 %v1016_v1, %v4004_v6  ;;  %v1026_v44 = vmul.f32 %v3331_v56, %v1025_v38  ;;  %v4711_v6 = vld [vmem:[#allocation13_spill] sm:$0xff]  ;;  %v496_v11 = vadd.f32 %v4713_v15, %v3996_v0 }
 0x1fa   :  { %v349_v50 = vadd.f32 %v4711_v6, %v3984_v24 }
 0x1fb   :  { %v4051_v34 = vadd.f32 %v1039_v39, %v1038_v43  ;;  %v1027_v12 = vadd.f32 %v3331_v56, %v1026_v44 }
 0x1fd   :  { %3334 = vtanh.f32 %v4051_v34  ;;  %v1031_v31 = vsel %vm1030_vm6, %v3331_v56, %v1027_v12  ;;  %v398_v56 = vadd.f32 %v4712_v53, %v3986_v29 }
 0x1fe   :  { %v1036_v32 = vsel %vm1033_vm7, %v1035_v58, %v1031_v31 }
 0x203   :  { %v3335_v36 = vpop.eup %3334 }
 0x204   :  { %v1042_v19 = vmul.f32 %v3335_v36, %v1036_v32 }
 0x206   :  { %v1043_v57 = vpack.c.bf16 %v1042_v19, %v1042_v19  ;;  %v4714_v19 = vld [vmem:[#allocation15_spill] sm:$0xff] }
 0x208   :  { %3169 = vst [vmem:[%s4652_s4 + $0x4] sm:$0xf] %v1043_v57  ;;  %1061 = vmatmul.bf16.vlgmr.msrb.gmra.mxu0 %v1043_v57  ;;  %1074 = vmatmul.bf16.vlgmr.msrb.gmra.mxu1 %v1043_v57 }
 0x209   :  { %1087 = vmatmul.bf16.vlgmr.msrb.gmra.mxu2 %v1043_v57  ;;  %1100 = vmatmul.bf16.vlgmr.msrb.gmra.mxu3 %v1043_v57  ;;  %v447_v57 = vadd.f32 %v4714_v19, %v4000_v5 }
 0x20a   :  { %1311 = vmatpush.bf16.msrb.mxu0 %v3679_v37  ;;  %1324 = vmatpush.bf16.msrb.mxu1 %v3681_v41 }
 0x20b   :  { %1337 = vmatpush.bf16.msrb.mxu2 %v3683_v47  ;;  %1350 = vmatpush.bf16.msrb.mxu3 %v3686_v48 }
 0x20e   :  { %1312 = vmatpush.bf16.msrb.mxu0 %v3688_v49  ;;  %1325 = vmatpush.bf16.msrb.mxu1 %v3691_v52 }
 0x20f   :  { %1338 = vmatpush.bf16.msrb.mxu2 %v3694_v55  ;;  %1351 = vmatpush.bf16.msrb.mxu3 %v3698_v59 }
 0x212   :  { %1313 = vmatpush.bf16.msrb.mxu0 %v3700_v60  ;;  %1326 = vmatpush.bf16.msrb.mxu1 %v3703_v63 }
 0x213   :  { %1339 = vmatpush.bf16.msrb.mxu2 %v3706_v3  ;;  %1352 = vmatpush.bf16.msrb.mxu3 %v3710_v4 }
 0x216   :  { %1314 = vmatpush.bf16.msrb.mxu0 %v3718_v9  ;;  %1327 = vmatpush.bf16.msrb.mxu1 %v3720_v13 }
 0x217   :  { %1340 = vmatpush.bf16.msrb.mxu2 %v3725_v17  ;;  %1353 = vmatpush.bf16.msrb.mxu3 %v3722_v14 }
 0x21a   :  { %1315 = vmatpush.bf16.msrb.mxu0 %v3733_v22  ;;  %1328 = vmatpush.bf16.msrb.mxu1 %v3735_v26 }
 0x21b   :  { %1341 = vmatpush.bf16.msrb.mxu2 %v3740_v30  ;;  %1354 = vmatpush.bf16.msrb.mxu3 %v3737_v27 }
 0x21e   :  { %1316 = vmatpush.bf16.msrb.mxu0 %v3748_v35  ;;  %1329 = vmatpush.bf16.msrb.mxu1 %v3750_v40 }
 0x21f   :  { %1342 = vmatpush.bf16.msrb.mxu2 %v3755_v45  ;;  %1355 = vmatpush.bf16.msrb.mxu3 %v3752_v42 }
 0x222   :  { %1317 = vmatpush.bf16.msrb.mxu0 %v3763_v54  ;;  %1330 = vmatpush.bf16.msrb.mxu1 %v3765_v61 }
 0x223   :  { %1343 = vmatpush.bf16.msrb.mxu2 %v3770_v2  ;;  %1356 = vmatpush.bf16.msrb.mxu3 %v3767_v62 }
 0x226   :  { %1318 = vmatpush.bf16.msrb.mxu0 %v3778_v10  ;;  %1331 = vmatpush.bf16.msrb.mxu1 %v3780_v16 }
 0x227   :  { %1344 = vmatpush.bf16.msrb.mxu2 %v3796_v23  ;;  %1357 = vmatpush.bf16.msrb.mxu3 %v3782_v18 }
 0x285   :  { %v1062_v51 = vpop.f32.mrf.mxu0  ;;  %v1075_v25 = vpop.f32.mrf.mxu1 }
 0x286   :  { %v1105_v33 = vadd.f32 %v1062_v51, %v349_v50  ;;  %v1106_v28 = vadd.f32 %v1075_v25, %v398_v56 }
 0x288   :  { %v3170_v8 = vmul.f32 -1.442695, %v1105_v33  ;;  %v3171_v20 = vmul.f32 -1.442695, %v1106_v28 }
 0x28a   :  { %3336 = vpow2.f32 %v3170_v8 }
 0x28b   :  { %3338 = vpow2.f32 %v3171_v20 }
 0x28c   :  { %v1088_v46 = vpop.f32.mrf.mxu2  ;;  %v1101_v38 = vpop.f32.mrf.mxu3 }
 0x28d   :  { %v1108_v1 = vadd.f32 %v1101_v38, %v496_v11  ;;  %v1064_v39 = vpop.f32.mrf.mxu0  ;;  %v1077_v43 = vpop.f32.mrf.mxu1  ;;  %v1107_v53 = vadd.f32 %v1088_v46, %v447_v57 }
 0x28f   :  { %v3172_v44 = vmul.f32 -1.442695, %v1108_v1 }
 0x290   :  { %v3337_v12 = vpop.eup %3336 }
 0x291   :  { %v3339_v7 = vpop.eup %3338  ;;  %v1112_v21 = vadd.f32 1.0, %v3337_v12  ;;  %3340 = vpow2.f32 %v3172_v44 }
 0x292   :  { %v1131_v31 = vadd.f32 1.0, %v3339_v7 }
 0x293   :  { %3342 = vrcp.f32 %v1112_v21  ;;  %v1124_v8 = vand.u32 2147483648, %v1112_v21  ;;  %v1122_v11 = vand.u32 2147483647, %v1112_v21  ;;  %vm1118_vm10 = vweird.f32 %v1112_v21 }
 0x294   :  { %3344 = vrcp.f32 %v1131_v31  ;;  %v1090_v58 = vpop.f32.mrf.mxu2  ;;  %v1103_v36 = vpop.f32.mrf.mxu3  ;;  %v1143_v20 = vand.u32 2147483648, %v1131_v31  ;;  %v1141_v1 = vand.u32 2147483647, %v1131_v31  ;;  %vm1137_vm11 = vweird.f32 %v1131_v31 }
 0x295   :  { %v1125_v46 = vor.u32 1.1754944e-38, %v1124_v8  ;;  %vm1123_vm14 = vcmp.eq.f32.partialorder %v1122_v11, 8.507059e+37 }
 0x296   :  { %v1144_v7 = vor.u32 1.1754944e-38, %v1143_v20  ;;  %vm1142_vm15 = vcmp.eq.f32.partialorder %v1141_v1, 8.507059e+37  ;;  %v4716_v1 = vld [vmem:[#allocation18_spill] sm:$0xff] }
 0x297   :  { %v3341_v32 = vpop.eup %3340 }
 0x298   :  { %v1151_v6 = vadd.f32 1.0, %v3341_v32 }
 0x299   :  { %v3343_v50 = vpop.eup %3342 }
 0x29a   :  { %v3345_v56 = vpop.eup %3344  ;;  %v1114_v51 = vmul.f32 %v3343_v50, %v1112_v21  ;;  %3346 = vrcp.f32 %v1151_v6  ;;  %vm1119_vm8 = vweird.f32 %v3343_v50  ;;  %vm1157_vm1 = vweird.f32 %v1151_v6 }
 0x29b   :  { %v1133_v25 = vmul.f32 %v3345_v56, %v1131_v31  ;;  %3348 = vtanh.f32 %v1107_v53  ;;  %vm1138_vm9 = vweird.f32 %v3345_v56  ;;  %vm1120_vm12 = vmor %vm1118_vm10, %vm1119_vm8 }
 0x29c   :  { %v1115_v33 = vsub.f32 1.0, %v1114_v51  ;;  %vm1139_vm13 = vmor %vm1137_vm11, %vm1138_vm9 }
 0x29d   :  { %v1134_v28 = vsub.f32 1.0, %v1133_v25 }
 0x29e   :  { %v1116_v15 = vmul.f32 %v3343_v50, %v1115_v33 }
 0x29f   :  { %v1135_v38 = vmul.f32 %v3345_v56, %v1134_v28  ;;  %v1163_v28 = vand.u32 2147483648, %v1151_v6 }
 0x2a0   :  { %v3347_v39 = vpop.eup %3346  ;;  %v1117_v43 = vadd.f32 %v3343_v50, %v1116_v15 }
 0x2a1   :  { %v1136_v44 = vadd.f32 %v3345_v56, %v1135_v38  ;;  %v1153_v12 = vmul.f32 %v3347_v39, %v1151_v6  ;;  %v3349_v36 = vpop.eup %3348  ;;  %vm1158_vm0 = vweird.f32 %v3347_v39  ;;  %v1164_v20 = vor.u32 1.1754944e-38, %v1163_v28 }
 0x2a2   :  { %v1121_v58 = vsel %vm1120_vm12, %v3343_v50, %v1117_v43  ;;  %v1161_v50 = vand.u32 2147483647, %v1151_v6  ;;  %vm1159_vm2 = vmor %vm1157_vm1, %vm1158_vm0 }
 0x2a3   :  { %v1126_v32 = vsel %vm1123_vm14, %v1125_v46, %v1121_v58  ;;  %v1140_v19 = vsel %vm1139_vm13, %v3345_v56, %v1136_v44  ;;  %v1154_v57 = vsub.f32 1.0, %v1153_v12 }
 0x2a4   :  { %v1145_v53 = vsel %vm1142_vm15, %v1144_v7, %v1140_v19  ;;  %v1168_v51 = vmul.f32 %v3349_v36, %v1126_v32  ;;  %vm1162_vm3 = vcmp.eq.f32.partialorder %v1161_v50, 8.507059e+37  ;;  %v4717_v36 = vld [vmem:[#allocation20_spill] sm:$0xff] }
 0x2a5   :  { %v1167_v25 = vmul.f32 %v1145_v53, %v4051_v34  ;;  %v1155_v33 = vmul.f32 %v3347_v39, %v1154_v57  ;;  %v4715_v34 = vld [vmem:[#allocation17_spill] sm:$0xff]  ;;  %v498_v32 = vadd.f32 %v4717_v36, %v3996_v0 }
 0x2a6   :  { %v351_v6 = vadd.f32 %v4715_v34, %v3984_v24 }
 0x2a7   :  { %v4098_v21 = vadd.f32 %v1168_v51, %v1167_v25  ;;  %v1156_v31 = vadd.f32 %v3347_v39, %v1155_v33 }
 0x2a9   :  { %3350 = vtanh.f32 %v4098_v21  ;;  %v1160_v8 = vsel %vm1159_vm2, %v3347_v39, %v1156_v31  ;;  %v400_v39 = vadd.f32 %v4716_v1, %v3986_v29 }
 0x2aa   :  { %v1165_v15 = vsel %vm1162_vm3, %v1164_v20, %v1160_v8 }
 0x2af   :  { %v3351_v56 = vpop.eup %3350 }
 0x2b0   :  { %v1171_v11 = vmul.f32 %v3351_v56, %v1165_v15 }
 0x2b2   :  { %v1172_v38 = vpack.c.bf16 %v1171_v11, %v1171_v11  ;;  %v4718_v11 = vld [vmem:[#allocation19_spill] sm:$0xff] }
 0x2b4   :  { %3173 = vst [vmem:[%s4652_s4 + $0x8] sm:$0xf] %v1172_v38  ;;  %1190 = vmatmul.bf16.vlgmr.msra.gmra.mxu0 %v1172_v38  ;;  %1203 = vmatmul.bf16.vlgmr.msra.gmra.mxu1 %v1172_v38 }
 0x2b5   :  { %1216 = vmatmul.bf16.vlgmr.msra.gmra.mxu2 %v1172_v38  ;;  %1229 = vmatmul.bf16.vlgmr.msra.gmra.mxu3 %v1172_v38  ;;  %v449_v38 = vadd.f32 %v4718_v11, %v4000_v5 }
 0x2b6   :  { %1440 = vmatpush.bf16.msra.mxu0 %v3679_v37  ;;  %1453 = vmatpush.bf16.msra.mxu1 %v3681_v41 }
 0x2b7   :  { %1466 = vmatpush.bf16.msra.mxu2 %v3683_v47  ;;  %1479 = vmatpush.bf16.msra.mxu3 %v3686_v48 }
 0x2ba   :  { %1441 = vmatpush.bf16.msra.mxu0 %v3688_v49  ;;  %1454 = vmatpush.bf16.msra.mxu1 %v3691_v52 }
 0x2bb   :  { %1467 = vmatpush.bf16.msra.mxu2 %v3694_v55  ;;  %1480 = vmatpush.bf16.msra.mxu3 %v3698_v59 }
 0x2be   :  { %1442 = vmatpush.bf16.msra.mxu0 %v3700_v60  ;;  %1455 = vmatpush.bf16.msra.mxu1 %v3703_v63 }
 0x2bf   :  { %1468 = vmatpush.bf16.msra.mxu2 %v3706_v3  ;;  %1481 = vmatpush.bf16.msra.mxu3 %v3710_v4 }
 0x2c2   :  { %1443 = vmatpush.bf16.msra.mxu0 %v3718_v9  ;;  %1456 = vmatpush.bf16.msra.mxu1 %v3720_v13 }
 0x2c3   :  { %1469 = vmatpush.bf16.msra.mxu2 %v3725_v17  ;;  %1482 = vmatpush.bf16.msra.mxu3 %v3722_v14 }
 0x2c6   :  { %1444 = vmatpush.bf16.msra.mxu0 %v3733_v22  ;;  %1457 = vmatpush.bf16.msra.mxu1 %v3735_v26 }
 0x2c7   :  { %1470 = vmatpush.bf16.msra.mxu2 %v3740_v30  ;;  %1483 = vmatpush.bf16.msra.mxu3 %v3737_v27 }
 0x2ca   :  { %1445 = vmatpush.bf16.msra.mxu0 %v3748_v35  ;;  %1458 = vmatpush.bf16.msra.mxu1 %v3750_v40 }
 0x2cb   :  { %1471 = vmatpush.bf16.msra.mxu2 %v3755_v45  ;;  %1484 = vmatpush.bf16.msra.mxu3 %v3752_v42 }
 0x2ce   :  { %1446 = vmatpush.bf16.msra.mxu0 %v3763_v54  ;;  %1459 = vmatpush.bf16.msra.mxu1 %v3765_v61 }
 0x2cf   :  { %1472 = vmatpush.bf16.msra.mxu2 %v3770_v2  ;;  %1485 = vmatpush.bf16.msra.mxu3 %v3767_v62 }
 0x2d2   :  { %1447 = vmatpush.bf16.msra.mxu0 %v3778_v10  ;;  %1460 = vmatpush.bf16.msra.mxu1 %v3780_v16 }
 0x2d3   :  { %1473 = vmatpush.bf16.msra.mxu2 %v3796_v23  ;;  %1486 = vmatpush.bf16.msra.mxu3 %v3782_v18 }
 0x331   :  { %v1191_v43 = vpop.f32.mrf.mxu0  ;;  %v1204_v46 = vpop.f32.mrf.mxu1 }
 0x332   :  { %v1234_v44 = vadd.f32 %v1191_v43, %v351_v6  ;;  %v1235_v12 = vadd.f32 %v1204_v46, %v400_v39 }
 0x334   :  { %v3174_v7 = vmul.f32 -1.442695, %v1234_v44  ;;  %v3175_v58 = vmul.f32 -1.442695, %v1235_v12 }
 0x336   :  { %3352 = vpow2.f32 %v3174_v7 }
 0x337   :  { %3354 = vpow2.f32 %v3175_v58 }
 0x338   :  { %v1217_v19 = vpop.f32.mrf.mxu2  ;;  %v1230_v57 = vpop.f32.mrf.mxu3 }
 0x339   :  { %v1237_v53 = vadd.f32 %v1230_v57, %v498_v32  ;;  %v1193_v51 = vpop.f32.mrf.mxu0  ;;  %v1206_v25 = vpop.f32.mrf.mxu1  ;;  %v1236_v1 = vadd.f32 %v1217_v19, %v449_v38 }
 0x33b   :  { %v3176_v33 = vmul.f32 -1.442695, %v1237_v53 }
 0x33c   :  { %v3353_v31 = vpop.eup %3352 }
 0x33d   :  { %v3355_v28 = vpop.eup %3354  ;;  %v1241_v50 = vadd.f32 1.0, %v3353_v31  ;;  %3356 = vpow2.f32 %v3176_v33 }
 0x33e   :  { %v1260_v8 = vadd.f32 1.0, %v3355_v28 }
 0x33f   :  { %3358 = vrcp.f32 %v1241_v50  ;;  %v1253_v7 = vand.u32 2147483648, %v1241_v50  ;;  %v1251_v32 = vand.u32 2147483647, %v1241_v50  ;;  %vm1247_vm6 = vweird.f32 %v1241_v50 }
 0x340   :  { %3360 = vrcp.f32 %v1260_v8  ;;  %v1219_v20 = vpop.f32.mrf.mxu2  ;;  %v1232_v56 = vpop.f32.mrf.mxu3  ;;  %v1272_v58 = vand.u32 2147483648, %v1260_v8  ;;  %v1270_v53 = vand.u32 2147483647, %v1260_v8  ;;  %vm1266_vm7 = vweird.f32 %v1260_v8 }
 0x341   :  { %v1254_v19 = vor.u32 1.1754944e-38, %v1253_v7  ;;  %vm1252_vm10 = vcmp.eq.f32.partialorder %v1251_v32, 8.507059e+37 }
 0x342   :  { %v1273_v28 = vor.u32 1.1754944e-38, %v1272_v58  ;;  %vm1271_vm11 = vcmp.eq.f32.partialorder %v1270_v53, 8.507059e+37  ;;  %v4720_v53 = vld [vmem:[#allocation22_spill] sm:$0xff] }
 0x343   :  { %v3357_v15 = vpop.eup %3356 }
 0x344   :  { %v1280_v34 = vadd.f32 1.0, %v3357_v15 }
 0x345   :  { %v3359_v6 = vpop.eup %3358 }
 0x346   :  { %v3361_v39 = vpop.eup %3360  ;;  %v1243_v43 = vmul.f32 %v3359_v6, %v1241_v50  ;;  %3362 = vrcp.f32 %v1280_v34  ;;  %vm1248_vm4 = vweird.f32 %v3359_v6  ;;  %vm1286_vm13 = vweird.f32 %v1280_v34 }
 0x347   :  { %v1262_v46 = vmul.f32 %v3361_v39, %v1260_v8  ;;  %3364 = vtanh.f32 %v1236_v1  ;;  %vm1267_vm5 = vweird.f32 %v3361_v39  ;;  %vm1249_vm8 = vmor %vm1247_vm6, %vm1248_vm4 }
 0x348   :  { %v1244_v44 = vsub.f32 1.0, %v1243_v43  ;;  %vm1268_vm9 = vmor %vm1266_vm7, %vm1267_vm5 }
 0x349   :  { %v1263_v12 = vsub.f32 1.0, %v1262_v46 }
 0x34a   :  { %v1245_v36 = vmul.f32 %v3359_v6, %v1244_v44 }
 0x34b   :  { %v1264_v57 = vmul.f32 %v3361_v39, %v1263_v12  ;;  %v1292_v12 = vand.u32 2147483648, %v1280_v34 }
 0x34c   :  { %v3363_v51 = vpop.eup %3362  ;;  %v1246_v25 = vadd.f32 %v3359_v6, %v1245_v36 }
 0x34d   :  { %v1265_v33 = vadd.f32 %v3361_v39, %v1264_v57  ;;  %v1282_v31 = vmul.f32 %v3363_v51, %v1280_v34  ;;  %v3365_v56 = vpop.eup %3364  ;;  %vm1287_vm12 = vweird.f32 %v3363_v51  ;;  %v1293_v58 = vor.u32 1.1754944e-38, %v1292_v12 }
 0x34e   :  { %v1250_v20 = vsel %vm1249_vm8, %v3359_v6, %v1246_v25  ;;  %v1290_v6 = vand.u32 2147483647, %v1280_v34  ;;  %vm1288_vm14 = vmor %vm1286_vm13, %vm1287_vm12 }
 0x34f   :  { %v1255_v15 = vsel %vm1252_vm10, %v1254_v19, %v1250_v20  ;;  %v1269_v11 = vsel %vm1268_vm9, %v3361_v39, %v1265_v33  ;;  %v1283_v38 = vsub.f32 1.0, %v1282_v31 }
 0x350   :  { %v1274_v1 = vsel %vm1271_vm11, %v1273_v28, %v1269_v11  ;;  %v1297_v43 = vmul.f32 %v3365_v56, %v1255_v15  ;;  %vm1291_vm15 = vcmp.eq.f32.partialorder %v1290_v6, 8.507059e+37  ;;  %v4721_v56 = vld [vmem:[#allocation24_spill] sm:$0xff] }
 0x351   :  { %v1296_v46 = vmul.f32 %v1274_v1, %v4098_v21  ;;  %v1284_v44 = vmul.f32 %v3363_v51, %v1283_v38  ;;  %v4719_v21 = vld [vmem:[#allocation21_spill] sm:$0xff]  ;;  %v501_v15 = vadd.f32 %v4721_v56, %v3996_v0 }
 0x352   :  { %v354_v34 = vadd.f32 %v4719_v21, %v3984_v24 }
 0x353   :  { %v4145_v50 = vadd.f32 %v1297_v43, %v1296_v46  ;;  %v1285_v8 = vadd.f32 %v3363_v51, %v1284_v44 }
 0x355   :  { %3366 = vtanh.f32 %v4145_v50  ;;  %v1289_v7 = vsel %vm1288_vm14, %v3363_v51, %v1285_v8  ;;  %v403_v51 = vadd.f32 %v4720_v53, %v3986_v29 }
 0x356   :  { %v1294_v36 = vsel %vm1291_vm15, %v1293_v58, %v1289_v7 }
 0x35b   :  { %v3367_v39 = vpop.eup %3366 }
 0x35c   :  { %v1300_v32 = vmul.f32 %v3367_v39, %v1294_v36 }
 0x35e   :  { %v1301_v57 = vpack.c.bf16 %v1300_v32, %v1300_v32  ;;  %v4722_v32 = vld [vmem:[#allocation23_spill] sm:$0xff] }
 0x360   :  { %3177 = vst [vmem:[%s4652_s4 + $0xc] sm:$0xf] %v1301_v57  ;;  %1319 = vmatmul.bf16.vlgmr.msrb.gmra.mxu0 %v1301_v57  ;;  %1332 = vmatmul.bf16.vlgmr.msrb.gmra.mxu1 %v1301_v57 }
 0x361   :  { %1345 = vmatmul.bf16.vlgmr.msrb.gmra.mxu2 %v1301_v57  ;;  %1358 = vmatmul.bf16.vlgmr.msrb.gmra.mxu3 %v1301_v57  ;;  %v452_v57 = vadd.f32 %v4722_v32, %v4000_v5 }
 0x362   :  { %1569 = vmatpush.bf16.msrb.mxu0 %v3679_v37  ;;  %1582 = vmatpush.bf16.msrb.mxu1 %v3681_v41 }
 0x363   :  { %1595 = vmatpush.bf16.msrb.mxu2 %v3683_v47  ;;  %1608 = vmatpush.bf16.msrb.mxu3 %v3686_v48 }
 0x366   :  { %1570 = vmatpush.bf16.msrb.mxu0 %v3688_v49  ;;  %1583 = vmatpush.bf16.msrb.mxu1 %v3691_v52 }
 0x367   :  { %1596 = vmatpush.bf16.msrb.mxu2 %v3694_v55  ;;  %1609 = vmatpush.bf16.msrb.mxu3 %v3698_v59 }
 0x36a   :  { %1571 = vmatpush.bf16.msrb.mxu0 %v3700_v60  ;;  %1584 = vmatpush.bf16.msrb.mxu1 %v3703_v63 }
 0x36b   :  { %1597 = vmatpush.bf16.msrb.mxu2 %v3706_v3  ;;  %1610 = vmatpush.bf16.msrb.mxu3 %v3710_v4 }
 0x36e   :  { %1572 = vmatpush.bf16.msrb.mxu0 %v3718_v9  ;;  %1585 = vmatpush.bf16.msrb.mxu1 %v3720_v13 }
 0x36f   :  { %1598 = vmatpush.bf16.msrb.mxu2 %v3725_v17  ;;  %1611 = vmatpush.bf16.msrb.mxu3 %v3722_v14 }
 0x372   :  { %1573 = vmatpush.bf16.msrb.mxu0 %v3733_v22  ;;  %1586 = vmatpush.bf16.msrb.mxu1 %v3735_v26 }
 0x373   :  { %1599 = vmatpush.bf16.msrb.mxu2 %v3740_v30  ;;  %1612 = vmatpush.bf16.msrb.mxu3 %v3737_v27 }
 0x376   :  { %1574 = vmatpush.bf16.msrb.mxu0 %v3748_v35  ;;  %1587 = vmatpush.bf16.msrb.mxu1 %v3750_v40 }
 0x377   :  { %1600 = vmatpush.bf16.msrb.mxu2 %v3755_v45  ;;  %1613 = vmatpush.bf16.msrb.mxu3 %v3752_v42 }
 0x37a   :  { %1575 = vmatpush.bf16.msrb.mxu0 %v3763_v54  ;;  %1588 = vmatpush.bf16.msrb.mxu1 %v3765_v61 }
 0x37b   :  { %1601 = vmatpush.bf16.msrb.mxu2 %v3770_v2  ;;  %1614 = vmatpush.bf16.msrb.mxu3 %v3767_v62 }
 0x37e   :  { %1576 = vmatpush.bf16.msrb.mxu0 %v3778_v10  ;;  %1589 = vmatpush.bf16.msrb.mxu1 %v3780_v16 }
 0x37f   :  { %1602 = vmatpush.bf16.msrb.mxu2 %v3796_v23  ;;  %1615 = vmatpush.bf16.msrb.mxu3 %v3782_v18 }
 0x3dd   :  { %v1320_v25 = vpop.f32.mrf.mxu0  ;;  %v1333_v19 = vpop.f32.mrf.mxu1 }
 0x3de   :  { %v1363_v33 = vadd.f32 %v1320_v25, %v354_v34  ;;  %v1364_v31 = vadd.f32 %v1333_v19, %v403_v51 }
 0x3e0   :  { %v3178_v28 = vmul.f32 -1.442695, %v1363_v33  ;;  %v3179_v20 = vmul.f32 -1.442695, %v1364_v31 }
 0x3e2   :  { %3368 = vpow2.f32 %v3178_v28 }
 0x3e3   :  { %3370 = vpow2.f32 %v3179_v20 }
 0x3e4   :  { %v1346_v11 = vpop.f32.mrf.mxu2  ;;  %v1359_v38 = vpop.f32.mrf.mxu3 }
 0x3e5   :  { %v1366_v1 = vadd.f32 %v1359_v38, %v501_v15  ;;  %v1322_v43 = vpop.f32.mrf.mxu0  ;;  %v1335_v46 = vpop.f32.mrf.mxu1  ;;  %v1365_v53 = vadd.f32 %v1346_v11, %v452_v57 }
 0x3e7   :  { %v3180_v44 = vmul.f32 -1.442695, %v1366_v1 }
 0x3e8   :  { %v3369_v8 = vpop.eup %3368 }
 0x3e9   :  { %v3371_v12 = vpop.eup %3370  ;;  %v1370_v6 = vadd.f32 1.0, %v3369_v8  ;;  %3372 = vpow2.f32 %v3180_v44 }
 0x3ea   :  { %v1389_v7 = vadd.f32 1.0, %v3371_v12 }
 0x3eb   :  { %3374 = vrcp.f32 %v1370_v6  ;;  %v1382_v28 = vand.u32 2147483648, %v1370_v6  ;;  %v1380_v15 = vand.u32 2147483647, %v1370_v6  ;;  %vm1376_vm2 = vweird.f32 %v1370_v6 }
 0x3ec   :  { %3376 = vrcp.f32 %v1389_v7  ;;  %v1348_v58 = vpop.f32.mrf.mxu2  ;;  %v1361_v39 = vpop.f32.mrf.mxu3  ;;  %v1401_v20 = vand.u32 2147483648, %v1389_v7  ;;  %v1399_v1 = vand.u32 2147483647, %v1389_v7  ;;  %vm1395_vm3 = vweird.f32 %v1389_v7 }
 0x3ed   :  { %v1383_v11 = vor.u32 1.1754944e-38, %v1382_v28  ;;  %vm1381_vm6 = vcmp.eq.f32.partialorder %v1380_v15, 8.507059e+37 }
 0x3ee   :  { %v1402_v12 = vor.u32 1.1754944e-38, %v1401_v20  ;;  %vm1400_vm7 = vcmp.eq.f32.partialorder %v1399_v1, 8.507059e+37  ;;  %v4724_v1 = vld [vmem:[#allocation26_spill] sm:$0xff] }
 0x3ef   :  { %v3373_v36 = vpop.eup %3372 }
 0x3f0   :  { %v1409_v21 = vadd.f32 1.0, %v3373_v36 }
 0x3f1   :  { %v3375_v34 = vpop.eup %3374 }
 0x3f2   :  { %v3377_v51 = vpop.eup %3376  ;;  %v1372_v25 = vmul.f32 %v3375_v34, %v1370_v6  ;;  %3378 = vrcp.f32 %v1409_v21  ;;  %vm1377_vm0 = vweird.f32 %v3375_v34  ;;  %vm1415_vm9 = vweird.f32 %v1409_v21 }
 0x3f3   :  { %v1391_v19 = vmul.f32 %v3377_v51, %v1389_v7  ;;  %3380 = vtanh.f32 %v1365_v53  ;;  %vm1396_vm1 = vweird.f32 %v3377_v51  ;;  %vm1378_vm4 = vmor %vm1376_vm2, %vm1377_vm0 }
 0x3f4   :  { %v1373_v33 = vsub.f32 1.0, %v1372_v25  ;;  %vm1397_vm5 = vmor %vm1395_vm3, %vm1396_vm1 }
 0x3f5   :  { %v1392_v31 = vsub.f32 1.0, %v1391_v19 }
 0x3f6   :  { %v1374_v56 = vmul.f32 %v3375_v34, %v1373_v33 }
 0x3f7   :  { %v1393_v38 = vmul.f32 %v3377_v51, %v1392_v31  ;;  %v1421_v31 = vand.u32 2147483648, %v1409_v21 }
 0x3f8   :  { %v3379_v43 = vpop.eup %3378  ;;  %v1375_v46 = vadd.f32 %v3375_v34, %v1374_v56 }
 0x3f9   :  { %v1394_v44 = vadd.f32 %v3377_v51, %v1393_v38  ;;  %v1411_v8 = vmul.f32 %v3379_v43, %v1409_v21  ;;  %v3381_v39 = vpop.eup %3380  ;;  %vm1416_vm8 = vweird.f32 %v3379_v43  ;;  %v1422_v20 = vor.u32 1.1754944e-38, %v1421_v31 }
 0x3fa   :  { %v1379_v58 = vsel %vm1378_vm4, %v3375_v34, %v1375_v46  ;;  %v1419_v34 = vand.u32 2147483647, %v1409_v21  ;;  %vm1417_vm10 = vmor %vm1415_vm9, %vm1416_vm8 }
 0x3fb   :  { %v1384_v36 = vsel %vm1381_vm6, %v1383_v11, %v1379_v58  ;;  %v1398_v32 = vsel %vm1397_vm5, %v3377_v51, %v1394_v44  ;;  %v1412_v57 = vsub.f32 1.0, %v1411_v8 }
 0x3fc   :  { %v1403_v53 = vsel %vm1400_vm7, %v1402_v12, %v1398_v32  ;;  %v1426_v25 = vmul.f32 %v3381_v39, %v1384_v36  ;;  %vm1420_vm11 = vcmp.eq.f32.partialorder %v1419_v34, 8.507059e+37  ;;  %v4725_v39 = vld [vmem:[#allocation28_spill] sm:$0xff] }
 0x3fd   :  { %v1425_v19 = vmul.f32 %v1403_v53, %v4145_v50  ;;  %v1413_v33 = vmul.f32 %v3379_v43, %v1412_v57  ;;  %v4723_v50 = vld [vmem:[#allocation25_spill] sm:$0xff]  ;;  %v503_v36 = vadd.f32 %v4725_v39, %v3996_v0 }
 0x3fe   :  { %v356_v21 = vadd.f32 %v4723_v50, %v3984_v24 }
 0x3ff   :  { %v4192_v6 = vadd.f32 %v1426_v25, %v1425_v19  ;;  %v1414_v7 = vadd.f32 %v3379_v43, %v1413_v33 }
 0x401   :  { %3382 = vtanh.f32 %v4192_v6  ;;  %v1418_v28 = vsel %vm1417_vm10, %v3379_v43, %v1414_v7  ;;  %v405_v43 = vadd.f32 %v4724_v1, %v3986_v29 }
 0x402   :  { %v1423_v56 = vsel %vm1420_vm11, %v1422_v20, %v1418_v28 }
 0x407   :  { %v3383_v51 = vpop.eup %3382 }
 0x408   :  { %v1429_v15 = vmul.f32 %v3383_v51, %v1423_v56 }
 0x40a   :  { %v1430_v38 = vpack.c.bf16 %v1429_v15, %v1429_v15  ;;  %v4726_v15 = vld [vmem:[#allocation27_spill] sm:$0xff] }
 0x40c   :  { %3181 = vst [vmem:[%s4652_s4 + $0x10] sm:$0xf] %v1430_v38  ;;  %1448 = vmatmul.bf16.vlgmr.msra.gmra.mxu0 %v1430_v38  ;;  %1461 = vmatmul.bf16.vlgmr.msra.gmra.mxu1 %v1430_v38 }
 0x40d   :  { %1474 = vmatmul.bf16.vlgmr.msra.gmra.mxu2 %v1430_v38  ;;  %1487 = vmatmul.bf16.vlgmr.msra.gmra.mxu3 %v1430_v38  ;;  %v454_v38 = vadd.f32 %v4726_v15, %v4000_v5 }
 0x40e   :  { %1698 = vmatpush.bf16.msra.mxu0 %v3679_v37  ;;  %1711 = vmatpush.bf16.msra.mxu1 %v3681_v41 }
 0x40f   :  { %1724 = vmatpush.bf16.msra.mxu2 %v3683_v47  ;;  %1737 = vmatpush.bf16.msra.mxu3 %v3686_v48 }
 0x412   :  { %1699 = vmatpush.bf16.msra.mxu0 %v3688_v49  ;;  %1712 = vmatpush.bf16.msra.mxu1 %v3691_v52 }
 0x413   :  { %1725 = vmatpush.bf16.msra.mxu2 %v3694_v55  ;;  %1738 = vmatpush.bf16.msra.mxu3 %v3698_v59 }
 0x416   :  { %1700 = vmatpush.bf16.msra.mxu0 %v3700_v60  ;;  %1713 = vmatpush.bf16.msra.mxu1 %v3703_v63 }
 0x417   :  { %1726 = vmatpush.bf16.msra.mxu2 %v3706_v3  ;;  %1739 = vmatpush.bf16.msra.mxu3 %v3710_v4 }
 0x41a   :  { %1701 = vmatpush.bf16.msra.mxu0 %v3718_v9  ;;  %1714 = vmatpush.bf16.msra.mxu1 %v3720_v13 }
 0x41b   :  { %1727 = vmatpush.bf16.msra.mxu2 %v3725_v17  ;;  %1740 = vmatpush.bf16.msra.mxu3 %v3722_v14 }
 0x41e   :  { %1702 = vmatpush.bf16.msra.mxu0 %v3733_v22  ;;  %1715 = vmatpush.bf16.msra.mxu1 %v3735_v26 }
 0x41f   :  { %1728 = vmatpush.bf16.msra.mxu2 %v3740_v30  ;;  %1741 = vmatpush.bf16.msra.mxu3 %v3737_v27 }
 0x422   :  { %1703 = vmatpush.bf16.msra.mxu0 %v3748_v35  ;;  %1716 = vmatpush.bf16.msra.mxu1 %v3750_v40 }
 0x423   :  { %1729 = vmatpush.bf16.msra.mxu2 %v3755_v45  ;;  %1742 = vmatpush.bf16.msra.mxu3 %v3752_v42 }
 0x426   :  { %1704 = vmatpush.bf16.msra.mxu0 %v3763_v54  ;;  %1717 = vmatpush.bf16.msra.mxu1 %v3765_v61 }
 0x427   :  { %1730 = vmatpush.bf16.msra.mxu2 %v3770_v2  ;;  %1743 = vmatpush.bf16.msra.mxu3 %v3767_v62 }
 0x42a   :  { %1705 = vmatpush.bf16.msra.mxu0 %v3778_v10  ;;  %1718 = vmatpush.bf16.msra.mxu1 %v3780_v16 }
 0x42b   :  { %1731 = vmatpush.bf16.msra.mxu2 %v3796_v23  ;;  %1744 = vmatpush.bf16.msra.mxu3 %v3782_v18 }
 0x489   :  { %v1449_v46 = vpop.f32.mrf.mxu0  ;;  %v1462_v11 = vpop.f32.mrf.mxu1 }
 0x48a   :  { %v1492_v44 = vadd.f32 %v1449_v46, %v356_v21  ;;  %v1493_v8 = vadd.f32 %v1462_v11, %v405_v43 }
 0x48c   :  { %v3182_v12 = vmul.f32 -1.442695, %v1492_v44  ;;  %v3183_v58 = vmul.f32 -1.442695, %v1493_v8 }
 0x48e   :  { %3384 = vpow2.f32 %v3182_v12 }
 0x48f   :  { %3386 = vpow2.f32 %v3183_v58 }
 0x490   :  { %v1475_v32 = vpop.f32.mrf.mxu2  ;;  %v1488_v57 = vpop.f32.mrf.mxu3 }
 0x491   :  { %v1495_v53 = vadd.f32 %v1488_v57, %v503_v36  ;;  %v1451_v25 = vpop.f32.mrf.mxu0  ;;  %v1464_v19 = vpop.f32.mrf.mxu1  ;;  %v1494_v1 = vadd.f32 %v1475_v32, %v454_v38 }
 0x493   :  { %v3184_v33 = vmul.f32 -1.442695, %v1495_v53 }
 0x494   :  { %v3385_v7 = vpop.eup %3384 }
 0x495   :  { %v3387_v31 = vpop.eup %3386  ;;  %v1499_v34 = vadd.f32 1.0, %v3385_v7  ;;  %3388 = vpow2.f32 %v3184_v33 }
 0x496   :  { %v1518_v28 = vadd.f32 1.0, %v3387_v31 }
 0x497   :  { %3390 = vrcp.f32 %v1499_v34  ;;  %v1511_v12 = vand.u32 2147483648, %v1499_v34  ;;  %v1509_v36 = vand.u32 2147483647, %v1499_v34  ;;  %vm1505_vm14 = vweird.f32 %v1499_v34 }
 0x498   :  { %3392 = vrcp.f32 %v1518_v28  ;;  %v1477_v20 = vpop.f32.mrf.mxu2  ;;  %v1490_v51 = vpop.f32.mrf.mxu3  ;;  %v1530_v58 = vand.u32 2147483648, %v1518_v28  ;;  %v1528_v53 = vand.u32 2147483647, %v1518_v28  ;;  %vm1524_vm15 = vweird.f32 %v1518_v28 }
 0x499   :  { %v1512_v32 = vor.u32 1.1754944e-38, %v1511_v12  ;;  %vm1510_vm2 = vcmp.eq.f32.partialorder %v1509_v36, 8.507059e+37 }
 0x49a   :  { %v1531_v31 = vor.u32 1.1754944e-38, %v1530_v58  ;;  %vm1529_vm3 = vcmp.eq.f32.partialorder %v1528_v53, 8.507059e+37  ;;  %v4728_v53 = vld [vmem:[#allocation30_spill] sm:$0xff] }
 0x49b   :  { %v3389_v56 = vpop.eup %3388 }
 0x49c   :  { %v1538_v50 = vadd.f32 1.0, %v3389_v56 }
 0x49d   :  { %v3391_v21 = vpop.eup %3390 }
 0x49e   :  { %v3393_v43 = vpop.eup %3392  ;;  %v1501_v46 = vmul.f32 %v3391_v21, %v1499_v34  ;;  %3394 = vrcp.f32 %v1538_v50  ;;  %vm1506_vm12 = vweird.f32 %v3391_v21  ;;  %vm1544_vm5 = vweird.f32 %v1538_v50 }
 0x49f   :  { %v1520_v11 = vmul.f32 %v3393_v43, %v1518_v28  ;;  %3396 = vtanh.f32 %v1494_v1  ;;  %vm1525_vm13 = vweird.f32 %v3393_v43  ;;  %vm1507_vm0 = vmor %vm1505_vm14, %vm1506_vm12 }
 0x4a0   :  { %v1502_v44 = vsub.f32 1.0, %v1501_v46  ;;  %vm1526_vm1 = vmor %vm1524_vm15, %vm1525_vm13 }
 0x4a1   :  { %v1521_v8 = vsub.f32 1.0, %v1520_v11 }
 0x4a2   :  { %v1503_v39 = vmul.f32 %v3391_v21, %v1502_v44 }
 0x4a3   :  { %v1522_v57 = vmul.f32 %v3393_v43, %v1521_v8  ;;  %v1550_v8 = vand.u32 2147483648, %v1538_v50 }
 0x4a4   :  { %v3395_v25 = vpop.eup %3394  ;;  %v1504_v19 = vadd.f32 %v3391_v21, %v1503_v39 }
 0x4a5   :  { %v1523_v33 = vadd.f32 %v3393_v43, %v1522_v57  ;;  %v1540_v7 = vmul.f32 %v3395_v25, %v1538_v50  ;;  %v3397_v51 = vpop.eup %3396  ;;  %vm1545_vm4 = vweird.f32 %v3395_v25  ;;  %v1551_v58 = vor.u32 1.1754944e-38, %v1550_v8 }
 0x4a6   :  { %v1508_v20 = vsel %vm1507_vm0, %v3391_v21, %v1504_v19  ;;  %v1548_v21 = vand.u32 2147483647, %v1538_v50  ;;  %vm1546_vm6 = vmor %vm1544_vm5, %vm1545_vm4 }
 0x4a7   :  { %v1513_v56 = vsel %vm1510_vm2, %v1512_v32, %v1508_v20  ;;  %v1527_v15 = vsel %vm1526_vm1, %v3393_v43, %v1523_v33  ;;  %v1541_v38 = vsub.f32 1.0, %v1540_v7 }
 0x4a8   :  { %v1532_v1 = vsel %vm1529_vm3, %v1531_v31, %v1527_v15  ;;  %v1555_v46 = vmul.f32 %v3397_v51, %v1513_v56  ;;  %vm1549_vm7 = vcmp.eq.f32.partialorder %v1548_v21, 8.507059e+37  ;;  %v4729_v51 = vld [vmem:[#allocation32_spill] sm:$0xff] }
 0x4a9   :  { %v1554_v11 = vmul.f32 %v1532_v1, %v4192_v6  ;;  %v1542_v44 = vmul.f32 %v3395_v25, %v1541_v38  ;;  %v4727_v6 = vld [vmem:[#allocation29_spill] sm:$0xff]  ;;  %v506_v56 = vadd.f32 %v4729_v51, %v3996_v0 }
 0x4aa   :  { %v359_v50 = vadd.f32 %v4727_v6, %v3984_v24 }
 0x4ab   :  { %v4239_v34 = vadd.f32 %v1555_v46, %v1554_v11  ;;  %v1543_v28 = vadd.f32 %v3395_v25, %v1542_v44 }
 0x4ad   :  { %3398 = vtanh.f32 %v4239_v34  ;;  %v1547_v12 = vsel %vm1546_vm6, %v3395_v25, %v1543_v28  ;;  %v408_v25 = vadd.f32 %v4728_v53, %v3986_v29 }
 0x4ae   :  { %v1552_v39 = vsel %vm1549_vm7, %v1551_v58, %v1547_v12 }
 0x4b3   :  { %v3399_v43 = vpop.eup %3398 }
 0x4b4   :  { %v1558_v36 = vmul.f32 %v3399_v43, %v1552_v39 }
 0x4b6   :  { %v1559_v57 = vpack.c.bf16 %v1558_v36, %v1558_v36  ;;  %v4730_v36 = vld [vmem:[#allocation31_spill] sm:$0xff] }
 0x4b8   :  { %3185 = vst [vmem:[%s4652_s4 + $0x14] sm:$0xf] %v1559_v57  ;;  %1577 = vmatmul.bf16.vlgmr.msrb.gmra.mxu0 %v1559_v57  ;;  %1590 = vmatmul.bf16.vlgmr.msrb.gmra.mxu1 %v1559_v57 }
 0x4b9   :  { %1603 = vmatmul.bf16.vlgmr.msrb.gmra.mxu2 %v1559_v57  ;;  %1616 = vmatmul.bf16.vlgmr.msrb.gmra.mxu3 %v1559_v57  ;;  %v457_v57 = vadd.f32 %v4730_v36, %v4000_v5 }
 0x4ba   :  { %1827 = vmatpush.bf16.msrb.mxu0 %v3679_v37  ;;  %1840 = vmatpush.bf16.msrb.mxu1 %v3681_v41 }
 0x4bb   :  { %1853 = vmatpush.bf16.msrb.mxu2 %v3683_v47  ;;  %1866 = vmatpush.bf16.msrb.mxu3 %v3686_v48 }
 0x4be   :  { %1828 = vmatpush.bf16.msrb.mxu0 %v3688_v49  ;;  %1841 = vmatpush.bf16.msrb.mxu1 %v3691_v52 }
 0x4bf   :  { %1854 = vmatpush.bf16.msrb.mxu2 %v3694_v55  ;;  %1867 = vmatpush.bf16.msrb.mxu3 %v3698_v59 }
 0x4c2   :  { %1829 = vmatpush.bf16.msrb.mxu0 %v3700_v60  ;;  %1842 = vmatpush.bf16.msrb.mxu1 %v3703_v63 }
 0x4c3   :  { %1855 = vmatpush.bf16.msrb.mxu2 %v3706_v3  ;;  %1868 = vmatpush.bf16.msrb.mxu3 %v3710_v4 }
 0x4c6   :  { %1830 = vmatpush.bf16.msrb.mxu0 %v3718_v9  ;;  %1843 = vmatpush.bf16.msrb.mxu1 %v3720_v13 }
 0x4c7   :  { %1856 = vmatpush.bf16.msrb.mxu2 %v3725_v17  ;;  %1869 = vmatpush.bf16.msrb.mxu3 %v3722_v14 }
 0x4ca   :  { %1831 = vmatpush.bf16.msrb.mxu0 %v3733_v22  ;;  %1844 = vmatpush.bf16.msrb.mxu1 %v3735_v26 }
 0x4cb   :  { %1857 = vmatpush.bf16.msrb.mxu2 %v3740_v30  ;;  %1870 = vmatpush.bf16.msrb.mxu3 %v3737_v27 }
 0x4ce   :  { %1832 = vmatpush.bf16.msrb.mxu0 %v3748_v35  ;;  %1845 = vmatpush.bf16.msrb.mxu1 %v3750_v40 }
 0x4cf   :  { %1858 = vmatpush.bf16.msrb.mxu2 %v3755_v45  ;;  %1871 = vmatpush.bf16.msrb.mxu3 %v3752_v42 }
 0x4d2   :  { %1833 = vmatpush.bf16.msrb.mxu0 %v3763_v54  ;;  %1846 = vmatpush.bf16.msrb.mxu1 %v3765_v61 }
 0x4d3   :  { %1859 = vmatpush.bf16.msrb.mxu2 %v3770_v2  ;;  %1872 = vmatpush.bf16.msrb.mxu3 %v3767_v62 }
 0x4d6   :  { %1834 = vmatpush.bf16.msrb.mxu0 %v3778_v10  ;;  %1847 = vmatpush.bf16.msrb.mxu1 %v3780_v16 }
 0x4d7   :  { %1860 = vmatpush.bf16.msrb.mxu2 %v3796_v23  ;;  %1873 = vmatpush.bf16.msrb.mxu3 %v3782_v18 }
 0x535   :  { %v1578_v19 = vpop.f32.mrf.mxu0  ;;  %v1591_v32 = vpop.f32.mrf.mxu1 }
 0x536   :  { %v1621_v33 = vadd.f32 %v1578_v19, %v359_v50  ;;  %v1622_v7 = vadd.f32 %v1591_v32, %v408_v25 }
 0x538   :  { %v3186_v31 = vmul.f32 -1.442695, %v1621_v33  ;;  %v3187_v20 = vmul.f32 -1.442695, %v1622_v7 }
 0x53a   :  { %3400 = vpow2.f32 %v3186_v31 }
 0x53b   :  { %3402 = vpow2.f32 %v3187_v20 }
 0x53c   :  { %v1604_v15 = vpop.f32.mrf.mxu2  ;;  %v1617_v38 = vpop.f32.mrf.mxu3 }
 0x53d   :  { %v1624_v1 = vadd.f32 %v1617_v38, %v506_v56  ;;  %v1580_v46 = vpop.f32.mrf.mxu0  ;;  %v1593_v11 = vpop.f32.mrf.mxu1  ;;  %v1623_v53 = vadd.f32 %v1604_v15, %v457_v57 }
 0x53f   :  { %v3188_v44 = vmul.f32 -1.442695, %v1624_v1 }
 0x540   :  { %v3401_v28 = vpop.eup %3400 }
 0x541   :  { %v3403_v8 = vpop.eup %3402  ;;  %v1628_v21 = vadd.f32 1.0, %v3401_v28  ;;  %3404 = vpow2.f32 %v3188_v44 }
 0x542   :  { %v1647_v12 = vadd.f32 1.0, %v3403_v8 }
 0x543   :  { %3406 = vrcp.f32 %v1628_v21  ;;  %v1640_v31 = vand.u32 2147483648, %v1628_v21  ;;  %v1638_v56 = vand.u32 2147483647, %v1628_v21  ;;  %vm1634_vm10 = vweird.f32 %v1628_v21 }
 0x544   :  { %3408 = vrcp.f32 %v1647_v12  ;;  %v1606_v58 = vpop.f32.mrf.mxu2  ;;  %v1619_v43 = vpop.f32.mrf.mxu3  ;;  %v1659_v20 = vand.u32 2147483648, %v1647_v12  ;;  %v1657_v1 = vand.u32 2147483647, %v1647_v12  ;;  %vm1653_vm11 = vweird.f32 %v1647_v12 }
 0x545   :  { %v1641_v15 = vor.u32 1.1754944e-38, %v1640_v31  ;;  %vm1639_vm14 = vcmp.eq.f32.partialorder %v1638_v56, 8.507059e+37 }
 0x546   :  { %v1660_v8 = vor.u32 1.1754944e-38, %v1659_v20  ;;  %vm1658_vm15 = vcmp.eq.f32.partialorder %v1657_v1, 8.507059e+37  ;;  %v4732_v1 = vld [vmem:[#allocation34_spill] sm:$0xff] }
 0x547   :  { %v3405_v39 = vpop.eup %3404 }
 0x548   :  { %v1667_v6 = vadd.f32 1.0, %v3405_v39 }
 0x549   :  { %v3407_v50 = vpop.eup %3406 }
 0x54a   :  { %v3409_v25 = vpop.eup %3408  ;;  %v1630_v19 = vmul.f32 %v3407_v50, %v1628_v21  ;;  %3410 = vrcp.f32 %v1667_v6  ;;  %vm1635_vm8 = vweird.f32 %v3407_v50  ;;  %vm1673_vm1 = vweird.f32 %v1667_v6 }
 0x54b   :  { %v1649_v32 = vmul.f32 %v3409_v25, %v1647_v12  ;;  %3412 = vtanh.f32 %v1623_v53  ;;  %vm1654_vm9 = vweird.f32 %v3409_v25  ;;  %vm1636_vm12 = vmor %vm1634_vm10, %vm1635_vm8 }
 0x54c   :  { %v1631_v33 = vsub.f32 1.0, %v1630_v19  ;;  %vm1655_vm13 = vmor %vm1653_vm11, %vm1654_vm9 }
 0x54d   :  { %v1650_v7 = vsub.f32 1.0, %v1649_v32 }
 0x54e   :  { %v1632_v51 = vmul.f32 %v3407_v50, %v1631_v33 }
 0x54f   :  { %v1651_v38 = vmul.f32 %v3409_v25, %v1650_v7  ;;  %v1679_v7 = vand.u32 2147483648, %v1667_v6 }
 0x550   :  { %v3411_v46 = vpop.eup %3410  ;;  %v1633_v11 = vadd.f32 %v3407_v50, %v1632_v51 }
 0x551   :  { %v1652_v44 = vadd.f32 %v3409_v25, %v1651_v38  ;;  %v1669_v28 = vmul.f32 %v3411_v46, %v1667_v6  ;;  %v3413_v43 = vpop.eup %3412  ;;  %vm1674_vm0 = vweird.f32 %v3411_v46  ;;  %v1680_v20 = vor.u32 1.1754944e-38, %v1679_v7 }
 0x552   :  { %v1637_v58 = vsel %vm1636_vm12, %v3407_v50, %v1633_v11  ;;  %v1677_v50 = vand.u32 2147483647, %v1667_v6  ;;  %vm1675_vm2 = vmor %vm1673_vm1, %vm1674_vm0 }
 0x553   :  { %v1642_v39 = vsel %vm1639_vm14, %v1641_v15, %v1637_v58  ;;  %v1656_v36 = vsel %vm1655_vm13, %v3409_v25, %v1652_v44  ;;  %v1670_v57 = vsub.f32 1.0, %v1669_v28 }
 0x554   :  { %v1661_v53 = vsel %vm1658_vm15, %v1660_v8, %v1656_v36  ;;  %v1684_v19 = vmul.f32 %v3413_v43, %v1642_v39  ;;  %vm1678_vm3 = vcmp.eq.f32.partialorder %v1677_v50, 8.507059e+37  ;;  %v4733_v43 = vld [vmem:[#allocation36_spill] sm:$0xff] }
 0x555   :  { %v1683_v32 = vmul.f32 %v1661_v53, %v4239_v34  ;;  %v1671_v33 = vmul.f32 %v3411_v46, %v1670_v57  ;;  %v4731_v34 = vld [vmem:[#allocation33_spill] sm:$0xff]  ;;  %v508_v39 = vadd.f32 %v4733_v43, %v3996_v0 }
 0x556   :  { %v361_v6 = vadd.f32 %v4731_v34, %v3984_v24 }
 0x557   :  { %v4286_v21 = vadd.f32 %v1684_v19, %v1683_v32  ;;  %v1672_v12 = vadd.f32 %v3411_v46, %v1671_v33 }
 0x559   :  { %3414 = vtanh.f32 %v4286_v21  ;;  %v1676_v31 = vsel %vm1675_vm2, %v3411_v46, %v1672_v12  ;;  %v410_v46 = vadd.f32 %v4732_v1, %v3986_v29 }
 0x55a   :  { %v1681_v51 = vsel %vm1678_vm3, %v1680_v20, %v1676_v31 }
 0x55f   :  { %v3415_v25 = vpop.eup %3414 }
 0x560   :  { %v1687_v56 = vmul.f32 %v3415_v25, %v1681_v51 }
 0x562   :  { %v1688_v38 = vpack.c.bf16 %v1687_v56, %v1687_v56  ;;  %v4734_v56 = vld [vmem:[#allocation35_spill] sm:$0xff] }
 0x564   :  { %3189 = vst [vmem:[%s4652_s4 + $0x18] sm:$0xf] %v1688_v38  ;;  %1706 = vmatmul.bf16.vlgmr.msra.gmra.mxu0 %v1688_v38  ;;  %1719 = vmatmul.bf16.vlgmr.msra.gmra.mxu1 %v1688_v38 }
 0x565   :  { %1732 = vmatmul.bf16.vlgmr.msra.gmra.mxu2 %v1688_v38  ;;  %1745 = vmatmul.bf16.vlgmr.msra.gmra.mxu3 %v1688_v38  ;;  %v459_v38 = vadd.f32 %v4734_v56, %v4000_v5 }
 0x566   :  { %1956 = vmatpush.bf16.msra.mxu0 %v3679_v37  ;;  %1969 = vmatpush.bf16.msra.mxu1 %v3681_v41 }
 0x567   :  { %1982 = vmatpush.bf16.msra.mxu2 %v3683_v47  ;;  %1995 = vmatpush.bf16.msra.mxu3 %v3686_v48 }
 0x56a   :  { %1957 = vmatpush.bf16.msra.mxu0 %v3688_v49  ;;  %1970 = vmatpush.bf16.msra.mxu1 %v3691_v52 }
 0x56b   :  { %1983 = vmatpush.bf16.msra.mxu2 %v3694_v55  ;;  %1996 = vmatpush.bf16.msra.mxu3 %v3698_v59 }
 0x56e   :  { %1958 = vmatpush.bf16.msra.mxu0 %v3700_v60  ;;  %1971 = vmatpush.bf16.msra.mxu1 %v3703_v63 }
 0x56f   :  { %1984 = vmatpush.bf16.msra.mxu2 %v3706_v3  ;;  %1997 = vmatpush.bf16.msra.mxu3 %v3710_v4 }
 0x572   :  { %1959 = vmatpush.bf16.msra.mxu0 %v3718_v9  ;;  %1972 = vmatpush.bf16.msra.mxu1 %v3720_v13 }
 0x573   :  { %1985 = vmatpush.bf16.msra.mxu2 %v3725_v17  ;;  %1998 = vmatpush.bf16.msra.mxu3 %v3722_v14 }
 0x576   :  { %1960 = vmatpush.bf16.msra.mxu0 %v3733_v22  ;;  %1973 = vmatpush.bf16.msra.mxu1 %v3735_v26 }
 0x577   :  { %1986 = vmatpush.bf16.msra.mxu2 %v3740_v30  ;;  %1999 = vmatpush.bf16.msra.mxu3 %v3737_v27 }
 0x57a   :  { %1961 = vmatpush.bf16.msra.mxu0 %v3748_v35  ;;  %1974 = vmatpush.bf16.msra.mxu1 %v3750_v40 }
 0x57b   :  { %1987 = vmatpush.bf16.msra.mxu2 %v3755_v45  ;;  %2000 = vmatpush.bf16.msra.mxu3 %v3752_v42 }
 0x57e   :  { %1962 = vmatpush.bf16.msra.mxu0 %v3763_v54  ;;  %1975 = vmatpush.bf16.msra.mxu1 %v3765_v61 }
 0x57f   :  { %1988 = vmatpush.bf16.msra.mxu2 %v3770_v2  ;;  %2001 = vmatpush.bf16.msra.mxu3 %v3767_v62 }
 0x582   :  { %1963 = vmatpush.bf16.msra.mxu0 %v3778_v10  ;;  %1976 = vmatpush.bf16.msra.mxu1 %v3780_v16 }
 0x583   :  { %1989 = vmatpush.bf16.msra.mxu2 %v3796_v23  ;;  %2002 = vmatpush.bf16.msra.mxu3 %v3782_v18 }
 0x5e1   :  { %v1707_v11 = vpop.f32.mrf.mxu0  ;;  %v1720_v15 = vpop.f32.mrf.mxu1 }
 0x5e2   :  { %v1750_v44 = vadd.f32 %v1707_v11, %v361_v6  ;;  %v1751_v28 = vadd.f32 %v1720_v15, %v410_v46 }
 0x5e4   :  { %v3190_v8 = vmul.f32 -1.442695, %v1750_v44  ;;  %v3191_v58 = vmul.f32 -1.442695, %v1751_v28 }
 0x5e6   :  { %3416 = vpow2.f32 %v3190_v8 }
 0x5e7   :  { %3418 = vpow2.f32 %v3191_v58 }
 0x5e8   :  { %v1733_v36 = vpop.f32.mrf.mxu2  ;;  %v1746_v57 = vpop.f32.mrf.mxu3 }
 0x5e9   :  { %v1753_v53 = vadd.f32 %v1746_v57, %v508_v39  ;;  %v1709_v19 = vpop.f32.mrf.mxu0  ;;  %v1722_v32 = vpop.f32.mrf.mxu1  ;;  %v1752_v1 = vadd.f32 %v1733_v36, %v459_v38 }
 0x5eb   :  { %v3192_v33 = vmul.f32 -1.442695, %v1753_v53 }
 0x5ec   :  { %v3417_v12 = vpop.eup %3416 }
 0x5ed   :  { %v3419_v7 = vpop.eup %3418  ;;  %v1757_v50 = vadd.f32 1.0, %v3417_v12  ;;  %3420 = vpow2.f32 %v3192_v33 }
 0x5ee   :  { %v1776_v31 = vadd.f32 1.0, %v3419_v7 }
 0x5ef   :  { %3422 = vrcp.f32 %v1757_v50  ;;  %v1769_v8 = vand.u32 2147483648, %v1757_v50  ;;  %v1767_v39 = vand.u32 2147483647, %v1757_v50  ;;  %vm1763_vm6 = vweird.f32 %v1757_v50 }
 0x5f0   :  { %3424 = vrcp.f32 %v1776_v31  ;;  %v1735_v20 = vpop.f32.mrf.mxu2  ;;  %v1748_v25 = vpop.f32.mrf.mxu3  ;;  %v1788_v58 = vand.u32 2147483648, %v1776_v31  ;;  %v1786_v53 = vand.u32 2147483647, %v1776_v31  ;;  %vm1782_vm7 = vweird.f32 %v1776_v31 }
 0x5f1   :  { %v1770_v36 = vor.u32 1.1754944e-38, %v1769_v8  ;;  %vm1768_vm10 = vcmp.eq.f32.partialorder %v1767_v39, 8.507059e+37 }
 0x5f2   :  { %v1789_v7 = vor.u32 1.1754944e-38, %v1788_v58  ;;  %vm1787_vm11 = vcmp.eq.f32.partialorder %v1786_v53, 8.507059e+37  ;;  %v4736_v53 = vld [vmem:[#allocation38_spill] sm:$0xff] }
 0x5f3   :  { %v3421_v51 = vpop.eup %3420 }
 0x5f4   :  { %v1796_v34 = vadd.f32 1.0, %v3421_v51 }
 0x5f5   :  { %v3423_v6 = vpop.eup %3422 }
 0x5f6   :  { %v3425_v46 = vpop.eup %3424  ;;  %v1759_v11 = vmul.f32 %v3423_v6, %v1757_v50  ;;  %3426 = vrcp.f32 %v1796_v34  ;;  %vm1764_vm4 = vweird.f32 %v3423_v6  ;;  %vm1802_vm13 = vweird.f32 %v1796_v34 }
 0x5f7   :  { %v1778_v15 = vmul.f32 %v3425_v46, %v1776_v31  ;;  %3428 = vtanh.f32 %v1752_v1  ;;  %vm1783_vm5 = vweird.f32 %v3425_v46  ;;  %vm1765_vm8 = vmor %vm1763_vm6, %vm1764_vm4 }
 0x5f8   :  { %v1760_v44 = vsub.f32 1.0, %v1759_v11  ;;  %vm1784_vm9 = vmor %vm1782_vm7, %vm1783_vm5 }
 0x5f9   :  { %v1779_v28 = vsub.f32 1.0, %v1778_v15 }
 0x5fa   :  { %v1761_v43 = vmul.f32 %v3423_v6, %v1760_v44 }
 0x5fb   :  { %v1780_v57 = vmul.f32 %v3425_v46, %v1779_v28  ;;  %v1808_v28 = vand.u32 2147483648, %v1796_v34 }
 0x5fc   :  { %v3427_v19 = vpop.eup %3426  ;;  %v1762_v32 = vadd.f32 %v3423_v6, %v1761_v43 }
 0x5fd   :  { %v1781_v33 = vadd.f32 %v3425_v46, %v1780_v57  ;;  %v1798_v12 = vmul.f32 %v3427_v19, %v1796_v34  ;;  %v3429_v25 = vpop.eup %3428  ;;  %vm1803_vm12 = vweird.f32 %v3427_v19  ;;  %v1809_v58 = vor.u32 1.1754944e-38, %v1808_v28 }
 0x5fe   :  { %v1766_v20 = vsel %vm1765_vm8, %v3423_v6, %v1762_v32  ;;  %v1806_v6 = vand.u32 2147483647, %v1796_v34  ;;  %vm1804_vm14 = vmor %vm1802_vm13, %vm1803_vm12 }
 0x5ff   :  { %v1771_v51 = vsel %vm1768_vm10, %v1770_v36, %v1766_v20  ;;  %v1785_v56 = vsel %vm1784_vm9, %v3425_v46, %v1781_v33  ;;  %v1799_v38 = vsub.f32 1.0, %v1798_v12 }
 0x600   :  { %v1790_v1 = vsel %vm1787_vm11, %v1789_v7, %v1785_v56  ;;  %v1813_v11 = vmul.f32 %v3429_v25, %v1771_v51  ;;  %vm1807_vm15 = vcmp.eq.f32.partialorder %v1806_v6, 8.507059e+37  ;;  %v4737_v25 = vld [vmem:[#allocation40_spill] sm:$0xff] }
 0x601   :  { %v1812_v15 = vmul.f32 %v1790_v1, %v4286_v21  ;;  %v1800_v44 = vmul.f32 %v3427_v19, %v1799_v38  ;;  %v4735_v21 = vld [vmem:[#allocation37_spill] sm:$0xff]  ;;  %v511_v51 = vadd.f32 %v4737_v25, %v3996_v0 }
 0x602   :  { %v364_v34 = vadd.f32 %v4735_v21, %v3984_v24 }
 0x603   :  { %v4333_v50 = vadd.f32 %v1813_v11, %v1812_v15  ;;  %v1801_v31 = vadd.f32 %v3427_v19, %v1800_v44 }
 0x605   :  { %3430 = vtanh.f32 %v4333_v50  ;;  %v1805_v8 = vsel %vm1804_vm14, %v3427_v19, %v1801_v31  ;;  %v413_v19 = vadd.f32 %v4736_v53, %v3986_v29 }
 0x606   :  { %v1810_v43 = vsel %vm1807_vm15, %v1809_v58, %v1805_v8 }
 0x60b   :  { %v3431_v46 = vpop.eup %3430 }
 0x60c   :  { %v1816_v39 = vmul.f32 %v3431_v46, %v1810_v43 }
 0x60e   :  { %v1817_v57 = vpack.c.bf16 %v1816_v39, %v1816_v39  ;;  %v4738_v39 = vld [vmem:[#allocation39_spill] sm:$0xff] }
 0x610   :  { %3193 = vst [vmem:[%s4652_s4 + $0x1c] sm:$0xf] %v1817_v57  ;;  %1835 = vmatmul.bf16.vlgmr.msrb.gmra.mxu0 %v1817_v57  ;;  %1848 = vmatmul.bf16.vlgmr.msrb.gmra.mxu1 %v1817_v57 }
 0x611   :  { %1861 = vmatmul.bf16.vlgmr.msrb.gmra.mxu2 %v1817_v57  ;;  %1874 = vmatmul.bf16.vlgmr.msrb.gmra.mxu3 %v1817_v57  ;;  %v462_v57 = vadd.f32 %v4738_v39, %v4000_v5 }
 0x612   :  { %2085 = vmatpush.bf16.msrb.mxu0 %v3679_v37  ;;  %2098 = vmatpush.bf16.msrb.mxu1 %v3681_v41 }
 0x613   :  { %2111 = vmatpush.bf16.msrb.mxu2 %v3683_v47  ;;  %2124 = vmatpush.bf16.msrb.mxu3 %v3686_v48 }
 0x616   :  { %2086 = vmatpush.bf16.msrb.mxu0 %v3688_v49  ;;  %2099 = vmatpush.bf16.msrb.mxu1 %v3691_v52 }
 0x617   :  { %2112 = vmatpush.bf16.msrb.mxu2 %v3694_v55  ;;  %2125 = vmatpush.bf16.msrb.mxu3 %v3698_v59 }
 0x61a   :  { %2087 = vmatpush.bf16.msrb.mxu0 %v3700_v60  ;;  %2100 = vmatpush.bf16.msrb.mxu1 %v3703_v63 }
 0x61b   :  { %2113 = vmatpush.bf16.msrb.mxu2 %v3706_v3  ;;  %2126 = vmatpush.bf16.msrb.mxu3 %v3710_v4 }
 0x61e   :  { %2088 = vmatpush.bf16.msrb.mxu0 %v3718_v9  ;;  %2101 = vmatpush.bf16.msrb.mxu1 %v3720_v13 }
 0x61f   :  { %2114 = vmatpush.bf16.msrb.mxu2 %v3725_v17  ;;  %2127 = vmatpush.bf16.msrb.mxu3 %v3722_v14 }
 0x622   :  { %2089 = vmatpush.bf16.msrb.mxu0 %v3733_v22  ;;  %2102 = vmatpush.bf16.msrb.mxu1 %v3735_v26 }
 0x623   :  { %2115 = vmatpush.bf16.msrb.mxu2 %v3740_v30  ;;  %2128 = vmatpush.bf16.msrb.mxu3 %v3737_v27 }
 0x626   :  { %2090 = vmatpush.bf16.msrb.mxu0 %v3748_v35  ;;  %2103 = vmatpush.bf16.msrb.mxu1 %v3750_v40 }
 0x627   :  { %2116 = vmatpush.bf16.msrb.mxu2 %v3755_v45  ;;  %2129 = vmatpush.bf16.msrb.mxu3 %v3752_v42 }
 0x62a   :  { %2091 = vmatpush.bf16.msrb.mxu0 %v3763_v54  ;;  %2104 = vmatpush.bf16.msrb.mxu1 %v3765_v61 }
 0x62b   :  { %2117 = vmatpush.bf16.msrb.mxu2 %v3770_v2  ;;  %2130 = vmatpush.bf16.msrb.mxu3 %v3767_v62 }
 0x62e   :  { %2092 = vmatpush.bf16.msrb.mxu0 %v3778_v10  ;;  %2105 = vmatpush.bf16.msrb.mxu1 %v3780_v16 }
 0x62f   :  { %2118 = vmatpush.bf16.msrb.mxu2 %v3796_v23  ;;  %2131 = vmatpush.bf16.msrb.mxu3 %v3782_v18 }
 0x68d   :  { %v1836_v32 = vpop.f32.mrf.mxu0  ;;  %v1849_v36 = vpop.f32.mrf.mxu1 }
 0x68e   :  { %v1879_v33 = vadd.f32 %v1836_v32, %v364_v34  ;;  %v1880_v12 = vadd.f32 %v1849_v36, %v413_v19 }
 0x690   :  { %v3194_v7 = vmul.f32 -1.442695, %v1879_v33  ;;  %v3195_v20 = vmul.f32 -1.442695, %v1880_v12 }
 0x692   :  { %3432 = vpow2.f32 %v3194_v7 }
 0x693   :  { %3434 = vpow2.f32 %v3195_v20 }
 0x694   :  { %v1862_v56 = vpop.f32.mrf.mxu2  ;;  %v1875_v38 = vpop.f32.mrf.mxu3 }
 0x695   :  { %v1882_v1 = vadd.f32 %v1875_v38, %v511_v51  ;;  %v1838_v11 = vpop.f32.mrf.mxu0  ;;  %v1851_v15 = vpop.f32.mrf.mxu1  ;;  %v1881_v53 = vadd.f32 %v1862_v56, %v462_v57 }
 0x697   :  { %v3196_v44 = vmul.f32 -1.442695, %v1882_v1 }
 0x698   :  { %v3433_v31 = vpop.eup %3432 }
 0x699   :  { %v3435_v28 = vpop.eup %3434  ;;  %v1886_v6 = vadd.f32 1.0, %v3433_v31  ;;  %3436 = vpow2.f32 %v3196_v44 }
 0x69a   :  { %v1905_v8 = vadd.f32 1.0, %v3435_v28 }
 0x69b   :  { %3438 = vrcp.f32 %v1886_v6  ;;  %v1898_v7 = vand.u32 2147483648, %v1886_v6  ;;  %v1896_v51 = vand.u32 2147483647, %v1886_v6  ;;  %vm1892_vm2 = vweird.f32 %v1886_v6 }
 0x69c   :  { %3440 = vrcp.f32 %v1905_v8  ;;  %v1864_v58 = vpop.f32.mrf.mxu2  ;;  %v1877_v46 = vpop.f32.mrf.mxu3  ;;  %v1917_v20 = vand.u32 2147483648, %v1905_v8  ;;  %v1915_v1 = vand.u32 2147483647, %v1905_v8  ;;  %vm1911_vm3 = vweird.f32 %v1905_v8 }
 0x69d   :  { %v1899_v56 = vor.u32 1.1754944e-38, %v1898_v7  ;;  %vm1897_vm6 = vcmp.eq.f32.partialorder %v1896_v51, 8.507059e+37 }
 0x69e   :  { %v1918_v28 = vor.u32 1.1754944e-38, %v1917_v20  ;;  %vm1916_vm7 = vcmp.eq.f32.partialorder %v1915_v1, 8.507059e+37  ;;  %v4740_v1 = vld [vmem:[#allocation42_spill] sm:$0xff] }
 0x69f   :  { %v3437_v43 = vpop.eup %3436 }
 0x6a0   :  { %v1925_v21 = vadd.f32 1.0, %v3437_v43 }
 0x6a1   :  { %v3439_v34 = vpop.eup %3438 }
 0x6a2   :  { %v3441_v19 = vpop.eup %3440  ;;  %v1888_v32 = vmul.f32 %v3439_v34, %v1886_v6  ;;  %3442 = vrcp.f32 %v1925_v21  ;;  %vm1893_vm0 = vweird.f32 %v3439_v34  ;;  %vm1931_vm9 = vweird.f32 %v1925_v21 }
 0x6a3   :  { %v1907_v36 = vmul.f32 %v3441_v19, %v1905_v8  ;;  %3444 = vtanh.f32 %v1881_v53  ;;  %vm1912_vm1 = vweird.f32 %v3441_v19  ;;  %vm1894_vm4 = vmor %vm1892_vm2, %vm1893_vm0 }
 0x6a4   :  { %v1889_v33 = vsub.f32 1.0, %v1888_v32  ;;  %vm1913_vm5 = vmor %vm1911_vm3, %vm1912_vm1 }
 0x6a5   :  { %v1908_v12 = vsub.f32 1.0, %v1907_v36 }
 0x6a6   :  { %v1890_v25 = vmul.f32 %v3439_v34, %v1889_v33 }
 0x6a7   :  { %v1909_v38 = vmul.f32 %v3441_v19, %v1908_v12  ;;  %v1937_v12 = vand.u32 2147483648, %v1925_v21 }
 0x6a8   :  { %v3443_v11 = vpop.eup %3442  ;;  %v1891_v15 = vadd.f32 %v3439_v34, %v1890_v25 }
 0x6a9   :  { %v1910_v44 = vadd.f32 %v3441_v19, %v1909_v38  ;;  %v1927_v31 = vmul.f32 %v3443_v11, %v1925_v21  ;;  %v3445_v46 = vpop.eup %3444  ;;  %vm1932_vm8 = vweird.f32 %v3443_v11  ;;  %v1938_v20 = vor.u32 1.1754944e-38, %v1937_v12 }
 0x6aa   :  { %v1895_v58 = vsel %vm1894_vm4, %v3439_v34, %v1891_v15  ;;  %v1935_v34 = vand.u32 2147483647, %v1925_v21  ;;  %vm1933_vm10 = vmor %vm1931_vm9, %vm1932_vm8 }
 0x6ab   :  { %v1900_v43 = vsel %vm1897_vm6, %v1899_v56, %v1895_v58  ;;  %v1914_v39 = vsel %vm1913_vm5, %v3441_v19, %v1910_v44  ;;  %v1928_v57 = vsub.f32 1.0, %v1927_v31 }
 0x6ac   :  { %v1919_v53 = vsel %vm1916_vm7, %v1918_v28, %v1914_v39  ;;  %v1942_v32 = vmul.f32 %v3445_v46, %v1900_v43  ;;  %vm1936_vm11 = vcmp.eq.f32.partialorder %v1935_v34, 8.507059e+37  ;;  %v4741_v46 = vld [vmem:[#allocation44_spill] sm:$0xff] }
 0x6ad   :  { %v1941_v36 = vmul.f32 %v1919_v53, %v4333_v50  ;;  %v1929_v33 = vmul.f32 %v3443_v11, %v1928_v57  ;;  %v4739_v50 = vld [vmem:[#allocation41_spill] sm:$0xff]  ;;  %v513_v43 = vadd.f32 %v4741_v46, %v3996_v0 }
 0x6ae   :  { %v366_v21 = vadd.f32 %v4739_v50, %v3984_v24 }
 0x6af   :  { %v4380_v6 = vadd.f32 %v1942_v32, %v1941_v36  ;;  %v1930_v8 = vadd.f32 %v3443_v11, %v1929_v33 }
 0x6b1   :  { %3446 = vtanh.f32 %v4380_v6  ;;  %v1934_v7 = vsel %vm1933_vm10, %v3443_v11, %v1930_v8  ;;  %v415_v11 = vadd.f32 %v4740_v1, %v3986_v29 }
 0x6b2   :  { %v1939_v25 = vsel %vm1936_vm11, %v1938_v20, %v1934_v7 }
 0x6b7   :  { %v3447_v19 = vpop.eup %3446 }
 0x6b8   :  { %v1945_v51 = vmul.f32 %v3447_v19, %v1939_v25 }
 0x6ba   :  { %v1946_v38 = vpack.c.bf16 %v1945_v51, %v1945_v51  ;;  %v4742_v51 = vld [vmem:[#allocation43_spill] sm:$0xff] }
 0x6bc   :  { %3197 = vst [vmem:[%s4652_s4 + $0x20] sm:$0xf] %v1946_v38  ;;  %1964 = vmatmul.bf16.vlgmr.msra.gmra.mxu0 %v1946_v38  ;;  %1977 = vmatmul.bf16.vlgmr.msra.gmra.mxu1 %v1946_v38 }
 0x6bd   :  { %1990 = vmatmul.bf16.vlgmr.msra.gmra.mxu2 %v1946_v38  ;;  %2003 = vmatmul.bf16.vlgmr.msra.gmra.mxu3 %v1946_v38  ;;  %v464_v38 = vadd.f32 %v4742_v51, %v4000_v5 }
 0x6be   :  { %2214 = vmatpush.bf16.msra.mxu0 %v3679_v37  ;;  %2227 = vmatpush.bf16.msra.mxu1 %v3681_v41 }
 0x6bf   :  { %2240 = vmatpush.bf16.msra.mxu2 %v3683_v47  ;;  %2253 = vmatpush.bf16.msra.mxu3 %v3686_v48 }
 0x6c2   :  { %2215 = vmatpush.bf16.msra.mxu0 %v3688_v49  ;;  %2228 = vmatpush.bf16.msra.mxu1 %v3691_v52 }
 0x6c3   :  { %2241 = vmatpush.bf16.msra.mxu2 %v3694_v55  ;;  %2254 = vmatpush.bf16.msra.mxu3 %v3698_v59 }
 0x6c6   :  { %2216 = vmatpush.bf16.msra.mxu0 %v3700_v60  ;;  %2229 = vmatpush.bf16.msra.mxu1 %v3703_v63 }
 0x6c7   :  { %2242 = vmatpush.bf16.msra.mxu2 %v3706_v3  ;;  %2255 = vmatpush.bf16.msra.mxu3 %v3710_v4 }
 0x6ca   :  { %2217 = vmatpush.bf16.msra.mxu0 %v3718_v9  ;;  %2230 = vmatpush.bf16.msra.mxu1 %v3720_v13 }
 0x6cb   :  { %2243 = vmatpush.bf16.msra.mxu2 %v3725_v17  ;;  %2256 = vmatpush.bf16.msra.mxu3 %v3722_v14 }
 0x6ce   :  { %2218 = vmatpush.bf16.msra.mxu0 %v3733_v22  ;;  %2231 = vmatpush.bf16.msra.mxu1 %v3735_v26 }
 0x6cf   :  { %2244 = vmatpush.bf16.msra.mxu2 %v3740_v30  ;;  %2257 = vmatpush.bf16.msra.mxu3 %v3737_v27 }
 0x6d2   :  { %2219 = vmatpush.bf16.msra.mxu0 %v3748_v35  ;;  %2232 = vmatpush.bf16.msra.mxu1 %v3750_v40 }
 0x6d3   :  { %2245 = vmatpush.bf16.msra.mxu2 %v3755_v45  ;;  %2258 = vmatpush.bf16.msra.mxu3 %v3752_v42 }
 0x6d6   :  { %2220 = vmatpush.bf16.msra.mxu0 %v3763_v54  ;;  %2233 = vmatpush.bf16.msra.mxu1 %v3765_v61 }
 0x6d7   :  { %2246 = vmatpush.bf16.msra.mxu2 %v3770_v2  ;;  %2259 = vmatpush.bf16.msra.mxu3 %v3767_v62 }
 0x6da   :  { %2221 = vmatpush.bf16.msra.mxu0 %v3778_v10  ;;  %2234 = vmatpush.bf16.msra.mxu1 %v3780_v16 }
 0x6db   :  { %2247 = vmatpush.bf16.msra.mxu2 %v3796_v23  ;;  %2260 = vmatpush.bf16.msra.mxu3 %v3782_v18 }
 0x739   :  { %v1965_v15 = vpop.f32.mrf.mxu0  ;;  %v1978_v56 = vpop.f32.mrf.mxu1 }
 0x73a   :  { %v2008_v44 = vadd.f32 %v1965_v15, %v366_v21  ;;  %v2009_v31 = vadd.f32 %v1978_v56, %v415_v11 }
 0x73c   :  { %v3198_v28 = vmul.f32 -1.442695, %v2008_v44  ;;  %v3199_v58 = vmul.f32 -1.442695, %v2009_v31 }
 0x73e   :  { %3448 = vpow2.f32 %v3198_v28 }
 0x73f   :  { %3450 = vpow2.f32 %v3199_v58 }
 0x740   :  { %v1991_v39 = vpop.f32.mrf.mxu2  ;;  %v2004_v57 = vpop.f32.mrf.mxu3 }
 0x741   :  { %v2011_v53 = vadd.f32 %v2004_v57, %v513_v43  ;;  %v1967_v32 = vpop.f32.mrf.mxu0  ;;  %v1980_v36 = vpop.f32.mrf.mxu1  ;;  %v2010_v1 = vadd.f32 %v1991_v39, %v464_v38 }
 0x743   :  { %v3200_v33 = vmul.f32 -1.442695, %v2011_v53 }
 0x744   :  { %v3449_v8 = vpop.eup %3448 }
 0x745   :  { %v3451_v12 = vpop.eup %3450  ;;  %v2015_v34 = vadd.f32 1.0, %v3449_v8  ;;  %3452 = vpow2.f32 %v3200_v33 }
 0x746   :  { %v2034_v7 = vadd.f32 1.0, %v3451_v12 }
 0x747   :  { %3454 = vrcp.f32 %v2015_v34  ;;  %v2027_v28 = vand.u32 2147483648, %v2015_v34  ;;  %v2025_v43 = vand.u32 2147483647, %v2015_v34  ;;  %vm2021_vm14 = vweird.f32 %v2015_v34 }
 0x748   :  { %3456 = vrcp.f32 %v2034_v7  ;;  %v1993_v20 = vpop.f32.mrf.mxu2  ;;  %v2006_v19 = vpop.f32.mrf.mxu3  ;;  %v2046_v58 = vand.u32 2147483648, %v2034_v7  ;;  %v2044_v53 = vand.u32 2147483647, %v2034_v7  ;;  %vm2040_vm15 = vweird.f32 %v2034_v7 }
 0x749   :  { %v2028_v39 = vor.u32 1.1754944e-38, %v2027_v28  ;;  %vm2026_vm2 = vcmp.eq.f32.partialorder %v2025_v43, 8.507059e+37 }
 0x74a   :  { %v2047_v12 = vor.u32 1.1754944e-38, %v2046_v58  ;;  %vm2045_vm3 = vcmp.eq.f32.partialorder %v2044_v53, 8.507059e+37  ;;  %v4744_v53 = vld [vmem:[#allocation46_spill] sm:$0xff] }
 0x74b   :  { %v3453_v25 = vpop.eup %3452 }
 0x74c   :  { %v2054_v50 = vadd.f32 1.0, %v3453_v25 }
 0x74d   :  { %v3455_v21 = vpop.eup %3454 }
 0x74e   :  { %v3457_v11 = vpop.eup %3456  ;;  %v2017_v15 = vmul.f32 %v3455_v21, %v2015_v34  ;;  %3458 = vrcp.f32 %v2054_v50  ;;  %vm2022_vm12 = vweird.f32 %v3455_v21  ;;  %vm2060_vm5 = vweird.f32 %v2054_v50 }
 0x74f   :  { %v2036_v56 = vmul.f32 %v3457_v11, %v2034_v7  ;;  %3460 = vtanh.f32 %v2010_v1  ;;  %vm2041_vm13 = vweird.f32 %v3457_v11  ;;  %vm2023_vm0 = vmor %vm2021_vm14, %vm2022_vm12 }
 0x750   :  { %v2018_v44 = vsub.f32 1.0, %v2017_v15  ;;  %vm2042_vm1 = vmor %vm2040_vm15, %vm2041_vm13 }
 0x751   :  { %v2037_v31 = vsub.f32 1.0, %v2036_v56 }
 0x752   :  { %v2019_v46 = vmul.f32 %v3455_v21, %v2018_v44 }
 0x753   :  { %v2038_v57 = vmul.f32 %v3457_v11, %v2037_v31  ;;  %v2066_v31 = vand.u32 2147483648, %v2054_v50 }
 0x754   :  { %v3459_v32 = vpop.eup %3458  ;;  %v2020_v36 = vadd.f32 %v3455_v21, %v2019_v46 }
 0x755   :  { %v2039_v33 = vadd.f32 %v3457_v11, %v2038_v57  ;;  %v2056_v8 = vmul.f32 %v3459_v32, %v2054_v50  ;;  %v3461_v19 = vpop.eup %3460  ;;  %vm2061_vm4 = vweird.f32 %v3459_v32  ;;  %v2067_v58 = vor.u32 1.1754944e-38, %v2066_v31 }
 0x756   :  { %v2024_v20 = vsel %vm2023_vm0, %v3455_v21, %v2020_v36  ;;  %v2064_v21 = vand.u32 2147483647, %v2054_v50  ;;  %vm2062_vm6 = vmor %vm2060_vm5, %vm2061_vm4 }
 0x757   :  { %v2029_v25 = vsel %vm2026_vm2, %v2028_v39, %v2024_v20  ;;  %v2043_v51 = vsel %vm2042_vm1, %v3457_v11, %v2039_v33  ;;  %v2057_v38 = vsub.f32 1.0, %v2056_v8 }
 0x758   :  { %v2048_v1 = vsel %vm2045_vm3, %v2047_v12, %v2043_v51  ;;  %v2071_v15 = vmul.f32 %v3461_v19, %v2029_v25  ;;  %vm2065_vm7 = vcmp.eq.f32.partialorder %v2064_v21, 8.507059e+37  ;;  %v4745_v19 = vld [vmem:[#allocation48_spill] sm:$0xff] }
 0x759   :  { %v2070_v56 = vmul.f32 %v2048_v1, %v4380_v6  ;;  %v2058_v44 = vmul.f32 %v3459_v32, %v2057_v38  ;;  %v4743_v6 = vld [vmem:[#allocation45_spill] sm:$0xff]  ;;  %v516_v25 = vadd.f32 %v4745_v19, %v3996_v0 }
 0x75a   :  { %v369_v50 = vadd.f32 %v4743_v6, %v3984_v24 }
 0x75b   :  { %v4427_v34 = vadd.f32 %v2071_v15, %v2070_v56  ;;  %v2059_v7 = vadd.f32 %v3459_v32, %v2058_v44 }
 0x75d   :  { %3462 = vtanh.f32 %v4427_v34  ;;  %v2063_v28 = vsel %vm2062_vm6, %v3459_v32, %v2059_v7  ;;  %v418_v32 = vadd.f32 %v4744_v53, %v3986_v29 }
 0x75e   :  { %v2068_v46 = vsel %vm2065_vm7, %v2067_v58, %v2063_v28 }
 0x763   :  { %v3463_v11 = vpop.eup %3462 }
 0x764   :  { %v2074_v43 = vmul.f32 %v3463_v11, %v2068_v46 }
 0x766   :  { %v2075_v57 = vpack.c.bf16 %v2074_v43, %v2074_v43  ;;  %v4746_v43 = vld [vmem:[#allocation47_spill] sm:$0xff] }
 0x768   :  { %3201 = vst [vmem:[%s4652_s4 + $0x24] sm:$0xf] %v2075_v57  ;;  %2093 = vmatmul.bf16.vlgmr.msrb.gmra.mxu0 %v2075_v57  ;;  %2106 = vmatmul.bf16.vlgmr.msrb.gmra.mxu1 %v2075_v57 }
 0x769   :  { %2119 = vmatmul.bf16.vlgmr.msrb.gmra.mxu2 %v2075_v57  ;;  %2132 = vmatmul.bf16.vlgmr.msrb.gmra.mxu3 %v2075_v57  ;;  %v467_v57 = vadd.f32 %v4746_v43, %v4000_v5 }
 0x76a   :  { %2343 = vmatpush.bf16.msrb.mxu0 %v3679_v37  ;;  %2356 = vmatpush.bf16.msrb.mxu1 %v3681_v41 }
 0x76b   :  { %2369 = vmatpush.bf16.msrb.mxu2 %v3683_v47  ;;  %2382 = vmatpush.bf16.msrb.mxu3 %v3686_v48 }
 0x76e   :  { %2344 = vmatpush.bf16.msrb.mxu0 %v3688_v49  ;;  %2357 = vmatpush.bf16.msrb.mxu1 %v3691_v52 }
 0x76f   :  { %2370 = vmatpush.bf16.msrb.mxu2 %v3694_v55  ;;  %2383 = vmatpush.bf16.msrb.mxu3 %v3698_v59 }
 0x772   :  { %2345 = vmatpush.bf16.msrb.mxu0 %v3700_v60  ;;  %2358 = vmatpush.bf16.msrb.mxu1 %v3703_v63 }
 0x773   :  { %2371 = vmatpush.bf16.msrb.mxu2 %v3706_v3  ;;  %2384 = vmatpush.bf16.msrb.mxu3 %v3710_v4 }
 0x776   :  { %2346 = vmatpush.bf16.msrb.mxu0 %v3718_v9  ;;  %2359 = vmatpush.bf16.msrb.mxu1 %v3720_v13 }
 0x777   :  { %2372 = vmatpush.bf16.msrb.mxu2 %v3725_v17  ;;  %2385 = vmatpush.bf16.msrb.mxu3 %v3722_v14 }
 0x77a   :  { %2347 = vmatpush.bf16.msrb.mxu0 %v3733_v22  ;;  %2360 = vmatpush.bf16.msrb.mxu1 %v3735_v26 }
 0x77b   :  { %2373 = vmatpush.bf16.msrb.mxu2 %v3740_v30  ;;  %2386 = vmatpush.bf16.msrb.mxu3 %v3737_v27 }
 0x77e   :  { %2348 = vmatpush.bf16.msrb.mxu0 %v3748_v35  ;;  %2361 = vmatpush.bf16.msrb.mxu1 %v3750_v40 }
 0x77f   :  { %2374 = vmatpush.bf16.msrb.mxu2 %v3755_v45  ;;  %2387 = vmatpush.bf16.msrb.mxu3 %v3752_v42 }
 0x782   :  { %2349 = vmatpush.bf16.msrb.mxu0 %v3763_v54  ;;  %2362 = vmatpush.bf16.msrb.mxu1 %v3765_v61 }
 0x783   :  { %2375 = vmatpush.bf16.msrb.mxu2 %v3770_v2  ;;  %2388 = vmatpush.bf16.msrb.mxu3 %v3767_v62 }
 0x786   :  { %2350 = vmatpush.bf16.msrb.mxu0 %v3778_v10  ;;  %2363 = vmatpush.bf16.msrb.mxu1 %v3780_v16 }
 0x787   :  { %2376 = vmatpush.bf16.msrb.mxu2 %v3796_v23  ;;  %2389 = vmatpush.bf16.msrb.mxu3 %v3782_v18 }
 0x7e5   :  { %v2094_v36 = vpop.f32.mrf.mxu0  ;;  %v2107_v39 = vpop.f32.mrf.mxu1 }
 0x7e6   :  { %v2137_v33 = vadd.f32 %v2094_v36, %v369_v50  ;;  %v2138_v8 = vadd.f32 %v2107_v39, %v418_v32 }
 0x7e8   :  { %v3202_v12 = vmul.f32 -1.442695, %v2137_v33  ;;  %v3203_v20 = vmul.f32 -1.442695, %v2138_v8 }
 0x7ea   :  { %3464 = vpow2.f32 %v3202_v12 }
 0x7eb   :  { %3466 = vpow2.f32 %v3203_v20 }
 0x7ec   :  { %v2120_v51 = vpop.f32.mrf.mxu2  ;;  %v2133_v38 = vpop.f32.mrf.mxu3 }
 0x7ed   :  { %v2140_v1 = vadd.f32 %v2133_v38, %v516_v25  ;;  %v2096_v15 = vpop.f32.mrf.mxu0  ;;  %v2109_v56 = vpop.f32.mrf.mxu1  ;;  %v2139_v53 = vadd.f32 %v2120_v51, %v467_v57 }
 0x7ef   :  { %v3204_v44 = vmul.f32 -1.442695, %v2140_v1 }
 0x7f0   :  { %v3465_v7 = vpop.eup %3464 }
 0x7f1   :  { %v3467_v31 = vpop.eup %3466  ;;  %v2144_v21 = vadd.f32 1.0, %v3465_v7  ;;  %3468 = vpow2.f32 %v3204_v44 }
 0x7f2   :  { %v2163_v28 = vadd.f32 1.0, %v3467_v31 }
 0x7f3   :  { %3470 = vrcp.f32 %v2144_v21  ;;  %v2156_v12 = vand.u32 2147483648, %v2144_v21  ;;  %v2154_v25 = vand.u32 2147483647, %v2144_v21  ;;  %vm2150_vm10 = vweird.f32 %v2144_v21 }
 0x7f4   :  { %3472 = vrcp.f32 %v2163_v28  ;;  %v2122_v58 = vpop.f32.mrf.mxu2  ;;  %v2135_v11 = vpop.f32.mrf.mxu3  ;;  %v2175_v20 = vand.u32 2147483648, %v2163_v28  ;;  %v2173_v1 = vand.u32 2147483647, %v2163_v28  ;;  %vm2169_vm11 = vweird.f32 %v2163_v28 }
 0x7f5   :  { %v2157_v51 = vor.u32 1.1754944e-38, %v2156_v12  ;;  %vm2155_vm14 = vcmp.eq.f32.partialorder %v2154_v25, 8.507059e+37 }
 0x7f6   :  { %v2176_v31 = vor.u32 1.1754944e-38, %v2175_v20  ;;  %vm2174_vm15 = vcmp.eq.f32.partialorder %v2173_v1, 8.507059e+37  ;;  %v4748_v1 = vld [vmem:[#allocation50_spill] sm:$0xff] }
 0x7f7   :  { %v3469_v46 = vpop.eup %3468 }
 0x7f8   :  { %v2183_v6 = vadd.f32 1.0, %v3469_v46 }
 0x7f9   :  { %v3471_v50 = vpop.eup %3470 }
 0x7fa   :  { %v3473_v32 = vpop.eup %3472  ;;  %v2146_v36 = vmul.f32 %v3471_v50, %v2144_v21  ;;  %3474 = vrcp.f32 %v2183_v6  ;;  %vm2151_vm8 = vweird.f32 %v3471_v50  ;;  %vm2189_vm1 = vweird.f32 %v2183_v6 }
 0x7fb   :  { %v2165_v39 = vmul.f32 %v3473_v32, %v2163_v28  ;;  %3476 = vtanh.f32 %v2139_v53  ;;  %vm2170_vm9 = vweird.f32 %v3473_v32  ;;  %vm2152_vm12 = vmor %vm2150_vm10, %vm2151_vm8 }
 0x7fc   :  { %v2147_v33 = vsub.f32 1.0, %v2146_v36  ;;  %vm2171_vm13 = vmor %vm2169_vm11, %vm2170_vm9 }
 0x7fd   :  { %v2166_v8 = vsub.f32 1.0, %v2165_v39 }
 0x7fe   :  { %v2148_v19 = vmul.f32 %v3471_v50, %v2147_v33 }
 0x7ff   :  { %v2167_v38 = vmul.f32 %v3473_v32, %v2166_v8  ;;  %v2195_v8 = vand.u32 2147483648, %v2183_v6 }
 0x800   :  { %v3475_v15 = vpop.eup %3474  ;;  %v2149_v56 = vadd.f32 %v3471_v50, %v2148_v19 }
 0x801   :  { %v2168_v44 = vadd.f32 %v3473_v32, %v2167_v38  ;;  %v2185_v7 = vmul.f32 %v3475_v15, %v2183_v6  ;;  %v3477_v11 = vpop.eup %3476  ;;  %vm2190_vm0 = vweird.f32 %v3475_v15  ;;  %v2196_v20 = vor.u32 1.1754944e-38, %v2195_v8 }
 0x802   :  { %v2153_v58 = vsel %vm2152_vm12, %v3471_v50, %v2149_v56  ;;  %v2193_v50 = vand.u32 2147483647, %v2183_v6  ;;  %vm2191_vm2 = vmor %vm2189_vm1, %vm2190_vm0 }
 0x803   :  { %v2158_v46 = vsel %vm2155_vm14, %v2157_v51, %v2153_v58  ;;  %v2172_v43 = vsel %vm2171_vm13, %v3473_v32, %v2168_v44  ;;  %v2186_v57 = vsub.f32 1.0, %v2185_v7 }
 0x804   :  { %v2177_v53 = vsel %vm2174_vm15, %v2176_v31, %v2172_v43  ;;  %v2200_v36 = vmul.f32 %v3477_v11, %v2158_v46  ;;  %vm2194_vm3 = vcmp.eq.f32.partialorder %v2193_v50, 8.507059e+37  ;;  %v4749_v11 = vld [vmem:[#allocation52_spill] sm:$0xff] }
 0x805   :  { %v2199_v39 = vmul.f32 %v2177_v53, %v4427_v34  ;;  %v2187_v33 = vmul.f32 %v3475_v15, %v2186_v57  ;;  %v4747_v34 = vld [vmem:[#allocation49_spill] sm:$0xff]  ;;  %v518_v46 = vadd.f32 %v4749_v11, %v3996_v0 }
 0x806   :  { %v371_v6 = vadd.f32 %v4747_v34, %v3984_v24 }
 0x807   :  { %v4474_v21 = vadd.f32 %v2200_v36, %v2199_v39  ;;  %v2188_v28 = vadd.f32 %v3475_v15, %v2187_v33 }
 0x809   :  { %3478 = vtanh.f32 %v4474_v21  ;;  %v2192_v12 = vsel %vm2191_vm2, %v3475_v15, %v2188_v28  ;;  %v420_v15 = vadd.f32 %v4748_v1, %v3986_v29 }
 0x80a   :  { %v2197_v19 = vsel %vm2194_vm3, %v2196_v20, %v2192_v12 }
 0x80f   :  { %v3479_v32 = vpop.eup %3478 }
 0x810   :  { %v2203_v25 = vmul.f32 %v3479_v32, %v2197_v19 }
 0x812   :  { %v2204_v38 = vpack.c.bf16 %v2203_v25, %v2203_v25  ;;  %v4750_v25 = vld [vmem:[#allocation51_spill] sm:$0xff] }
 0x814   :  { %3205 = vst [vmem:[%s4652_s4 + $0x28] sm:$0xf] %v2204_v38  ;;  %2222 = vmatmul.bf16.vlgmr.msra.gmra.mxu0 %v2204_v38  ;;  %2235 = vmatmul.bf16.vlgmr.msra.gmra.mxu1 %v2204_v38 }
 0x815   :  { %2248 = vmatmul.bf16.vlgmr.msra.gmra.mxu2 %v2204_v38  ;;  %2261 = vmatmul.bf16.vlgmr.msra.gmra.mxu3 %v2204_v38  ;;  %v469_v38 = vadd.f32 %v4750_v25, %v4000_v5 }
 0x816   :  { %2472 = vmatpush.bf16.msra.mxu0 %v3679_v37  ;;  %2485 = vmatpush.bf16.msra.mxu1 %v3681_v41 }
 0x817   :  { %2498 = vmatpush.bf16.msra.mxu2 %v3683_v47  ;;  %2511 = vmatpush.bf16.msra.mxu3 %v3686_v48 }
 0x81a   :  { %2473 = vmatpush.bf16.msra.mxu0 %v3688_v49  ;;  %2486 = vmatpush.bf16.msra.mxu1 %v3691_v52 }
 0x81b   :  { %2499 = vmatpush.bf16.msra.mxu2 %v3694_v55  ;;  %2512 = vmatpush.bf16.msra.mxu3 %v3698_v59 }
 0x81e   :  { %2474 = vmatpush.bf16.msra.mxu0 %v3700_v60  ;;  %2487 = vmatpush.bf16.msra.mxu1 %v3703_v63 }
 0x81f   :  { %2500 = vmatpush.bf16.msra.mxu2 %v3706_v3  ;;  %2513 = vmatpush.bf16.msra.mxu3 %v3710_v4 }
 0x822   :  { %2475 = vmatpush.bf16.msra.mxu0 %v3718_v9  ;;  %2488 = vmatpush.bf16.msra.mxu1 %v3720_v13 }
 0x823   :  { %2501 = vmatpush.bf16.msra.mxu2 %v3725_v17  ;;  %2514 = vmatpush.bf16.msra.mxu3 %v3722_v14 }
 0x826   :  { %2476 = vmatpush.bf16.msra.mxu0 %v3733_v22  ;;  %2489 = vmatpush.bf16.msra.mxu1 %v3735_v26 }
 0x827   :  { %2502 = vmatpush.bf16.msra.mxu2 %v3740_v30  ;;  %2515 = vmatpush.bf16.msra.mxu3 %v3737_v27 }
 0x82a   :  { %2477 = vmatpush.bf16.msra.mxu0 %v3748_v35  ;;  %2490 = vmatpush.bf16.msra.mxu1 %v3750_v40 }
 0x82b   :  { %2503 = vmatpush.bf16.msra.mxu2 %v3755_v45  ;;  %2516 = vmatpush.bf16.msra.mxu3 %v3752_v42 }
 0x82e   :  { %2478 = vmatpush.bf16.msra.mxu0 %v3763_v54  ;;  %2491 = vmatpush.bf16.msra.mxu1 %v3765_v61 }
 0x82f   :  { %2504 = vmatpush.bf16.msra.mxu2 %v3770_v2  ;;  %2517 = vmatpush.bf16.msra.mxu3 %v3767_v62 }
 0x832   :  { %2479 = vmatpush.bf16.msra.mxu0 %v3778_v10  ;;  %2492 = vmatpush.bf16.msra.mxu1 %v3780_v16 }
 0x833   :  { %2505 = vmatpush.bf16.msra.mxu2 %v3796_v23  ;;  %2518 = vmatpush.bf16.msra.mxu3 %v3782_v18 }
 0x891   :  { %v2223_v56 = vpop.f32.mrf.mxu0  ;;  %v2236_v51 = vpop.f32.mrf.mxu1 }
 0x892   :  { %v2266_v44 = vadd.f32 %v2223_v56, %v371_v6  ;;  %v2267_v7 = vadd.f32 %v2236_v51, %v420_v15 }
 0x894   :  { %v3206_v31 = vmul.f32 -1.442695, %v2266_v44  ;;  %v3207_v58 = vmul.f32 -1.442695, %v2267_v7 }
 0x896   :  { %3480 = vpow2.f32 %v3206_v31 }
 0x897   :  { %3482 = vpow2.f32 %v3207_v58 }
 0x898   :  { %v2249_v43 = vpop.f32.mrf.mxu2  ;;  %v2262_v57 = vpop.f32.mrf.mxu3 }
 0x899   :  { %v2269_v53 = vadd.f32 %v2262_v57, %v518_v46  ;;  %v2225_v36 = vpop.f32.mrf.mxu0  ;;  %v2238_v39 = vpop.f32.mrf.mxu1  ;;  %v2268_v1 = vadd.f32 %v2249_v43, %v469_v38 }
 0x89b   :  { %v3208_v33 = vmul.f32 -1.442695, %v2269_v53 }
 0x89c   :  { %v3481_v28 = vpop.eup %3480 }
 0x89d   :  { %v3483_v8 = vpop.eup %3482  ;;  %v2273_v50 = vadd.f32 1.0, %v3481_v28  ;;  %3484 = vpow2.f32 %v3208_v33 }
 0x89e   :  { %v2292_v12 = vadd.f32 1.0, %v3483_v8 }
 0x89f   :  { %3486 = vrcp.f32 %v2273_v50  ;;  %v2285_v31 = vand.u32 2147483648, %v2273_v50  ;;  %v2283_v46 = vand.u32 2147483647, %v2273_v50  ;;  %vm2279_vm6 = vweird.f32 %v2273_v50 }
 0x8a0   :  { %3488 = vrcp.f32 %v2292_v12  ;;  %v2251_v20 = vpop.f32.mrf.mxu2  ;;  %v2264_v32 = vpop.f32.mrf.mxu3  ;;  %v2304_v58 = vand.u32 2147483648, %v2292_v12  ;;  %v2302_v53 = vand.u32 2147483647, %v2292_v12  ;;  %vm2298_vm7 = vweird.f32 %v2292_v12 }
 0x8a1   :  { %v2286_v43 = vor.u32 1.1754944e-38, %v2285_v31  ;;  %vm2284_vm10 = vcmp.eq.f32.partialorder %v2283_v46, 8.507059e+37 }
 0x8a2   :  { %v2305_v8 = vor.u32 1.1754944e-38, %v2304_v58  ;;  %vm2303_vm11 = vcmp.eq.f32.partialorder %v2302_v53, 8.507059e+37  ;;  %v4752_v53 = vld [vmem:[#allocation54_spill] sm:$0xff] }
 0x8a3   :  { %v3485_v19 = vpop.eup %3484 }
 0x8a4   :  { %v2312_v34 = vadd.f32 1.0, %v3485_v19 }
 0x8a5   :  { %v3487_v6 = vpop.eup %3486 }
 0x8a6   :  { %v3489_v15 = vpop.eup %3488  ;;  %v2275_v56 = vmul.f32 %v3487_v6, %v2273_v50  ;;  %3490 = vrcp.f32 %v2312_v34  ;;  %vm2280_vm4 = vweird.f32 %v3487_v6  ;;  %vm2318_vm13 = vweird.f32 %v2312_v34 }
 0x8a7   :  { %v2294_v51 = vmul.f32 %v3489_v15, %v2292_v12  ;;  %3492 = vtanh.f32 %v2268_v1  ;;  %vm2299_vm5 = vweird.f32 %v3489_v15  ;;  %vm2281_vm8 = vmor %vm2279_vm6, %vm2280_vm4 }
 0x8a8   :  { %v2276_v44 = vsub.f32 1.0, %v2275_v56  ;;  %vm2300_vm9 = vmor %vm2298_vm7, %vm2299_vm5 }
 0x8a9   :  { %v2295_v7 = vsub.f32 1.0, %v2294_v51 }
 0x8aa   :  { %v2277_v11 = vmul.f32 %v3487_v6, %v2276_v44 }
 0x8ab   :  { %v2296_v57 = vmul.f32 %v3489_v15, %v2295_v7  ;;  %v2324_v7 = vand.u32 2147483648, %v2312_v34 }
 0x8ac   :  { %v3491_v36 = vpop.eup %3490  ;;  %v2278_v39 = vadd.f32 %v3487_v6, %v2277_v11 }
 0x8ad   :  { %v2297_v33 = vadd.f32 %v3489_v15, %v2296_v57  ;;  %v2314_v28 = vmul.f32 %v3491_v36, %v2312_v34  ;;  %v3493_v32 = vpop.eup %3492  ;;  %vm2319_vm12 = vweird.f32 %v3491_v36  ;;  %v2325_v58 = vor.u32 1.1754944e-38, %v2324_v7 }
 0x8ae   :  { %v2282_v20 = vsel %vm2281_vm8, %v3487_v6, %v2278_v39  ;;  %v2322_v6 = vand.u32 2147483647, %v2312_v34  ;;  %vm2320_vm14 = vmor %vm2318_vm13, %vm2319_vm12 }
 0x8af   :  { %v2287_v19 = vsel %vm2284_vm10, %v2286_v43, %v2282_v20  ;;  %v2301_v25 = vsel %vm2300_vm9, %v3489_v15, %v2297_v33  ;;  %v2315_v38 = vsub.f32 1.0, %v2314_v28 }
 0x8b0   :  { %v2306_v1 = vsel %vm2303_vm11, %v2305_v8, %v2301_v25  ;;  %v2329_v56 = vmul.f32 %v3493_v32, %v2287_v19  ;;  %vm2323_vm15 = vcmp.eq.f32.partialorder %v2322_v6, 8.507059e+37  ;;  %v4753_v32 = vld [vmem:[#allocation56_spill] sm:$0xff] }
 0x8b1   :  { %v2328_v51 = vmul.f32 %v2306_v1, %v4474_v21  ;;  %v2316_v44 = vmul.f32 %v3491_v36, %v2315_v38  ;;  %v4751_v21 = vld [vmem:[#allocation53_spill] sm:$0xff]  ;;  %v521_v19 = vadd.f32 %v4753_v32, %v3996_v0 }
 0x8b2   :  { %v374_v34 = vadd.f32 %v4751_v21, %v3984_v24 }
 0x8b3   :  { %v4521_v50 = vadd.f32 %v2329_v56, %v2328_v51  ;;  %v2317_v12 = vadd.f32 %v3491_v36, %v2316_v44 }
 0x8b5   :  { %3494 = vtanh.f32 %v4521_v50  ;;  %v2321_v31 = vsel %vm2320_vm14, %v3491_v36, %v2317_v12  ;;  %v423_v36 = vadd.f32 %v4752_v53, %v3986_v29 }
 0x8b6   :  { %v2326_v11 = vsel %vm2323_vm15, %v2325_v58, %v2321_v31 }
 0x8bb   :  { %v3495_v15 = vpop.eup %3494 }
 0x8bc   :  { %v2332_v46 = vmul.f32 %v3495_v15, %v2326_v11 }
 0x8be   :  { %v2333_v57 = vpack.c.bf16 %v2332_v46, %v2332_v46  ;;  %v4754_v46 = vld [vmem:[#allocation55_spill] sm:$0xff] }
 0x8c0   :  { %3209 = vst [vmem:[%s4652_s4 + $0x2c] sm:$0xf] %v2333_v57  ;;  %2351 = vmatmul.bf16.vlgmr.msrb.gmra.mxu0 %v2333_v57  ;;  %2364 = vmatmul.bf16.vlgmr.msrb.gmra.mxu1 %v2333_v57 }
 0x8c1   :  { %2377 = vmatmul.bf16.vlgmr.msrb.gmra.mxu2 %v2333_v57  ;;  %2390 = vmatmul.bf16.vlgmr.msrb.gmra.mxu3 %v2333_v57  ;;  %v472_v57 = vadd.f32 %v4754_v46, %v4000_v5 }
 0x8c2   :  { %2601 = vmatpush.bf16.msrb.mxu0 %v3679_v37  ;;  %2614 = vmatpush.bf16.msrb.mxu1 %v3681_v41 }
 0x8c3   :  { %2627 = vmatpush.bf16.msrb.mxu2 %v3683_v47  ;;  %2640 = vmatpush.bf16.msrb.mxu3 %v3686_v48 }
 0x8c6   :  { %2602 = vmatpush.bf16.msrb.mxu0 %v3688_v49  ;;  %2615 = vmatpush.bf16.msrb.mxu1 %v3691_v52 }
 0x8c7   :  { %2628 = vmatpush.bf16.msrb.mxu2 %v3694_v55  ;;  %2641 = vmatpush.bf16.msrb.mxu3 %v3698_v59 }
 0x8ca   :  { %2603 = vmatpush.bf16.msrb.mxu0 %v3700_v60  ;;  %2616 = vmatpush.bf16.msrb.mxu1 %v3703_v63 }
 0x8cb   :  { %2629 = vmatpush.bf16.msrb.mxu2 %v3706_v3  ;;  %2642 = vmatpush.bf16.msrb.mxu3 %v3710_v4 }
 0x8ce   :  { %2604 = vmatpush.bf16.msrb.mxu0 %v3718_v9  ;;  %2617 = vmatpush.bf16.msrb.mxu1 %v3720_v13 }
 0x8cf   :  { %2630 = vmatpush.bf16.msrb.mxu2 %v3725_v17  ;;  %2643 = vmatpush.bf16.msrb.mxu3 %v3722_v14 }
 0x8d2   :  { %2605 = vmatpush.bf16.msrb.mxu0 %v3733_v22  ;;  %2618 = vmatpush.bf16.msrb.mxu1 %v3735_v26 }
 0x8d3   :  { %2631 = vmatpush.bf16.msrb.mxu2 %v3740_v30  ;;  %2644 = vmatpush.bf16.msrb.mxu3 %v3737_v27 }
 0x8d6   :  { %2606 = vmatpush.bf16.msrb.mxu0 %v3748_v35  ;;  %2619 = vmatpush.bf16.msrb.mxu1 %v3750_v40 }
 0x8d7   :  { %2632 = vmatpush.bf16.msrb.mxu2 %v3755_v45  ;;  %2645 = vmatpush.bf16.msrb.mxu3 %v3752_v42 }
 0x8da   :  { %2607 = vmatpush.bf16.msrb.mxu0 %v3763_v54  ;;  %2620 = vmatpush.bf16.msrb.mxu1 %v3765_v61 }
 0x8db   :  { %2633 = vmatpush.bf16.msrb.mxu2 %v3770_v2  ;;  %2646 = vmatpush.bf16.msrb.mxu3 %v3767_v62 }
 0x8de   :  { %2608 = vmatpush.bf16.msrb.mxu0 %v3778_v10  ;;  %2621 = vmatpush.bf16.msrb.mxu1 %v3780_v16 }
 0x8df   :  { %2634 = vmatpush.bf16.msrb.mxu2 %v3796_v23  ;;  %2647 = vmatpush.bf16.msrb.mxu3 %v3782_v18 }
 0x93d   :  { %v2352_v39 = vpop.f32.mrf.mxu0  ;;  %v2365_v43 = vpop.f32.mrf.mxu1 }
 0x93e   :  { %v2395_v33 = vadd.f32 %v2352_v39, %v374_v34  ;;  %v2396_v28 = vadd.f32 %v2365_v43, %v423_v36 }
 0x940   :  { %v3210_v8 = vmul.f32 -1.442695, %v2395_v33  ;;  %v3211_v20 = vmul.f32 -1.442695, %v2396_v28 }
 0x942   :  { %3496 = vpow2.f32 %v3210_v8 }
 0x943   :  { %3498 = vpow2.f32 %v3211_v20 }
 0x944   :  { %v2378_v25 = vpop.f32.mrf.mxu2  ;;  %v2391_v38 = vpop.f32.mrf.mxu3 }
 0x945   :  { %v2398_v1 = vadd.f32 %v2391_v38, %v521_v19  ;;  %v2354_v56 = vpop.f32.mrf.mxu0  ;;  %v2367_v51 = vpop.f32.mrf.mxu1  ;;  %v2397_v53 = vadd.f32 %v2378_v25, %v472_v57 }
 0x947   :  { %v3212_v44 = vmul.f32 -1.442695, %v2398_v1 }
 0x948   :  { %v3497_v12 = vpop.eup %3496 }
 0x949   :  { %v3499_v7 = vpop.eup %3498  ;;  %v2402_v6 = vadd.f32 1.0, %v3497_v12  ;;  %3500 = vpow2.f32 %v3212_v44 }
 0x94a   :  { %v2421_v31 = vadd.f32 1.0, %v3499_v7 }
 0x94b   :  { %3502 = vrcp.f32 %v2402_v6  ;;  %v2414_v8 = vand.u32 2147483648, %v2402_v6  ;;  %v2412_v19 = vand.u32 2147483647, %v2402_v6  ;;  %vm2408_vm2 = vweird.f32 %v2402_v6 }
 0x94c   :  { %3504 = vrcp.f32 %v2421_v31  ;;  %v2380_v58 = vpop.f32.mrf.mxu2  ;;  %v2393_v15 = vpop.f32.mrf.mxu3  ;;  %v2433_v20 = vand.u32 2147483648, %v2421_v31  ;;  %v2431_v1 = vand.u32 2147483647, %v2421_v31  ;;  %vm2427_vm3 = vweird.f32 %v2421_v31 }
 0x94d   :  { %v2415_v25 = vor.u32 1.1754944e-38, %v2414_v8  ;;  %vm2413_vm6 = vcmp.eq.f32.partialorder %v2412_v19, 8.507059e+37 }
 0x94e   :  { %v2434_v7 = vor.u32 1.1754944e-38, %v2433_v20  ;;  %vm2432_vm7 = vcmp.eq.f32.partialorder %v2431_v1, 8.507059e+37 }
 0x94f   :  { %v3501_v11 = vpop.eup %3500 }
 0x950   :  { %v2441_v21 = vadd.f32 1.0, %v3501_v11 }
 0x951   :  { %v3503_v34 = vpop.eup %3502 }
 0x952   :  { %v3505_v36 = vpop.eup %3504  ;;  %v2404_v39 = vmul.f32 %v3503_v34, %v2402_v6  ;;  %3506 = vrcp.f32 %v2441_v21  ;;  %vm2409_vm0 = vweird.f32 %v3503_v34  ;;  %vm2447_vm9 = vweird.f32 %v2441_v21 }
 0x953   :  { %v2423_v43 = vmul.f32 %v3505_v36, %v2421_v31  ;;  %3508 = vtanh.f32 %v2397_v53  ;;  %vm2428_vm1 = vweird.f32 %v3505_v36  ;;  %vm2410_vm4 = vmor %vm2408_vm2, %vm2409_vm0 }
 0x954   :  { %v2405_v33 = vsub.f32 1.0, %v2404_v39  ;;  %vm2429_vm5 = vmor %vm2427_vm3, %vm2428_vm1 }
 0x955   :  { %v2424_v28 = vsub.f32 1.0, %v2423_v43 }
 0x956   :  { %v2406_v32 = vmul.f32 %v3503_v34, %v2405_v33 }
 0x957   :  { %v2425_v38 = vmul.f32 %v3505_v36, %v2424_v28  ;;  %v2453_v28 = vand.u32 2147483648, %v2441_v21 }
 0x958   :  { %v3507_v56 = vpop.eup %3506  ;;  %v2407_v51 = vadd.f32 %v3503_v34, %v2406_v32 }
 0x959   :  { %v2426_v44 = vadd.f32 %v3505_v36, %v2425_v38  ;;  %v2443_v12 = vmul.f32 %v3507_v56, %v2441_v21  ;;  %v3509_v15 = vpop.eup %3508  ;;  %vm2448_vm8 = vweird.f32 %v3507_v56  ;;  %v2454_v20 = vor.u32 1.1754944e-38, %v2453_v28 }
 0x95a   :  { %v2411_v58 = vsel %vm2410_vm4, %v3503_v34, %v2407_v51  ;;  %v2451_v34 = vand.u32 2147483647, %v2441_v21  ;;  %vm2449_vm10 = vmor %vm2447_vm9, %vm2448_vm8 }
 0x95b   :  { %v2416_v11 = vsel %vm2413_vm6, %v2415_v25, %v2411_v58  ;;  %v2430_v46 = vsel %vm2429_vm5, %v3505_v36, %v2426_v44  ;;  %v2444_v57 = vsub.f32 1.0, %v2443_v12 }
 0x95c   :  { %v2435_v53 = vsel %vm2432_vm7, %v2434_v7, %v2430_v46  ;;  %v2458_v39 = vmul.f32 %v3509_v15, %v2416_v11  ;;  %vm2452_vm11 = vcmp.eq.f32.partialorder %v2451_v34, 8.507059e+37 }
 0x95d   :  { %v2457_v43 = vmul.f32 %v2435_v53, %v4521_v50  ;;  %v2445_v33 = vmul.f32 %v3507_v56, %v2444_v57 }
 0x95f   :  { %v4568_v6 = vadd.f32 %v2458_v39, %v2457_v43  ;;  %v2446_v31 = vadd.f32 %v3507_v56, %v2445_v33 }
 0x961   :  { %3510 = vtanh.f32 %v4568_v6  ;;  %v2450_v8 = vsel %vm2449_vm10, %v3507_v56, %v2446_v31 }
 0x962   :  { %v2455_v32 = vsel %vm2452_vm11, %v2454_v20, %v2450_v8 }
 0x967   :  { %v3511_v36 = vpop.eup %3510 }
 0x968   :  { %v2461_v19 = vmul.f32 %v3511_v36, %v2455_v32 }
 0x96a   :  { %v2462_v38 = vpack.c.bf16 %v2461_v19, %v2461_v19 }
 0x96c   :  { %3213 = vst [vmem:[%s4652_s4 + $0x30] sm:$0xf] %v2462_v38  ;;  %2480 = vmatmul.bf16.vlgmr.msra.gmra.mxu0 %v2462_v38  ;;  %2493 = vmatmul.bf16.vlgmr.msra.gmra.mxu1 %v2462_v38 }
 0x96d   :  { %2506 = vmatmul.bf16.vlgmr.msra.gmra.mxu2 %v2462_v38  ;;  %2519 = vmatmul.bf16.vlgmr.msra.gmra.mxu3 %v2462_v38 }
 0x96e   :  { %2730 = vmatpush.bf16.msra.mxu0 %v3679_v37  ;;  %2743 = vmatpush.bf16.msra.mxu1 %v3681_v41  ;;  %v4755_v37 = vld [vmem:[#allocation57_spill] sm:$0xff] }
 0x96f   :  { %2756 = vmatpush.bf16.msra.mxu2 %v3683_v47  ;;  %2769 = vmatpush.bf16.msra.mxu3 %v3686_v48  ;;  %v376_v41 = vadd.f32 %v4755_v37, %v3984_v24  ;;  %v4756_v47 = vld [vmem:[#allocation58_spill] sm:$0xff] }
 0x970   :  { %v425_v48 = vadd.f32 %v4756_v47, %v3986_v29 }
 0x972   :  { %2731 = vmatpush.bf16.msra.mxu0 %v3688_v49  ;;  %2744 = vmatpush.bf16.msra.mxu1 %v3691_v52 }
 0x973   :  { %2757 = vmatpush.bf16.msra.mxu2 %v3694_v55  ;;  %2770 = vmatpush.bf16.msra.mxu3 %v3698_v59 }
 0x976   :  { %2732 = vmatpush.bf16.msra.mxu0 %v3700_v60  ;;  %2745 = vmatpush.bf16.msra.mxu1 %v3703_v63 }
 0x977   :  { %2758 = vmatpush.bf16.msra.mxu2 %v3706_v3  ;;  %2771 = vmatpush.bf16.msra.mxu3 %v3710_v4  ;;  %v4757_v3 = vld [vmem:[#allocation60_spill] sm:$0xff] }
 0x978   :  { %v523_v4 = vadd.f32 %v4757_v3, %v3996_v0 }
 0x97a   :  { %2733 = vmatpush.bf16.msra.mxu0 %v3718_v9  ;;  %2746 = vmatpush.bf16.msra.mxu1 %v3720_v13 }
 0x97b   :  { %2759 = vmatpush.bf16.msra.mxu2 %v3725_v17  ;;  %2772 = vmatpush.bf16.msra.mxu3 %v3722_v14 }
 0x97e   :  { %2734 = vmatpush.bf16.msra.mxu0 %v3733_v22  ;;  %2747 = vmatpush.bf16.msra.mxu1 %v3735_v26 }
 0x97f   :  { %2760 = vmatpush.bf16.msra.mxu2 %v3740_v30  ;;  %2773 = vmatpush.bf16.msra.mxu3 %v3737_v27 }
 0x982   :  { %2735 = vmatpush.bf16.msra.mxu0 %v3748_v35  ;;  %2748 = vmatpush.bf16.msra.mxu1 %v3750_v40 }
 0x983   :  { %2761 = vmatpush.bf16.msra.mxu2 %v3755_v45  ;;  %2774 = vmatpush.bf16.msra.mxu3 %v3752_v42 }
 0x986   :  { %2736 = vmatpush.bf16.msra.mxu0 %v3763_v54  ;;  %2749 = vmatpush.bf16.msra.mxu1 %v3765_v61  ;;  %v4758_v61 = vld [vmem:[#allocation59_spill] sm:$0xff] }
 0x987   :  { %2762 = vmatpush.bf16.msra.mxu2 %v3770_v2  ;;  %2775 = vmatpush.bf16.msra.mxu3 %v3767_v62  ;;  %v474_v62 = vadd.f32 %v4758_v61, %v4000_v5 }
 0x98a   :  { %2737 = vmatpush.bf16.msra.mxu0 %v3778_v10  ;;  %2750 = vmatpush.bf16.msra.mxu1 %v3780_v16 }
 0x98b   :  { %2763 = vmatpush.bf16.msra.mxu2 %v3796_v23  ;;  %2776 = vmatpush.bf16.msra.mxu3 %v3782_v18 }
 0x9e9   :  { %v2481_v49 = vpop.f32.mrf.mxu0  ;;  %v2494_v52 = vpop.f32.mrf.mxu1 }
 0x9ea   :  { %v2524_v55 = vadd.f32 %v2481_v49, %v376_v41  ;;  %v2525_v59 = vadd.f32 %v2494_v52, %v425_v48 }
 0x9ec   :  { %v3214_v60 = vmul.f32 -1.442695, %v2524_v55  ;;  %v3215_v63 = vmul.f32 -1.442695, %v2525_v59 }
 0x9ee   :  { %3512 = vpow2.f32 %v3214_v60  ;;  %v4760_v60 = vld [vmem:[#allocation62_spill] sm:$0xff] }
 0x9ef   :  { %3514 = vpow2.f32 %v3215_v63  ;;  %v428_v63 = vadd.f32 %v4760_v60, %v3986_v29 }
 0x9f0   :  { %v2507_v9 = vpop.f32.mrf.mxu2  ;;  %v2520_v13 = vpop.f32.mrf.mxu3 }
 0x9f1   :  { %v2527_v14 = vadd.f32 %v2520_v13, %v523_v4  ;;  %v2483_v17 = vpop.f32.mrf.mxu0  ;;  %v2496_v22 = vpop.f32.mrf.mxu1  ;;  %v2526_v16 = vadd.f32 %v2507_v9, %v474_v62 }
 0x9f2   :  { %v4761_v22 = vld [vmem:[#allocation64_spill] sm:$0xff] }
 0x9f3   :  { %v3216_v26 = vmul.f32 -1.442695, %v2527_v14 }
 0x9f4   :  { %v3513_v27 = vpop.eup %3512 }
 0x9f5   :  { %v3515_v30 = vpop.eup %3514  ;;  %v2531_v35 = vadd.f32 1.0, %v3513_v27  ;;  %3516 = vpow2.f32 %v3216_v26  ;;  %v526_v26 = vadd.f32 %v4761_v22, %v3996_v0 }
 0x9f6   :  { %v2550_v40 = vadd.f32 1.0, %v3515_v30 }
 0x9f7   :  { %3518 = vrcp.f32 %v2531_v35  ;;  %v2543_v56 = vand.u32 2147483648, %v2531_v35  ;;  %v2541_v44 = vand.u32 2147483647, %v2531_v35  ;;  %vm2537_vm14 = vweird.f32 %v2531_v35 }
 0x9f8   :  { %3520 = vrcp.f32 %v2550_v40  ;;  %v2509_v42 = vpop.f32.mrf.mxu2  ;;  %v2522_v45 = vpop.f32.mrf.mxu3  ;;  %v2562_v51 = vand.u32 2147483648, %v2550_v40  ;;  %v2560_v7 = vand.u32 2147483647, %v2550_v40  ;;  %vm2556_vm15 = vweird.f32 %v2550_v40 }
 0x9f9   :  { %v2544_v11 = vor.u32 1.1754944e-38, %v2543_v56  ;;  %vm2542_vm2 = vcmp.eq.f32.partialorder %v2541_v44, 8.507059e+37 }
 0x9fa   :  { %v2563_v53 = vor.u32 1.1754944e-38, %v2562_v51  ;;  %vm2561_vm3 = vcmp.eq.f32.partialorder %v2560_v7, 8.507059e+37 }
 0x9fb   :  { %v3517_v54 = vpop.eup %3516 }
 0x9fc   :  { %v2570_v2 = vadd.f32 1.0, %v3517_v54 }
 0x9fd   :  { %v3519_v10 = vpop.eup %3518 }
 0x9fe   :  { %v3521_v18 = vpop.eup %3520  ;;  %v2533_v23 = vmul.f32 %v3519_v10, %v2531_v35  ;;  %3522 = vrcp.f32 %v2570_v2  ;;  %vm2538_vm12 = vweird.f32 %v3519_v10  ;;  %v2582_v38 = vand.u32 2147483648, %v2570_v2 }
 0x9ff   :  { %v2552_v50 = vmul.f32 %v3521_v18, %v2550_v40  ;;  %3524 = vtanh.f32 %v2526_v16  ;;  %vm2557_vm13 = vweird.f32 %v3521_v18  ;;  %vm2539_vm0 = vmor %vm2537_vm14, %vm2538_vm12  ;;  %vm2576_vm5 = vweird.f32 %v2570_v2 }
 0xa00   :  { %v2534_v21 = vsub.f32 1.0, %v2533_v23  ;;  %vm2558_vm1 = vmor %vm2556_vm15, %vm2557_vm13  ;;  %v2580_v37 = vand.u32 2147483647, %v2570_v2  ;;  %v2583_v47 = vor.u32 1.1754944e-38, %v2582_v38  ;;  %v4762_v23 = vld [vmem:[#allocation63_spill] sm:$0xff] }
 0xa01   :  { %v2553_v1 = vsub.f32 1.0, %v2552_v50  ;;  %v477_v50 = vadd.f32 %v4762_v23, %v4000_v5 }
 0xa02   :  { %v2535_v25 = vmul.f32 %v3519_v10, %v2534_v21  ;;  %vm2581_vm7 = vcmp.eq.f32.partialorder %v2580_v37, 8.507059e+37 }
 0xa03   :  { %v2554_v12 = vmul.f32 %v3521_v18, %v2553_v1 }
 0xa04   :  { %v3523_v58 = vpop.eup %3522  ;;  %v2536_v15 = vadd.f32 %v3519_v10, %v2535_v25 }
 0xa05   :  { %v2555_v46 = vadd.f32 %v3521_v18, %v2554_v12  ;;  %v2572_v57 = vmul.f32 %v3523_v58, %v2570_v2  ;;  %v3525_v43 = vpop.eup %3524  ;;  %vm2577_vm4 = vweird.f32 %v3523_v58 }
 0xa06   :  { %v2540_v39 = vsel %vm2539_vm0, %v3519_v10, %v2536_v15  ;;  %vm2578_vm6 = vmor %vm2576_vm5, %vm2577_vm4 }
 0xa07   :  { %v2545_v33 = vsel %vm2542_vm2, %v2544_v11, %v2540_v39  ;;  %v2559_v31 = vsel %vm2558_vm1, %v3521_v18, %v2555_v46  ;;  %v2573_v28 = vsub.f32 1.0, %v2572_v57 }
 0xa08   :  { %v2564_v34 = vsel %vm2561_vm3, %v2563_v53, %v2559_v31  ;;  %v2587_v8 = vmul.f32 %v3525_v43, %v2545_v33 }
 0xa09   :  { %v2586_v20 = vmul.f32 %v2564_v34, %v4568_v6  ;;  %v2574_v36 = vmul.f32 %v3523_v58, %v2573_v28  ;;  %v4759_v6 = vld [vmem:[#allocation61_spill] sm:$0xff] }
 0xa0a   :  { %v379_v59 = vadd.f32 %v4759_v6, %v3984_v24 }
 0xa0b   :  { %v4615_v32 = vadd.f32 %v2587_v8, %v2586_v20  ;;  %v2575_v19 = vadd.f32 %v3523_v58, %v2574_v36 }
 0xa0d   :  { %3526 = vtanh.f32 %v4615_v32  ;;  %v2579_v41 = vsel %vm2578_vm6, %v3523_v58, %v2575_v19 }
 0xa0e   :  { %v2584_v49 = vsel %vm2581_vm7, %v2583_v47, %v2579_v41 }
 0xa13   :  { %v3527_v48 = vpop.eup %3526 }
 0xa14   :  { %v2590_v52 = vmul.f32 %v3527_v48, %v2584_v49 }
 0xa16   :  { %v2591_v55 = vpack.c.bf16 %v2590_v52, %v2590_v52 }
 0xa18   :  { %3217 = vst [vmem:[%s4652_s4 + $0x34] sm:$0xf] %v2591_v55  ;;  %2609 = vmatmul.bf16.vlgmr.msrb.gmra.mxu0 %v2591_v55  ;;  %2622 = vmatmul.bf16.vlgmr.msrb.gmra.mxu1 %v2591_v55 }
 0xa19   :  { %2635 = vmatmul.bf16.vlgmr.msrb.gmra.mxu2 %v2591_v55  ;;  %2648 = vmatmul.bf16.vlgmr.msrb.gmra.mxu3 %v2591_v55 }
 0xa95   :  { %v2610_v3 = vpop.f32.mrf.mxu0  ;;  %v2623_v4 = vpop.f32.mrf.mxu1 }
 0xa96   :  { %v2653_v9 = vadd.f32 %v2610_v3, %v379_v59  ;;  %v2654_v13 = vadd.f32 %v2623_v4, %v428_v63 }
 0xa98   :  { %v3218_v14 = vmul.f32 -1.442695, %v2653_v9  ;;  %v3219_v17 = vmul.f32 -1.442695, %v2654_v13 }
 0xa9a   :  { %3528 = vpow2.f32 %v3218_v14  ;;  %v4764_v14 = vld [vmem:[#allocation66_spill] sm:$0xff] }
 0xa9b   :  { %3530 = vpow2.f32 %v3219_v17  ;;  %v430_v17 = vadd.f32 %v4764_v14, %v3986_v29 }
 0xa9c   :  { %v2636_v27 = vpop.f32.mrf.mxu2  ;;  %v2649_v30 = vpop.f32.mrf.mxu3 }
 0xa9d   :  { %v2656_v35 = vadd.f32 %v2649_v30, %v526_v26  ;;  %v2612_v40 = vpop.f32.mrf.mxu0  ;;  %v2625_v42 = vpop.f32.mrf.mxu1  ;;  %v2655_v56 = vadd.f32 %v2636_v27, %v477_v50 }
 0xa9e   :  { %v4765_v42 = vld [vmem:[#allocation68_spill] sm:$0xff] }
 0xa9f   :  { %v3220_v45 = vmul.f32 -1.442695, %v2656_v35 }
 0xaa0   :  { %v3529_v54 = vpop.eup %3528 }
 0xaa1   :  { %v3531_v61 = vpop.eup %3530  ;;  %v2660_v62 = vadd.f32 1.0, %v3529_v54  ;;  %3532 = vpow2.f32 %v3220_v45  ;;  %v528_v45 = vadd.f32 %v4765_v42, %v3996_v0 }
 0xaa2   :  { %v2679_v2 = vadd.f32 1.0, %v3531_v61 }
 0xaa3   :  { %3534 = vrcp.f32 %v2660_v62  ;;  %v2672_v58 = vand.u32 2147483648, %v2660_v62  ;;  %v2670_v46 = vand.u32 2147483647, %v2660_v62  ;;  %vm2666_vm10 = vweird.f32 %v2660_v62 }
 0xaa4   :  { %3536 = vrcp.f32 %v2679_v2  ;;  %v2638_v10 = vpop.f32.mrf.mxu2  ;;  %v2651_v16 = vpop.f32.mrf.mxu3  ;;  %v2691_v15 = vand.u32 2147483648, %v2679_v2  ;;  %v2689_v53 = vand.u32 2147483647, %v2679_v2  ;;  %vm2685_vm11 = vweird.f32 %v2679_v2 }
 0xaa5   :  { %v2673_v33 = vor.u32 1.1754944e-38, %v2672_v58  ;;  %vm2671_vm14 = vcmp.eq.f32.partialorder %v2670_v46, 8.507059e+37 }
 0xaa6   :  { %v2692_v34 = vor.u32 1.1754944e-38, %v2691_v15  ;;  %vm2690_vm15 = vcmp.eq.f32.partialorder %v2689_v53, 8.507059e+37 }
 0xaa7   :  { %v3533_v18 = vpop.eup %3532 }
 0xaa8   :  { %v2699_v21 = vadd.f32 1.0, %v3533_v18 }
 0xaa9   :  { %v3535_v1 = vpop.eup %3534 }
 0xaaa   :  { %v3537_v51 = vpop.eup %3536  ;;  %v2662_v25 = vmul.f32 %v3535_v1, %v2660_v62  ;;  %3538 = vrcp.f32 %v2699_v21  ;;  %vm2667_vm8 = vweird.f32 %v3535_v1  ;;  %v2711_v55 = vand.u32 2147483648, %v2699_v21 }
 0xaab   :  { %v2681_v44 = vmul.f32 %v3537_v51, %v2679_v2  ;;  %3540 = vtanh.f32 %v2655_v56  ;;  %vm2686_vm9 = vweird.f32 %v3537_v51  ;;  %vm2668_vm12 = vmor %vm2666_vm10, %vm2667_vm8  ;;  %vm2705_vm1 = vweird.f32 %v2699_v21  ;;  %v4766_v56 = vld [vmem:[#allocation67_spill] sm:$0xff] }
 0xaac   :  { %v2663_v12 = vsub.f32 1.0, %v2662_v25  ;;  %vm2687_vm13 = vmor %vm2685_vm11, %vm2686_vm9  ;;  %v2709_v6 = vand.u32 2147483647, %v2699_v21  ;;  %v2712_v60 = vor.u32 1.1754944e-38, %v2711_v55  ;;  %v479_v0 = vadd.f32 %v4766_v56, %v4000_v5 }
 0xaad   :  { %v2682_v7 = vsub.f32 1.0, %v2681_v44 }
 0xaae   :  { %v2664_v11 = vmul.f32 %v3535_v1, %v2663_v12  ;;  %vm2710_vm3 = vcmp.eq.f32.partialorder %v2709_v6, 8.507059e+37 }
 0xaaf   :  { %v2683_v57 = vmul.f32 %v3537_v51, %v2682_v7 }
 0xab0   :  { %v3539_v39 = vpop.eup %3538  ;;  %v2665_v43 = vadd.f32 %v3535_v1, %v2664_v11 }
 0xab1   :  { %v2684_v31 = vadd.f32 %v3537_v51, %v2683_v57  ;;  %v2701_v28 = vmul.f32 %v3539_v39, %v2699_v21  ;;  %v3541_v20 = vpop.eup %3540  ;;  %vm2706_vm0 = vweird.f32 %v3539_v39 }
 0xab2   :  { %v2669_v8 = vsel %vm2668_vm12, %v3535_v1, %v2665_v43  ;;  %vm2707_vm2 = vmor %vm2705_vm1, %vm2706_vm0 }
 0xab3   :  { %v2674_v36 = vsel %vm2671_vm14, %v2673_v33, %v2669_v8  ;;  %v2688_v19 = vsel %vm2687_vm13, %v3537_v51, %v2684_v31  ;;  %v2702_v38 = vsub.f32 1.0, %v2701_v28 }
 0xab4   :  { %v2693_v37 = vsel %vm2690_vm15, %v2692_v34, %v2688_v19  ;;  %v2716_v41 = vmul.f32 %v3541_v20, %v2674_v36 }
 0xab5   :  { %v2715_v47 = vmul.f32 %v2693_v37, %v4615_v32  ;;  %v2703_v48 = vmul.f32 %v3539_v39, %v2702_v38  ;;  %v4763_v32 = vld [vmem:[#allocation65_spill] sm:$0xff] }
 0xab6   :  { %v381_v13 = vadd.f32 %v4763_v32, %v3984_v24 }
 0xab7   :  { %v4630_v49 = vadd.f32 %v2716_v41, %v2715_v47  ;;  %v2704_v52 = vadd.f32 %v3539_v39, %v2703_v48 }
 0xab9   :  { %3542 = vtanh.f32 %v4630_v49  ;;  %v2708_v59 = vsel %vm2707_vm2, %v3539_v39, %v2704_v52 }
 0xaba   :  { %v2713_v3 = vsel %vm2710_vm3, %v2712_v60, %v2708_v59 }
 0xabf   :  { %v3543_v63 = vpop.eup %3542 }
 0xac0   :  { %v2719_v4 = vmul.f32 %v3543_v63, %v2713_v3 }
 0xac2   :  { %v2720_v9 = vpack.c.bf16 %v2719_v4, %v2719_v4 }
 0xac4   :  { %3221 = vst [vmem:[%s4652_s4 + $0x38] sm:$0xf] %v2720_v9  ;;  %2738 = vmatmul.bf16.vlgmr.msra.gmra.mxu0 %v2720_v9  ;;  %2751 = vmatmul.bf16.vlgmr.msra.gmra.mxu1 %v2720_v9 }
 0xac5   :  { %2764 = vmatmul.bf16.vlgmr.msra.gmra.mxu2 %v2720_v9  ;;  %2777 = vmatmul.bf16.vlgmr.msra.gmra.mxu3 %v2720_v9 }
 0xb41   :  { %v2739_v22 = vpop.f32.mrf.mxu0  ;;  %v2752_v26 = vpop.f32.mrf.mxu1 }
 0xb42   :  { %v2782_v27 = vadd.f32 %v2739_v22, %v381_v13  ;;  %v2783_v30 = vadd.f32 %v2752_v26, %v430_v17 }
 0xb44   :  { %v3222_v35 = vmul.f32 -1.442695, %v2782_v27  ;;  %v3223_v40 = vmul.f32 -1.442695, %v2783_v30 }
 0xb46   :  { %3544 = vpow2.f32 %v3222_v35 }
 0xb47   :  { %3546 = vpow2.f32 %v3223_v40 }
 0xb48   :  { %v2765_v54 = vpop.f32.mrf.mxu2  ;;  %v2778_v61 = vpop.f32.mrf.mxu3 }
 0xb49   :  { %v2785_v62 = vadd.f32 %v2778_v61, %v528_v45  ;;  %v2741_v2 = vpop.f32.mrf.mxu0  ;;  %v2754_v10 = vpop.f32.mrf.mxu1  ;;  %v2784_v44 = vadd.f32 %v2765_v54, %v479_v0 }
 0xb4b   :  { %v3224_v24 = vmul.f32 -1.442695, %v2785_v62 }
 0xb4c   :  { %v3545_v16 = vpop.eup %3544 }
 0xb4d   :  { %v3547_v18 = vpop.eup %3546  ;;  %v2789_v29 = vadd.f32 1.0, %v3545_v16  ;;  %3548 = vpow2.f32 %v3224_v24 }
 0xb4e   :  { %v2808_v23 = vadd.f32 1.0, %v3547_v18 }
 0xb4f   :  { %3550 = vrcp.f32 %v2789_v29  ;;  %v2801_v46 = vand.u32 2147483648, %v2789_v29  ;;  %v2799_v39 = vand.u32 2147483647, %v2789_v29  ;;  %vm2795_vm6 = vweird.f32 %v2789_v29 }
 0xb50   :  { %3552 = vrcp.f32 %v2808_v23  ;;  %v2767_v50 = vpop.f32.mrf.mxu2  ;;  %v2780_v21 = vpop.f32.mrf.mxu3  ;;  %v2820_v57 = vand.u32 2147483648, %v2808_v23  ;;  %v2818_v33 = vand.u32 2147483647, %v2808_v23  ;;  %vm2814_vm7 = vweird.f32 %v2808_v23 }
 0xb51   :  { %v2802_v28 = vor.u32 1.1754944e-38, %v2801_v46  ;;  %vm2800_vm10 = vcmp.eq.f32.partialorder %v2799_v39, 8.507059e+37 }
 0xb52   :  { %v2821_v20 = vor.u32 1.1754944e-38, %v2820_v57  ;;  %vm2819_vm11 = vcmp.eq.f32.partialorder %v2818_v33, 8.507059e+37 }
 0xb53   :  { %v3549_v1 = vpop.eup %3548 }
 0xb54   :  { %v2828_v51 = vadd.f32 1.0, %v3549_v1 }
 0xb55   :  { %v3551_v25 = vpop.eup %3550 }
 0xb56   :  { %v3553_v12 = vpop.eup %3552  ;;  %v2791_v7 = vmul.f32 %v3551_v25, %v2789_v29  ;;  %3554 = vrcp.f32 %v2828_v51  ;;  %vm2796_vm4 = vweird.f32 %v3551_v25  ;;  %v2840_v60 = vand.u32 2147483648, %v2828_v51 }
 0xb57   :  { %v2810_v58 = vmul.f32 %v3553_v12, %v2808_v23  ;;  %3556 = vtanh.f32 %v2784_v44  ;;  %vm2815_vm5 = vweird.f32 %v3553_v12  ;;  %vm2797_vm8 = vmor %vm2795_vm6, %vm2796_vm4  ;;  %vm2834_vm13 = vweird.f32 %v2828_v51 }
 0xb58   :  { %v2792_v15 = vsub.f32 1.0, %v2791_v7  ;;  %vm2816_vm9 = vmor %vm2814_vm7, %vm2815_vm5  ;;  %v2838_v63 = vand.u32 2147483647, %v2828_v51  ;;  %v2841_v4 = vor.u32 1.1754944e-38, %v2840_v60 }
 0xb59   :  { %v2811_v11 = vsub.f32 1.0, %v2810_v58 }
 0xb5a   :  { %v2793_v53 = vmul.f32 %v3551_v25, %v2792_v15  ;;  %vm2839_vm15 = vcmp.eq.f32.partialorder %v2838_v63, 8.507059e+37 }
 0xb5b   :  { %v2812_v43 = vmul.f32 %v3553_v12, %v2811_v11 }
 0xb5c   :  { %v3555_v31 = vpop.eup %3554  ;;  %v2794_v5 = vadd.f32 %v3551_v25, %v2793_v53 }
 0xb5d   :  { %v2813_v34 = vadd.f32 %v3553_v12, %v2812_v43  ;;  %v2830_v8 = vmul.f32 %v3555_v31, %v2828_v51  ;;  %v3557_v19 = vpop.eup %3556  ;;  %vm2835_vm12 = vweird.f32 %v3555_v31 }
 0xb5e   :  { %v2798_v36 = vsel %vm2797_vm8, %v3551_v25, %v2794_v5  ;;  %vm2836_vm14 = vmor %vm2834_vm13, %vm2835_vm12 }
 0xb5f   :  { %v2803_v38 = vsel %vm2800_vm10, %v2802_v28, %v2798_v36  ;;  %v2817_v37 = vsel %vm2816_vm9, %v3553_v12, %v2813_v34  ;;  %v2831_v41 = vsub.f32 1.0, %v2830_v8 }
 0xb60   :  { %v2822_v47 = vsel %vm2819_vm11, %v2821_v20, %v2817_v37  ;;  %v2845_v48 = vmul.f32 %v3557_v19, %v2803_v38 }
 0xb61   :  { %v2844_v52 = vmul.f32 %v2822_v47, %v4630_v49  ;;  %v2832_v55 = vmul.f32 %v3555_v31, %v2831_v41 }
 0xb63   :  { %v2846_v6 = vadd.f32 %v2845_v48, %v2844_v52  ;;  %v2833_v59 = vadd.f32 %v3555_v31, %v2832_v55 }
 0xb65   :  { %3558 = vtanh.f32 %v2846_v6  ;;  %v2837_v3 = vsel %vm2836_vm14, %v3555_v31, %v2833_v59 }
 0xb66   :  { %v2842_v32 = vsel %vm2839_vm15, %v2841_v4, %v2837_v3 }
 0xb6b   :  { %v3559_v9 = vpop.eup %3558 }
 0xb6c   :  { %v2848_v13 = vmul.f32 %v3559_v9, %v2842_v32 }
 0xb6e   :  { %v2849_v14 = vpack.c.bf16 %v2848_v13, %v2848_v13 }
 0xb70   :  { %3225 = vst [vmem:[%s4652_s4 + $0x3c] sm:$0xf] %v2849_v14 }
 0xb71   :  { %2858 = vsyncpa [#allocation6], 1 }
 0xb72   :  { %2859 = vsyncpa [#allocation8], 1 }

</bundles_post_ra>
